<compile_context>
chip_gen: v5e
topology: v5e:2x2
jax: 0.10.0
libtpu: 0.0.40
codegen_flags: <defaults>
</compile_context>

<pallas_src>
import jax
import jax.numpy as jnp
from jax import lax
from jax.experimental import pallas as pl
from jax.experimental.pallas import tpu as pltpu

_VMEM_LIMIT = 32 * 1024 * 1024   # scoped-VMEM cap, safe on v5e / v6e / v7x
_LANE = 128
_SUBLANE = 8
_MRF_TQ = 128                    # synthesis-patch tile
_MRF_TS = 128                    # style-patch tile


def _round_up(x, m):
    return (x + m - 1) // m * m


# ----------------------------------------------------------------------------
# Fused conv3x3+ReLU backbone (single pallas_call, activation stays on-chip)
# ----------------------------------------------------------------------------

def _make_backbone_kernel(num_layers, tap_layers, wp, c, pflat):
    """conv chain on a flat zero-padded (C, Pflat) activation.

    For output (padded) position q, tap (dh, dw) reads position q + (dh-1)*Wp +
    (dw-1); because the padded ring (kept at zero every layer) absorbs the
    shift, a circular lane roll never wraps into valid positions.
    """
    tap_pos = {layer: k for k, layer in enumerate(tap_layers)}
    shifts = [(dh - 1) * wp + (dw - 1) for dh in range(3) for dw in range(3)]

    def kernel(mask_ref, w_ref, b_ref, x_ref, *rest):
        tap_refs = rest[:-1]
        col_scr = rest[-1]                       # (9C, Pflat) f32 VMEM scratch
        mask = mask_ref[...]                     # (1, Pflat) interior mask
        a = x_ref[...]                           # (C, Pflat) f32, zero ring/tail
        for l in range(num_layers):
            # fused im2col: 9 lane-rolled copies (XLU), 8-row aligned stores
            for t, s in enumerate(shifts):
                sh = a if s == 0 else pltpu.roll(a, shift=(-s) % pflat, axis=1)
                col_scr[t * c:(t + 1) * c, :] = sh
            im2col = col_scr[...].astype(jnp.bfloat16)        # (9C, Pflat)
            acc = jnp.dot(w_ref[l], im2col,
                          preferred_element_type=jnp.float32)  # (C, Pflat) lane-dense
            a = jnp.maximum(acc + b_ref[l], 0.0) * mask         # ReLU, re-zero pad ring
            if l in tap_pos:
                tap_refs[tap_pos[l]][...] = a

    return kernel


def run_backbone(image, w_all, b_all, tap_layers):
    """Run the first max(tap_layers)+1 conv3x3('same')+ReLU layers in one kernel.

    image: (N, Cin, H, W) with Cin <= C.  Returns one (N, C, H, W) feature map
    per tap layer.
    """
    n, cin, h, w = image.shape
    c = w_all.shape[1]
    num_layers = max(tap_layers) + 1
    hp, wp = h + 2, w + 2
    pimg = hp * wp
    pflat = _round_up(pimg, _LANE)

    # zero-pad channels to C, spatial ring of 1, flatten, pad tail to 128 lanes
    x = jnp.pad(image.astype(jnp.float32),
                ((0, 0), (0, c - cin), (1, 1), (1, 1)))
    x = x.reshape(n, c, pimg)
    x = jnp.pad(x, ((0, 0), (0, 0), (0, pflat - pimg)))

    mask = jnp.zeros((hp, wp), jnp.float32).at[1:h + 1, 1:w + 1].set(1.0)
    mask = jnp.pad(mask.reshape(1, pimg), ((0, 0), (0, pflat - pimg)))

    w_l = w_all[:num_layers]                     # (L, C, 9C) bf16
    b_l = b_all[:num_layers]                     # (L, C, 1)  f32

    kernel = _make_backbone_kernel(num_layers, list(tap_layers), wp, c, pflat)
    out_shape = tuple(jax.ShapeDtypeStruct((n, c, pflat), jnp.float32)
                      for _ in tap_layers)
    outs = pl.pallas_call(
        kernel,
        grid=(n,),
        in_specs=[
            pl.BlockSpec((1, pflat), lambda i: (0, 0)),                 # mask
            pl.BlockSpec((num_layers, c, 9 * c), lambda i: (0, 0, 0)),  # weights
            pl.BlockSpec((num_layers, c, 1), lambda i: (0, 0, 0)),      # biases
            pl.BlockSpec((None, c, pflat), lambda i: (i, 0, 0)),        # image
        ],
        out_specs=tuple(pl.BlockSpec((None, c, pflat), lambda i: (i, 0, 0))
                        for _ in tap_layers),
        out_shape=out_shape,
        scratch_shapes=[pltpu.VMEM((9 * c, pflat), jnp.float32)],
        compiler_params=pltpu.CompilerParams(
            dimension_semantics=("parallel",),
            vmem_limit_bytes=_VMEM_LIMIT),
    )(mask, w_l, b_l, x)
    if not isinstance(outs, (tuple, list)):
        outs = (outs,)

    feats = []
    for o in outs:
        f = o[:, :, :pimg].reshape(n, c, hp, wp)[:, :, 1:h + 1, 1:w + 1]
        feats.append(f)
    return feats


# ----------------------------------------------------------------------------
# TV loss (grid over the N*C planes, accumulated into a (1,1) output)
# ----------------------------------------------------------------------------

def _tv_kernel(x_ref, o_ref):
    @pl.when(pl.program_id(0) == 0)
    def _():
        o_ref[...] = jnp.zeros_like(o_ref)

    x = x_ref[...]                               # (H, W)
    # TODO(synk): for large images replace the misaligned slices with
    # pltpu.roll (+ edge mask) so the shift runs on the XLU.
    hd = x[1:, :] - x[:-1, :]
    wd = x[:, 1:] - x[:, :-1]
    o_ref[...] += jnp.sum(jnp.abs(hd)) + jnp.sum(jnp.abs(wd))


def tv_loss(x):
    n, c, h, w = x.shape
    out = pl.pallas_call(
        _tv_kernel,
        grid=(n * c,),
        in_specs=[pl.BlockSpec((None, h, w), lambda i: (i, 0, 0))],
        out_specs=pl.BlockSpec((1, 1), lambda i: (0, 0)),
        out_shape=jax.ShapeDtypeStruct((1, 1), jnp.float32),
        compiler_params=pltpu.CompilerParams(
            dimension_semantics=("arbitrary",),
            vmem_limit_bytes=_VMEM_LIMIT),
    )(x.reshape(n * c, h, w))
    return out[0, 0]


# ----------------------------------------------------------------------------
# Content loss: mean squared error, tiled over rows with scalar accumulation
# ----------------------------------------------------------------------------

def _sqdiff_kernel(x_ref, t_ref, o_ref):
    @pl.when(pl.program_id(0) == 0)
    def _():
        o_ref[...] = jnp.zeros_like(o_ref)

    d = x_ref[...] - t_ref[...]
    o_ref[...] += jnp.sum(d * d)


def content_mse(x, target, row_tile=128):
    n, c, h, w = x.shape
    rows = n * c * h
    rpad = _round_up(rows, row_tile)
    x2 = jnp.pad(x.reshape(rows, w), ((0, rpad - rows), (0, 0)))
    t2 = jnp.pad(target.reshape(rows, w), ((0, rpad - rows), (0, 0)))
    out = pl.pallas_call(
        _sqdiff_kernel,
        grid=(rpad // row_tile,),
        in_specs=[pl.BlockSpec((row_tile, w), lambda i: (i, 0)),
                  pl.BlockSpec((row_tile, w), lambda i: (i, 0))],
        out_specs=pl.BlockSpec((1, 1), lambda i: (0, 0)),
        out_shape=jax.ShapeDtypeStruct((1, 1), jnp.float32),
        compiler_params=pltpu.CompilerParams(
            dimension_semantics=("arbitrary",),
            vmem_limit_bytes=_VMEM_LIMIT),
    )(x2, t2)
    return out[0, 0] / float(rows * w)


# ----------------------------------------------------------------------------
# MRF style loss: blocked (Nq, Ns) grid, online argmax carry in VMEM scratch
# ----------------------------------------------------------------------------

def _make_mrf_kernel(nq_real, ns_real, k_real, tq, ts):
    def kernel(q_ref, s_ref, ssq_ref, sinv_ref, o_ref, m_scr, bd_scr, bs_scr):
        qi = pl.program_id(0)
        si = pl.program_id(1)

        @pl.when(si == 0)
        def _():
            m_scr[...] = jnp.full((tq, 1), -jnp.inf, jnp.float32)
            bd_scr[...] = jnp.zeros((tq, 1), jnp.float32)
            bs_scr[...] = jnp.zeros((tq, 1), jnp.float32)
            o_ref[...] = jnp.zeros_like(o_ref)

        q = q_ref[...]                                    # (tq, Kpad) bf16
        s = s_ref[...]                                    # (ts, Kpad) bf16
        dots = lax.dot_general(q, s, (((1,), (1,)), ((), ())),
                               preferred_element_type=jnp.float32)   # (tq, ts)
        resp = dots * sinv_ref[...]                       # normalized x-correlation
        col = lax.broadcasted_iota(jnp.int32, (1, ts), 1) + si * ts
        resp = jnp.where(col < ns_real, resp, -1e30)      # mask padded style cols

        tile_max = jnp.max(resp, axis=1, keepdims=True)   # (tq, 1)
        cols2d = lax.broadcasted_iota(jnp.int32, (tq, ts), 1)
        first = jnp.min(jnp.where(resp >= tile_max, cols2d, ts),
                        axis=1, keepdims=True)            # first max in this tile
        onehot = (cols2d == first).astype(jnp.float32)
        tile_dot = jnp.sum(dots * onehot, axis=1, keepdims=True)
        tile_ssq = jnp.sum(ssq_ref[...] * onehot, axis=1, keepdims=True)

        upd = tile_max > m_scr[...]                       # strict > keeps first match
        m_scr[...] = jnp.where(upd, tile_max, m_scr[...])
        bd_scr[...] = jnp.where(upd, tile_dot, bd_scr[...])
        bs_scr[...] = jnp.where(upd, tile_ssq, bs_scr[...])

        @pl.when(si == pl.num_programs(1) - 1)
        def _():
            qf = q.astype(jnp.float32)
            q_sq = jnp.sum(qf * qf, axis=1, keepdims=True)
            rows = lax.broadcasted_iota(jnp.int32, (tq, 1), 0) + qi * tq
            valid = (rows < nq_real).astype(jnp.float32)  # drop padded q rows
            per = (q_sq - 2.0 * bd_scr[...] + bs_scr[...]) * valid
            o_ref[0, 0] = jnp.sum(per) / (float(k_real) * float(nq_real))

    return kernel


def prep_style_bank(style_patches, ts=_MRF_TS):
    """Pad/cast the constant style patch bank and precompute its (reciprocal) norms."""
    ns, k = style_patches.shape
    kpad = _round_up(k, _LANE)
    nspad = _round_up(ns, ts)
    s = jnp.pad(style_patches.astype(jnp.float32), ((0, nspad - ns), (0, kpad - k)))
    s_bf = s.astype(jnp.bfloat16)
    sf = s_bf.astype(jnp.float32)
    s_sq = jnp.sum(sf * sf, axis=1).reshape(1, nspad)
    # guard against all-zero patches (torch would divide by zero here)
    s_inv = 1.0 / jnp.sqrt(jnp.maximum(s_sq, 1e-12))
    return {"s": s_bf, "s_sq": s_sq, "s_inv": s_inv, "ns": ns, "k": k}


def mrf_style_loss(synth_patches, bank, tq=_MRF_TQ, ts=_MRF_TS):
    nq, k = synth_patches.shape
    assert k == bank["k"]
    kpad = bank["s"].shape[1]
    nqpad = _round_up(nq, tq)
    q = jnp.pad(synth_patches.astype(jnp.float32),
                ((0, nqpad - nq), (0, kpad - k))).astype(jnp.bfloat16)
    n_qt = nqpad // tq
    n_st = bank["s"].shape[0] // ts
    kernel = _make_mrf_kernel(nq, bank["ns"], bank["k"], tq, ts)
    out = pl.pallas_call(
        kernel,
        grid=(n_qt, n_st),
        in_specs=[
            pl.BlockSpec((tq, kpad), lambda qi, si: (qi, 0)),   # synthesis patches
            pl.BlockSpec((ts, kpad), lambda qi, si: (si, 0)),   # style patches
            pl.BlockSpec((1, ts), lambda qi, si: (0, si)),      # ||s||^2
            pl.BlockSpec((1, ts), lambda qi, si: (0, si)),      # 1/||s||
        ],
        out_specs=pl.BlockSpec((None, _SUBLANE, _LANE), lambda qi, si: (qi, 0, 0)),
        out_shape=jax.ShapeDtypeStruct((n_qt, _SUBLANE, _LANE), jnp.float32),
        scratch_shapes=[pltpu.VMEM((tq, 1), jnp.float32),   # running max response
                        pltpu.VMEM((tq, 1), jnp.float32),   # matched <q,s>
                        pltpu.VMEM((tq, 1), jnp.float32)],  # matched ||s||^2
        compiler_params=pltpu.CompilerParams(
            dimension_semantics=("parallel", "arbitrary"),
            vmem_limit_bytes=_VMEM_LIMIT),
    )(q, bank["s"], bank["s_sq"], bank["s_inv"])
    return jnp.sum(out)


# ----------------------------------------------------------------------------
# Patch extraction (9 strided slices instead of one slice per patch position)
# ----------------------------------------------------------------------------

def extract_patches(feat, patch_size, stride):
    """feat: (1, C, H, W) -> (Npatches, C*patch_size*patch_size)."""
    n, c, h, w = feat.shape
    ho = (h - patch_size) // stride + 1
    wo = (w - patch_size) // stride + 1
    pieces = []
    for dh in range(patch_size):
        for dw in range(patch_size):
            pieces.append(feat[:, :,
                               dh:dh + (ho - 1) * stride + 1:stride,
                               dw:dw + (wo - 1) * stride + 1:stride])
    p = jnp.stack(pieces, axis=2)                               # (n, c, k*k, ho, wo)
    p = p.transpose(0, 3, 4, 1, 2).reshape(n * ho * wo, c * patch_size * patch_size)
    return p


# ----------------------------------------------------------------------------
# CNNMRF (Pallas version)
# ----------------------------------------------------------------------------

class CNNMRFPallas:
    def __init__(self, style_image, content_image, content_weight, style_weight,
                 tv_weight, gpu_chunck_size=256, mrf_style_stride=2,
                 mrf_synthesis_stride=2, num_layers=15, feat_channels=8):
        self.content_weight = float(content_weight)
        self.style_weight = float(style_weight)
        self.tv_weight = float(tv_weight)
        self.patch_size = 3
        self.mrf_style_stride = mrf_style_stride
        self.mrf_synthesis_stride = mrf_synthesis_stride
        self.style_layers = [7, 9]
        self.content_layers = [14]
        # gpu_chunck_size is a GPU memory workaround; the MRF kernel here is
        # tiled into (TQ x TS) VMEM blocks instead, so it is intentionally unused.
        del gpu_chunck_size

        # deterministic stand-in backbone (replaces pretrained inception_v3)
        cin = style_image.shape[1]
        assert feat_channels >= cin
        c = feat_channels
        key = jax.random.PRNGKey(0)
        w_list, b_list = [], []
        cin_l = cin
        for _ in range(num_layers):
            key, wk = jax.random.split(key)
            wl = jax.random.normal(wk, (c, cin_l, 3, 3), jnp.float32)
            wl = wl * jnp.sqrt(2.0 / (cin_l * 9))
            wl = jnp.pad(wl, ((0, 0), (0, c - cin_l), (0, 0), (0, 0)))
            # weight columns match the im2col row order: (tap=(dh,dw), channel)
            w_list.append(wl.transpose(0, 2, 3, 1).reshape(c, 9 * c))
            b_list.append(jnp.zeros((c, 1), jnp.float32))
            cin_l = c
        self.w_all = jnp.stack(w_list, axis=0).astype(jnp.bfloat16)   # (L, C, 9C)
        self.b_all = jnp.stack(b_list, axis=0)                         # (L, C, 1)

        self.update_style_and_content_image(style_image, content_image)

    def update_style_and_content_image(self, style_image, content_image):
        # style targets: normalized 3x3 patch banks at layers 7 and 9
        style_feats = run_backbone(style_image, self.w_all, self.b_all,
                                   self.style_layers)
        self.style_banks = [
            prep_style_bank(extract_patches(f, self.patch_size, self.mrf_style_stride))
            for f in style_feats]
        # content targets: feature map at layer 14
        content_feats = run_backbone(content_image, self.w_all, self.b_all,
                                     self.content_layers)
        self.content_targets = list(content_feats)
        # rebuild the jitted loss (targets are baked in as trace-time constants)
        self._loss_jit = jax.jit(self._loss_impl)

    def _loss_impl(self, synthesis):
        tv_score = tv_loss(synthesis)              # TVLoss sits first in the model
        tap_layers = sorted(set(self.style_layers + self.content_layers))
        feats = run_backbone(synthesis, self.w_all, self.b_all, tap_layers)
        feat_by_layer = dict(zip(tap_layers, feats))

        style_score = jnp.float32(0.0)
        for layer, bank in zip(self.style_layers, self.style_banks):
            q = extract_patches(feat_by_layer[layer], self.patch_size,
                                self.mrf_synthesis_stride)
            style_score = style_score + mrf_style_loss(q, bank)

        content_score = jnp.float32(0.0)
        for layer, tgt in zip(self.content_layers, self.content_targets):
            content_score = content_score + content_mse(feat_by_layer[layer], tgt)

        return (self.style_weight * style_score
                + self.content_weight * content_score
                + self.tv_weight * tv_score)

    def forward(self, synthesis):
        return self._loss_jit(synthesis)


# ----------------------------------------------------------------------------
# main
# ----------------------------------------------------------------------------

if __name__ == "__main__":
    key = jax.random.PRNGKey(0)
    k1, k2, k3 = jax.random.split(key, 3)
    N, C, H, W = 1, 3, 16, 16
    style_image = jax.random.uniform(k1, (N, C, H, W), jnp.float32)
    content_image = jax.random.uniform(k2, (N, C, H, W), jnp.float32)
    synthesis = jax.random.uniform(k3, (N, C, H, W), jnp.float32)

    model = CNNMRFPallas(style_image, content_image,
                         content_weight=1.0, style_weight=0.5, tv_weight=1e-3)
    loss = model.forward(synthesis)
    loss = jax.block_until_ready(loss)
    assert jnp.isfinite(loss), "loss is not finite"
    print("KERNEL_OK")
</pallas_src>

<mosaic_0001>
module attributes {stable_mosaic.version = 11 : i64} {
  func.func @kernel(%arg0: i32, %arg1: memref<1x384xf32, #tpu.memory_space<vmem>>, %arg2: memref<10x8x72xbf16, #tpu.memory_space<vmem>>, %arg3: memref<10x8x1xf32, #tpu.memory_space<vmem>>, %arg4: memref<1x8x384xf32, #tpu.memory_space<vmem>>, %arg5: memref<1x8x384xf32, #tpu.memory_space<vmem>>, %arg6: memref<1x8x384xf32, #tpu.memory_space<vmem>>, %arg7: memref<72x384xf32, #tpu.memory_space<vmem>>) attributes {dimension_semantics = [#tpu.dimension_semantics<parallel>], iteration_bounds = array<i64: 1>, scalar_prefetch = 0 : i64, scratch_operands = 1 : i64, tpu.core_type = #tpu.core_type<tc>, window_params = [{pipeline_mode = #tpu.pipeline_mode<synchronous>, transform_indices = @transform_0, window_bounds = array<i64: 1, 384>}, {pipeline_mode = #tpu.pipeline_mode<synchronous>, transform_indices = @transform_1, window_bounds = array<i64: 10, 8, 72>}, {pipeline_mode = #tpu.pipeline_mode<synchronous>, transform_indices = @transform_2, window_bounds = array<i64: 10, 8, 1>}, {transform_indices = @transform_3, window_bounds = array<i64: 1, 8, 384>}, {transform_indices = @transform_4, window_bounds = array<i64: 1, 8, 384>}, {transform_indices = @transform_5, window_bounds = array<i64: 1, 8, 384>}]} {
    %c0 = arith.constant 0 : index
    %c0_0 = arith.constant 0 : index
    %0 = vector.load %arg1[%c0, %c0_0] : memref<1x384xf32, #tpu.memory_space<vmem>>, vector<1x384xf32>
    %c0_1 = arith.constant 0 : index
    %c0_2 = arith.constant 0 : index
    %c0_3 = arith.constant 0 : index
    %1 = vector.load %arg4[%c0_1, %c0_2, %c0_3] : memref<1x8x384xf32, #tpu.memory_space<vmem>>, vector<1x8x384xf32>
    %2 = vector.shape_cast %1 : vector<1x8x384xf32> to vector<8x384xf32>
    %c19_i32 = arith.constant 19 : i32
    %3 = tpu.dynamic_rotate %2 by %c19_i32 dim 1 : vector<8x384xf32>, i32 -> vector<8x384xf32>
    %c0_4 = arith.constant 0 : index
    %c0_5 = arith.constant 0 : index
    %4 = vector.load %arg7[%c0_4, %c0_5] : memref<72x384xf32, #tpu.memory_space<vmem>>, vector<8x384xf32>
    tpu.vector_store %arg7[%c0_4, %c0_5], %3 {strides = array<i32>} : memref<72x384xf32, #tpu.memory_space<vmem>>, vector<8x384xf32>,
    %c18_i32 = arith.constant 18 : i32
    %5 = tpu.dynamic_rotate %2 by %c18_i32 dim 1 : vector<8x384xf32>, i32 -> vector<8x384xf32>
    %c8 = arith.constant 8 : index
    %c0_6 = arith.constant 0 : index
    %6 = vector.load %arg7[%c8, %c0_6] : memref<72x384xf32, #tpu.memory_space<vmem>>, vector<8x384xf32>
    tpu.vector_store %arg7[%c8, %c0_6], %5 {strides = array<i32>} : memref<72x384xf32, #tpu.memory_space<vmem>>, vector<8x384xf32>,
    %c17_i32 = arith.constant 17 : i32
    %7 = tpu.dynamic_rotate %2 by %c17_i32 dim 1 : vector<8x384xf32>, i32 -> vector<8x384xf32>
    %c16 = arith.constant 16 : index
    %c0_7 = arith.constant 0 : index
    %8 = vector.load %arg7[%c16, %c0_7] : memref<72x384xf32, #tpu.memory_space<vmem>>, vector<8x384xf32>
    tpu.vector_store %arg7[%c16, %c0_7], %7 {strides = array<i32>} : memref<72x384xf32, #tpu.memory_space<vmem>>, vector<8x384xf32>,
    %c1_i32 = arith.constant 1 : i32
    %9 = tpu.dynamic_rotate %2 by %c1_i32 dim 1 : vector<8x384xf32>, i32 -> vector<8x384xf32>
    %c24 = arith.constant 24 : index
    %c0_8 = arith.constant 0 : index
    %10 = vector.load %arg7[%c24, %c0_8] : memref<72x384xf32, #tpu.memory_space<vmem>>, vector<8x384xf32>
    tpu.vector_store %arg7[%c24, %c0_8], %9 {strides = array<i32>} : memref<72x384xf32, #tpu.memory_space<vmem>>, vector<8x384xf32>,
    %c32 = arith.constant 32 : index
    %c0_9 = arith.constant 0 : index
    %11 = vector.load %arg7[%c32, %c0_9] : memref<72x384xf32, #tpu.memory_space<vmem>>, vector<8x384xf32>
    tpu.vector_store %arg7[%c32, %c0_9], %2 {strides = array<i32>} : memref<72x384xf32, #tpu.memory_space<vmem>>, vector<8x384xf32>,
    %c383_i32 = arith.constant 383 : i32
    %12 = tpu.dynamic_rotate %2 by %c383_i32 dim 1 : vector<8x384xf32>, i32 -> vector<8x384xf32>
    %c40 = arith.constant 40 : index
    %c0_10 = arith.constant 0 : index
    %13 = vector.load %arg7[%c40, %c0_10] : memref<72x384xf32, #tpu.memory_space<vmem>>, vector<8x384xf32>
    tpu.vector_store %arg7[%c40, %c0_10], %12 {strides = array<i32>} : memref<72x384xf32, #tpu.memory_space<vmem>>, vector<8x384xf32>,
    %c367_i32 = arith.constant 367 : i32
    %14 = tpu.dynamic_rotate %2 by %c367_i32 dim 1 : vector<8x384xf32>, i32 -> vector<8x384xf32>
    %c48 = arith.constant 48 : index
    %c0_11 = arith.constant 0 : index
    %15 = vector.load %arg7[%c48, %c0_11] : memref<72x384xf32, #tpu.memory_space<vmem>>, vector<8x384xf32>
    tpu.vector_store %arg7[%c48, %c0_11], %14 {strides = array<i32>} : memref<72x384xf32, #tpu.memory_space<vmem>>, vector<8x384xf32>,
    %c366_i32 = arith.constant 366 : i32
    %16 = tpu.dynamic_rotate %2 by %c366_i32 dim 1 : vector<8x384xf32>, i32 -> vector<8x384xf32>
    %c56 = arith.constant 56 : index
    %c0_12 = arith.constant 0 : index
    %17 = vector.load %arg7[%c56, %c0_12] : memref<72x384xf32, #tpu.memory_space<vmem>>, vector<8x384xf32>
    tpu.vector_store %arg7[%c56, %c0_12], %16 {strides = array<i32>} : memref<72x384xf32, #tpu.memory_space<vmem>>, vector<8x384xf32>,
    %c365_i32 = arith.constant 365 : i32
    %18 = tpu.dynamic_rotate %2 by %c365_i32 dim 1 : vector<8x384xf32>, i32 -> vector<8x384xf32>
    %c64 = arith.constant 64 : index
    %c0_13 = arith.constant 0 : index
    %19 = vector.load %arg7[%c64, %c0_13] : memref<72x384xf32, #tpu.memory_space<vmem>>, vector<8x384xf32>
    tpu.vector_store %arg7[%c64, %c0_13], %18 {strides = array<i32>} : memref<72x384xf32, #tpu.memory_space<vmem>>, vector<8x384xf32>,
    %c0_14 = arith.constant 0 : index
    %c0_15 = arith.constant 0 : index
    %20 = vector.load %arg7[%c0_14, %c0_15] : memref<72x384xf32, #tpu.memory_space<vmem>>, vector<72x384xf32>
    %21 = arith.truncf %20 : vector<72x384xf32> to vector<72x384xbf16>
    %c0_16 = arith.constant 0 : index
    %c0_17 = arith.constant 0 : index
    %c0_18 = arith.constant 0 : index
    %22 = vector.load %arg2[%c0_16, %c0_17, %c0_18] : memref<10x8x72xbf16, #tpu.memory_space<vmem>>, vector<1x8x72xbf16>
    %23 = vector.shape_cast %22 : vector<1x8x72xbf16> to vector<8x72xbf16>
    %cst = arith.constant dense<0.000000e+00> : vector<8x384xf32>
    %24 = tpu.matmul %23, %21, %cst {dimension_numbers = #tpu.dot_dimension_numbers<[1], [0], [0], [1], [0, 0, 1, 1], [], []>} : vector<8x72xbf16>, vector<72x384xbf16>, vector<8x384xf32> -> vector<8x384xf32>
    %c0_19 = arith.constant 0 : index
    %c0_20 = arith.constant 0 : index
    %c0_21 = arith.constant 0 : index
    %25 = vector.load %arg3[%c0_19, %c0_20, %c0_21] : memref<10x8x1xf32, #tpu.memory_space<vmem>>, vector<1x8x1xf32>
    %26 = vector.shape_cast %25 : vector<1x8x1xf32> to vector<8x1xf32>
    %27 = vector.broadcast %26 : vector<8x1xf32> to vector<8x384xf32>
    %28 = arith.addf %24, %27 : vector<8x384xf32>
    %cst_22 = arith.constant 0.000000e+00 : f32
    %29 = vector.broadcast %cst_22 : f32 to vector<8x384xf32>
    %30 = arith.maximumf %28, %29 : vector<8x384xf32>
    %31 = vector.broadcast %0 : vector<1x384xf32> to vector<8x384xf32>
    %32 = arith.mulf %30, %31 : vector<8x384xf32>
    %c19_i32_23 = arith.constant 19 : i32
    %33 = tpu.dynamic_rotate %32 by %c19_i32_23 dim 1 : vector<8x384xf32>, i32 -> vector<8x384xf32>
    %c0_24 = arith.constant 0 : index
    %c0_25 = arith.constant 0 : index
    %34 = vector.load %arg7[%c0_24, %c0_25] : memref<72x384xf32, #tpu.memory_space<vmem>>, vector<8x384xf32>
    tpu.vector_store %arg7[%c0_24, %c0_25], %33 {strides = array<i32>} : memref<72x384xf32, #tpu.memory_space<vmem>>, vector<8x384xf32>,
    %c18_i32_26 = arith.constant 18 : i32
    %35 = tpu.dynamic_rotate %32 by %c18_i32_26 dim 1 : vector<8x384xf32>, i32 -> vector<8x384xf32>
    %c8_27 = arith.constant 8 : index
    %c0_28 = arith.constant 0 : index
    %36 = vector.load %arg7[%c8_27, %c0_28] : memref<72x384xf32, #tpu.memory_space<vmem>>, vector<8x384xf32>
    tpu.vector_store %arg7[%c8_27, %c0_28], %35 {strides = array<i32>} : memref<72x384xf32, #tpu.memory_space<vmem>>, vector<8x384xf32>,
    %c17_i32_29 = arith.constant 17 : i32
    %37 = tpu.dynamic_rotate %32 by %c17_i32_29 dim 1 : vector<8x384xf32>, i32 -> vector<8x384xf32>
    %c16_30 = arith.constant 16 : index
    %c0_31 = arith.constant 0 : index
    %38 = vector.load %arg7[%c16_30, %c0_31] : memref<72x384xf32, #tpu.memory_space<vmem>>, vector<8x384xf32>
    tpu.vector_store %arg7[%c16_30, %c0_31], %37 {strides = array<i32>} : memref<72x384xf32, #tpu.memory_space<vmem>>, vector<8x384xf32>,
    %c1_i32_32 = arith.constant 1 : i32
    %39 = tpu.dynamic_rotate %32 by %c1_i32_32 dim 1 : vector<8x384xf32>, i32 -> vector<8x384xf32>
    %c24_33 = arith.constant 24 : index
    %c0_34 = arith.constant 0 : index
    %40 = vector.load %arg7[%c24_33, %c0_34] : memref<72x384xf32, #tpu.memory_space<vmem>>, vector<8x384xf32>
    tpu.vector_store %arg7[%c24_33, %c0_34], %39 {strides = array<i32>} : memref<72x384xf32, #tpu.memory_space<vmem>>, vector<8x384xf32>,
    %c32_35 = arith.constant 32 : index
    %c0_36 = arith.constant 0 : index
    %41 = vector.load %arg7[%c32_35, %c0_36] : memref<72x384xf32, #tpu.memory_space<vmem>>, vector<8x384xf32>
    tpu.vector_store %arg7[%c32_35, %c0_36], %32 {strides = array<i32>} : memref<72x384xf32, #tpu.memory_space<vmem>>, vector<8x384xf32>,
    %c383_i32_37 = arith.constant 383 : i32
    %42 = tpu.dynamic_rotate %32 by %c383_i32_37 dim 1 : vector<8x384xf32>, i32 -> vector<8x384xf32>
    %c40_38 = arith.constant 40 : index
    %c0_39 = arith.constant 0 : index
    %43 = vector.load %arg7[%c40_38, %c0_39] : memref<72x384xf32, #tpu.memory_space<vmem>>, vector<8x384xf32>
    tpu.vector_store %arg7[%c40_38, %c0_39], %42 {strides = array<i32>} : memref<72x384xf32, #tpu.memory_space<vmem>>, vector<8x384xf32>,
    %c367_i32_40 = arith.constant 367 : i32
    %44 = tpu.dynamic_rotate %32 by %c367_i32_40 dim 1 : vector<8x384xf32>, i32 -> vector<8x384xf32>
    %c48_41 = arith.constant 48 : index
    %c0_42 = arith.constant 0 : index
    %45 = vector.load %arg7[%c48_41, %c0_42] : memref<72x384xf32, #tpu.memory_space<vmem>>, vector<8x384xf32>
    tpu.vector_store %arg7[%c48_41, %c0_42], %44 {strides = array<i32>} : memref<72x384xf32, #tpu.memory_space<vmem>>, vector<8x384xf32>,
    %c366_i32_43 = arith.constant 366 : i32
    %46 = tpu.dynamic_rotate %32 by %c366_i32_43 dim 1 : vector<8x384xf32>, i32 -> vector<8x384xf32>
    %c56_44 = arith.constant 56 : index
    %c0_45 = arith.constant 0 : index
    %47 = vector.load %arg7[%c56_44, %c0_45] : memref<72x384xf32, #tpu.memory_space<vmem>>, vector<8x384xf32>
    tpu.vector_store %arg7[%c56_44, %c0_45], %46 {strides = array<i32>} : memref<72x384xf32, #tpu.memory_space<vmem>>, vector<8x384xf32>,
    %c365_i32_46 = arith.constant 365 : i32
    %48 = tpu.dynamic_rotate %32 by %c365_i32_46 dim 1 : vector<8x384xf32>, i32 -> vector<8x384xf32>
    %c64_47 = arith.constant 64 : index
    %c0_48 = arith.constant 0 : index
    %49 = vector.load %arg7[%c64_47, %c0_48] : memref<72x384xf32, #tpu.memory_space<vmem>>, vector<8x384xf32>
    tpu.vector_store %arg7[%c64_47, %c0_48], %48 {strides = array<i32>} : memref<72x384xf32, #tpu.memory_space<vmem>>, vector<8x384xf32>,
    %c0_49 = arith.constant 0 : index
    %c0_50 = arith.constant 0 : index
    %50 = vector.load %arg7[%c0_49, %c0_50] : memref<72x384xf32, #tpu.memory_space<vmem>>, vector<72x384xf32>
    %51 = arith.truncf %50 : vector<72x384xf32> to vector<72x384xbf16>
    %c1 = arith.constant 1 : index
    %c0_51 = arith.constant 0 : index
    %c0_52 = arith.constant 0 : index
    %52 = vector.load %arg2[%c1, %c0_51, %c0_52] : memref<10x8x72xbf16, #tpu.memory_space<vmem>>, vector<1x8x72xbf16>
    %53 = vector.shape_cast %52 : vector<1x8x72xbf16> to vector<8x72xbf16>
    %cst_53 = arith.constant dense<0.000000e+00> : vector<8x384xf32>
    %54 = tpu.matmul %53, %51, %cst_53 {dimension_numbers = #tpu.dot_dimension_numbers<[1], [0], [0], [1], [0, 0, 1, 1], [], []>} : vector<8x72xbf16>, vector<72x384xbf16>, vector<8x384xf32> -> vector<8x384xf32>
    %c1_54 = arith.constant 1 : index
    %c0_55 = arith.constant 0 : index
    %c0_56 = arith.constant 0 : index
    %55 = vector.load %arg3[%c1_54, %c0_55, %c0_56] : memref<10x8x1xf32, #tpu.memory_space<vmem>>, vector<1x8x1xf32>
    %56 = vector.shape_cast %55 : vector<1x8x1xf32> to vector<8x1xf32>
    %57 = vector.broadcast %56 : vector<8x1xf32> to vector<8x384xf32>
    %58 = arith.addf %54, %57 : vector<8x384xf32>
    %cst_57 = arith.constant 0.000000e+00 : f32
    %59 = vector.broadcast %cst_57 : f32 to vector<8x384xf32>
    %60 = arith.maximumf %58, %59 : vector<8x384xf32>
    %61 = vector.broadcast %0 : vector<1x384xf32> to vector<8x384xf32>
    %62 = arith.mulf %60, %61 : vector<8x384xf32>
    %c19_i32_58 = arith.constant 19 : i32
    %63 = tpu.dynamic_rotate %62 by %c19_i32_58 dim 1 : vector<8x384xf32>, i32 -> vector<8x384xf32>
    %c0_59 = arith.constant 0 : index
    %c0_60 = arith.constant 0 : index
    %64 = vector.load %arg7[%c0_59, %c0_60] : memref<72x384xf32, #tpu.memory_space<vmem>>, vector<8x384xf32>
    tpu.vector_store %arg7[%c0_59, %c0_60], %63 {strides = array<i32>} : memref<72x384xf32, #tpu.memory_space<vmem>>, vector<8x384xf32>,
    %c18_i32_61 = arith.constant 18 : i32
    %65 = tpu.dynamic_rotate %62 by %c18_i32_61 dim 1 : vector<8x384xf32>, i32 -> vector<8x384xf32>
    %c8_62 = arith.constant 8 : index
    %c0_63 = arith.constant 0 : index
    %66 = vector.load %arg7[%c8_62, %c0_63] : memref<72x384xf32, #tpu.memory_space<vmem>>, vector<8x384xf32>
    tpu.vector_store %arg7[%c8_62, %c0_63], %65 {strides = array<i32>} : memref<72x384xf32, #tpu.memory_space<vmem>>, vector<8x384xf32>,
    %c17_i32_64 = arith.constant 17 : i32
    %67 = tpu.dynamic_rotate %62 by %c17_i32_64 dim 1 : vector<8x384xf32>, i32 -> vector<8x384xf32>
    %c16_65 = arith.constant 16 : index
    %c0_66 = arith.constant 0 : index
    %68 = vector.load %arg7[%c16_65, %c0_66] : memref<72x384xf32, #tpu.memory_space<vmem>>, vector<8x384xf32>
    tpu.vector_store %arg7[%c16_65, %c0_66], %67 {strides = array<i32>} : memref<72x384xf32, #tpu.memory_space<vmem>>, vector<8x384xf32>,
    %c1_i32_67 = arith.constant 1 : i32
    %69 = tpu.dynamic_rotate %62 by %c1_i32_67 dim 1 : vector<8x384xf32>, i32 -> vector<8x384xf32>
    %c24_68 = arith.constant 24 : index
    %c0_69 = arith.constant 0 : index
    %70 = vector.load %arg7[%c24_68, %c0_69] : memref<72x384xf32, #tpu.memory_space<vmem>>, vector<8x384xf32>
    tpu.vector_store %arg7[%c24_68, %c0_69], %69 {strides = array<i32>} : memref<72x384xf32, #tpu.memory_space<vmem>>, vector<8x384xf32>,
    %c32_70 = arith.constant 32 : index
    %c0_71 = arith.constant 0 : index
    %71 = vector.load %arg7[%c32_70, %c0_71] : memref<72x384xf32, #tpu.memory_space<vmem>>, vector<8x384xf32>
    tpu.vector_store %arg7[%c32_70, %c0_71], %62 {strides = array<i32>} : memref<72x384xf32, #tpu.memory_space<vmem>>, vector<8x384xf32>,
    %c383_i32_72 = arith.constant 383 : i32
    %72 = tpu.dynamic_rotate %62 by %c383_i32_72 dim 1 : vector<8x384xf32>, i32 -> vector<8x384xf32>
    %c40_73 = arith.constant 40 : index
    %c0_74 = arith.constant 0 : index
    %73 = vector.load %arg7[%c40_73, %c0_74] : memref<72x384xf32, #tpu.memory_space<vmem>>, vector<8x384xf32>
    tpu.vector_store %arg7[%c40_73, %c0_74], %72 {strides = array<i32>} : memref<72x384xf32, #tpu.memory_space<vmem>>, vector<8x384xf32>,
    %c367_i32_75 = arith.constant 367 : i32
    %74 = tpu.dynamic_rotate %62 by %c367_i32_75 dim 1 : vector<8x384xf32>, i32 -> vector<8x384xf32>
    %c48_76 = arith.constant 48 : index
    %c0_77 = arith.constant 0 : index
    %75 = vector.load %arg7[%c48_76, %c0_77] : memref<72x384xf32, #tpu.memory_space<vmem>>, vector<8x384xf32>
    tpu.vector_store %arg7[%c48_76, %c0_77], %74 {strides = array<i32>} : memref<72x384xf32, #tpu.memory_space<vmem>>, vector<8x384xf32>,
    %c366_i32_78 = arith.constant 366 : i32
    %76 = tpu.dynamic_rotate %62 by %c366_i32_78 dim 1 : vector<8x384xf32>, i32 -> vector<8x384xf32>
    %c56_79 = arith.constant 56 : index
    %c0_80 = arith.constant 0 : index
    %77 = vector.load %arg7[%c56_79, %c0_80] : memref<72x384xf32, #tpu.memory_space<vmem>>, vector<8x384xf32>
    tpu.vector_store %arg7[%c56_79, %c0_80], %76 {strides = array<i32>} : memref<72x384xf32, #tpu.memory_space<vmem>>, vector<8x384xf32>,
    %c365_i32_81 = arith.constant 365 : i32
    %78 = tpu.dynamic_rotate %62 by %c365_i32_81 dim 1 : vector<8x384xf32>, i32 -> vector<8x384xf32>
    %c64_82 = arith.constant 64 : index
    %c0_83 = arith.constant 0 : index
    %79 = vector.load %arg7[%c64_82, %c0_83] : memref<72x384xf32, #tpu.memory_space<vmem>>, vector<8x384xf32>
    tpu.vector_store %arg7[%c64_82, %c0_83], %78 {strides = array<i32>} : memref<72x384xf32, #tpu.memory_space<vmem>>, vector<8x384xf32>,
    %c0_84 = arith.constant 0 : index
    %c0_85 = arith.constant 0 : index
    %80 = vector.load %arg7[%c0_84, %c0_85] : memref<72x384xf32, #tpu.memory_space<vmem>>, vector<72x384xf32>
    %81 = arith.truncf %80 : vector<72x384xf32> to vector<72x384xbf16>
    %c2 = arith.constant 2 : index
    %c0_86 = arith.constant 0 : index
    %c0_87 = arith.constant 0 : index
    %82 = vector.load %arg2[%c2, %c0_86, %c0_87] : memref<10x8x72xbf16, #tpu.memory_space<vmem>>, vector<1x8x72xbf16>
    %83 = vector.shape_cast %82 : vector<1x8x72xbf16> to vector<8x72xbf16>
    %cst_88 = arith.constant dense<0.000000e+00> : vector<8x384xf32>
    %84 = tpu.matmul %83, %81, %cst_88 {dimension_numbers = #tpu.dot_dimension_numbers<[1], [0], [0], [1], [0, 0, 1, 1], [], []>} : vector<8x72xbf16>, vector<72x384xbf16>, vector<8x384xf32> -> vector<8x384xf32>
    %c2_89 = arith.constant 2 : index
    %c0_90 = arith.constant 0 : index
    %c0_91 = arith.constant 0 : index
    %85 = vector.load %arg3[%c2_89, %c0_90, %c0_91] : memref<10x8x1xf32, #tpu.memory_space<vmem>>, vector<1x8x1xf32>
    %86 = vector.shape_cast %85 : vector<1x8x1xf32> to vector<8x1xf32>
    %87 = vector.broadcast %86 : vector<8x1xf32> to vector<8x384xf32>
    %88 = arith.addf %84, %87 : vector<8x384xf32>
    %cst_92 = arith.constant 0.000000e+00 : f32
    %89 = vector.broadcast %cst_92 : f32 to vector<8x384xf32>
    %90 = arith.maximumf %88, %89 : vector<8x384xf32>
    %91 = vector.broadcast %0 : vector<1x384xf32> to vector<8x384xf32>
    %92 = arith.mulf %90, %91 : vector<8x384xf32>
    %c19_i32_93 = arith.constant 19 : i32
    %93 = tpu.dynamic_rotate %92 by %c19_i32_93 dim 1 : vector<8x384xf32>, i32 -> vector<8x384xf32>
    %c0_94 = arith.constant 0 : index
    %c0_95 = arith.constant 0 : index
    %94 = vector.load %arg7[%c0_94, %c0_95] : memref<72x384xf32, #tpu.memory_space<vmem>>, vector<8x384xf32>
    tpu.vector_store %arg7[%c0_94, %c0_95], %93 {strides = array<i32>} : memref<72x384xf32, #tpu.memory_space<vmem>>, vector<8x384xf32>,
    %c18_i32_96 = arith.constant 18 : i32
    %95 = tpu.dynamic_rotate %92 by %c18_i32_96 dim 1 : vector<8x384xf32>, i32 -> vector<8x384xf32>
    %c8_97 = arith.constant 8 : index
    %c0_98 = arith.constant 0 : index
    %96 = vector.load %arg7[%c8_97, %c0_98] : memref<72x384xf32, #tpu.memory_space<vmem>>, vector<8x384xf32>
    tpu.vector_store %arg7[%c8_97, %c0_98], %95 {strides = array<i32>} : memref<72x384xf32, #tpu.memory_space<vmem>>, vector<8x384xf32>,
    %c17_i32_99 = arith.constant 17 : i32
    %97 = tpu.dynamic_rotate %92 by %c17_i32_99 dim 1 : vector<8x384xf32>, i32 -> vector<8x384xf32>
    %c16_100 = arith.constant 16 : index
    %c0_101 = arith.constant 0 : index
    %98 = vector.load %arg7[%c16_100, %c0_101] : memref<72x384xf32, #tpu.memory_space<vmem>>, vector<8x384xf32>
    tpu.vector_store %arg7[%c16_100, %c0_101], %97 {strides = array<i32>} : memref<72x384xf32, #tpu.memory_space<vmem>>, vector<8x384xf32>,
    %c1_i32_102 = arith.constant 1 : i32
    %99 = tpu.dynamic_rotate %92 by %c1_i32_102 dim 1 : vector<8x384xf32>, i32 -> vector<8x384xf32>
    %c24_103 = arith.constant 24 : index
    %c0_104 = arith.constant 0 : index
    %100 = vector.load %arg7[%c24_103, %c0_104] : memref<72x384xf32, #tpu.memory_space<vmem>>, vector<8x384xf32>
    tpu.vector_store %arg7[%c24_103, %c0_104], %99 {strides = array<i32>} : memref<72x384xf32, #tpu.memory_space<vmem>>, vector<8x384xf32>,
    %c32_105 = arith.constant 32 : index
    %c0_106 = arith.constant 0 : index
    %101 = vector.load %arg7[%c32_105, %c0_106] : memref<72x384xf32, #tpu.memory_space<vmem>>, vector<8x384xf32>
    tpu.vector_store %arg7[%c32_105, %c0_106], %92 {strides = array<i32>} : memref<72x384xf32, #tpu.memory_space<vmem>>, vector<8x384xf32>,
    %c383_i32_107 = arith.constant 383 : i32
    %102 = tpu.dynamic_rotate %92 by %c383_i32_107 dim 1 : vector<8x384xf32>, i32 -> vector<8x384xf32>
    %c40_108 = arith.constant 40 : index
    %c0_109 = arith.constant 0 : index
    %103 = vector.load %arg7[%c40_108, %c0_109] : memref<72x384xf32, #tpu.memory_space<vmem>>, vector<8x384xf32>
    tpu.vector_store %arg7[%c40_108, %c0_109], %102 {strides = array<i32>} : memref<72x384xf32, #tpu.memory_space<vmem>>, vector<8x384xf32>,
    %c367_i32_110 = arith.constant 367 : i32
    %104 = tpu.dynamic_rotate %92 by %c367_i32_110 dim 1 : vector<8x384xf32>, i32 -> vector<8x384xf32>
    %c48_111 = arith.constant 48 : index
    %c0_112 = arith.constant 0 : index
    %105 = vector.load %arg7[%c48_111, %c0_112] : memref<72x384xf32, #tpu.memory_space<vmem>>, vector<8x384xf32>
    tpu.vector_store %arg7[%c48_111, %c0_112], %104 {strides = array<i32>} : memref<72x384xf32, #tpu.memory_space<vmem>>, vector<8x384xf32>,
    %c366_i32_113 = arith.constant 366 : i32
    %106 = tpu.dynamic_rotate %92 by %c366_i32_113 dim 1 : vector<8x384xf32>, i32 -> vector<8x384xf32>
    %c56_114 = arith.constant 56 : index
    %c0_115 = arith.constant 0 : index
    %107 = vector.load %arg7[%c56_114, %c0_115] : memref<72x384xf32, #tpu.memory_space<vmem>>, vector<8x384xf32>
    tpu.vector_store %arg7[%c56_114, %c0_115], %106 {strides = array<i32>} : memref<72x384xf32, #tpu.memory_space<vmem>>, vector<8x384xf32>,
    %c365_i32_116 = arith.constant 365 : i32
    %108 = tpu.dynamic_rotate %92 by %c365_i32_116 dim 1 : vector<8x384xf32>, i32 -> vector<8x384xf32>
    %c64_117 = arith.constant 64 : index
    %c0_118 = arith.constant 0 : index
    %109 = vector.load %arg7[%c64_117, %c0_118] : memref<72x384xf32, #tpu.memory_space<vmem>>, vector<8x384xf32>
    tpu.vector_store %arg7[%c64_117, %c0_118], %108 {strides = array<i32>} : memref<72x384xf32, #tpu.memory_space<vmem>>, vector<8x384xf32>,
    %c0_119 = arith.constant 0 : index
    %c0_120 = arith.constant 0 : index
    %110 = vector.load %arg7[%c0_119, %c0_120] : memref<72x384xf32, #tpu.memory_space<vmem>>, vector<72x384xf32>
    %111 = arith.truncf %110 : vector<72x384xf32> to vector<72x384xbf16>
    %c3 = arith.constant 3 : index
    %c0_121 = arith.constant 0 : index
    %c0_122 = arith.constant 0 : index
    %112 = vector.load %arg2[%c3, %c0_121, %c0_122] : memref<10x8x72xbf16, #tpu.memory_space<vmem>>, vector<1x8x72xbf16>
    %113 = vector.shape_cast %112 : vector<1x8x72xbf16> to vector<8x72xbf16>
    %cst_123 = arith.constant dense<0.000000e+00> : vector<8x384xf32>
    %114 = tpu.matmul %113, %111, %cst_123 {dimension_numbers = #tpu.dot_dimension_numbers<[1], [0], [0], [1], [0, 0, 1, 1], [], []>} : vector<8x72xbf16>, vector<72x384xbf16>, vector<8x384xf32> -> vector<8x384xf32>
    %c3_124 = arith.constant 3 : index
    %c0_125 = arith.constant 0 : index
    %c0_126 = arith.constant 0 : index
    %115 = vector.load %arg3[%c3_124, %c0_125, %c0_126] : memref<10x8x1xf32, #tpu.memory_space<vmem>>, vector<1x8x1xf32>
    %116 = vector.shape_cast %115 : vector<1x8x1xf32> to vector<8x1xf32>
    %117 = vector.broadcast %116 : vector<8x1xf32> to vector<8x384xf32>
    %118 = arith.addf %114, %117 : vector<8x384xf32>
    %cst_127 = arith.constant 0.000000e+00 : f32
    %119 = vector.broadcast %cst_127 : f32 to vector<8x384xf32>
    %120 = arith.maximumf %118, %119 : vector<8x384xf32>
    %121 = vector.broadcast %0 : vector<1x384xf32> to vector<8x384xf32>
    %122 = arith.mulf %120, %121 : vector<8x384xf32>
    %c19_i32_128 = arith.constant 19 : i32
    %123 = tpu.dynamic_rotate %122 by %c19_i32_128 dim 1 : vector<8x384xf32>, i32 -> vector<8x384xf32>
    %c0_129 = arith.constant 0 : index
    %c0_130 = arith.constant 0 : index
    %124 = vector.load %arg7[%c0_129, %c0_130] : memref<72x384xf32, #tpu.memory_space<vmem>>, vector<8x384xf32>
    tpu.vector_store %arg7[%c0_129, %c0_130], %123 {strides = array<i32>} : memref<72x384xf32, #tpu.memory_space<vmem>>, vector<8x384xf32>,
    %c18_i32_131 = arith.constant 18 : i32
    %125 = tpu.dynamic_rotate %122 by %c18_i32_131 dim 1 : vector<8x384xf32>, i32 -> vector<8x384xf32>
    %c8_132 = arith.constant 8 : index
    %c0_133 = arith.constant 0 : index
    %126 = vector.load %arg7[%c8_132, %c0_133] : memref<72x384xf32, #tpu.memory_space<vmem>>, vector<8x384xf32>
    tpu.vector_store %arg7[%c8_132, %c0_133], %125 {strides = array<i32>} : memref<72x384xf32, #tpu.memory_space<vmem>>, vector<8x384xf32>,
    %c17_i32_134 = arith.constant 17 : i32
    %127 = tpu.dynamic_rotate %122 by %c17_i32_134 dim 1 : vector<8x384xf32>, i32 -> vector<8x384xf32>
    %c16_135 = arith.constant 16 : index
    %c0_136 = arith.constant 0 : index
    %128 = vector.load %arg7[%c16_135, %c0_136] : memref<72x384xf32, #tpu.memory_space<vmem>>, vector<8x384xf32>
    tpu.vector_store %arg7[%c16_135, %c0_136], %127 {strides = array<i32>} : memref<72x384xf32, #tpu.memory_space<vmem>>, vector<8x384xf32>,
    %c1_i32_137 = arith.constant 1 : i32
    %129 = tpu.dynamic_rotate %122 by %c1_i32_137 dim 1 : vector<8x384xf32>, i32 -> vector<8x384xf32>
    %c24_138 = arith.constant 24 : index
    %c0_139 = arith.constant 0 : index
    %130 = vector.load %arg7[%c24_138, %c0_139] : memref<72x384xf32, #tpu.memory_space<vmem>>, vector<8x384xf32>
    tpu.vector_store %arg7[%c24_138, %c0_139], %129 {strides = array<i32>} : memref<72x384xf32, #tpu.memory_space<vmem>>, vector<8x384xf32>,
    %c32_140 = arith.constant 32 : index
    %c0_141 = arith.constant 0 : index
    %131 = vector.load %arg7[%c32_140, %c0_141] : memref<72x384xf32, #tpu.memory_space<vmem>>, vector<8x384xf32>
    tpu.vector_store %arg7[%c32_140, %c0_141], %122 {strides = array<i32>} : memref<72x384xf32, #tpu.memory_space<vmem>>, vector<8x384xf32>,
    %c383_i32_142 = arith.constant 383 : i32
    %132 = tpu.dynamic_rotate %122 by %c383_i32_142 dim 1 : vector<8x384xf32>, i32 -> vector<8x384xf32>
    %c40_143 = arith.constant 40 : index
    %c0_144 = arith.constant 0 : index
    %133 = vector.load %arg7[%c40_143, %c0_144] : memref<72x384xf32, #tpu.memory_space<vmem>>, vector<8x384xf32>
    tpu.vector_store %arg7[%c40_143, %c0_144], %132 {strides = array<i32>} : memref<72x384xf32, #tpu.memory_space<vmem>>, vector<8x384xf32>,
    %c367_i32_145 = arith.constant 367 : i32
    %134 = tpu.dynamic_rotate %122 by %c367_i32_145 dim 1 : vector<8x384xf32>, i32 -> vector<8x384xf32>
    %c48_146 = arith.constant 48 : index
    %c0_147 = arith.constant 0 : index
    %135 = vector.load %arg7[%c48_146, %c0_147] : memref<72x384xf32, #tpu.memory_space<vmem>>, vector<8x384xf32>
    tpu.vector_store %arg7[%c48_146, %c0_147], %134 {strides = array<i32>} : memref<72x384xf32, #tpu.memory_space<vmem>>, vector<8x384xf32>,
    %c366_i32_148 = arith.constant 366 : i32
    %136 = tpu.dynamic_rotate %122 by %c366_i32_148 dim 1 : vector<8x384xf32>, i32 -> vector<8x384xf32>
    %c56_149 = arith.constant 56 : index
    %c0_150 = arith.constant 0 : index
    %137 = vector.load %arg7[%c56_149, %c0_150] : memref<72x384xf32, #tpu.memory_space<vmem>>, vector<8x384xf32>
    tpu.vector_store %arg7[%c56_149, %c0_150], %136 {strides = array<i32>} : memref<72x384xf32, #tpu.memory_space<vmem>>, vector<8x384xf32>,
    %c365_i32_151 = arith.constant 365 : i32
    %138 = tpu.dynamic_rotate %122 by %c365_i32_151 dim 1 : vector<8x384xf32>, i32 -> vector<8x384xf32>
    %c64_152 = arith.constant 64 : index
    %c0_153 = arith.constant 0 : index
    %139 = vector.load %arg7[%c64_152, %c0_153] : memref<72x384xf32, #tpu.memory_space<vmem>>, vector<8x384xf32>
    tpu.vector_store %arg7[%c64_152, %c0_153], %138 {strides = array<i32>} : memref<72x384xf32, #tpu.memory_space<vmem>>, vector<8x384xf32>,
    %c0_154 = arith.constant 0 : index
    %c0_155 = arith.constant 0 : index
    %140 = vector.load %arg7[%c0_154, %c0_155] : memref<72x384xf32, #tpu.memory_space<vmem>>, vector<72x384xf32>
    %141 = arith.truncf %140 : vector<72x384xf32> to vector<72x384xbf16>
    %c4 = arith.constant 4 : index
    %c0_156 = arith.constant 0 : index
    %c0_157 = arith.constant 0 : index
    %142 = vector.load %arg2[%c4, %c0_156, %c0_157] : memref<10x8x72xbf16, #tpu.memory_space<vmem>>, vector<1x8x72xbf16>
    %143 = vector.shape_cast %142 : vector<1x8x72xbf16> to vector<8x72xbf16>
    %cst_158 = arith.constant dense<0.000000e+00> : vector<8x384xf32>
    %144 = tpu.matmul %143, %141, %cst_158 {dimension_numbers = #tpu.dot_dimension_numbers<[1], [0], [0], [1], [0, 0, 1, 1], [], []>} : vector<8x72xbf16>, vector<72x384xbf16>, vector<8x384xf32> -> vector<8x384xf32>
    %c4_159 = arith.constant 4 : index
    %c0_160 = arith.constant 0 : index
    %c0_161 = arith.constant 0 : index
    %145 = vector.load %arg3[%c4_159, %c0_160, %c0_161] : memref<10x8x1xf32, #tpu.memory_space<vmem>>, vector<1x8x1xf32>
    %146 = vector.shape_cast %145 : vector<1x8x1xf32> to vector<8x1xf32>
    %147 = vector.broadcast %146 : vector<8x1xf32> to vector<8x384xf32>
    %148 = arith.addf %144, %147 : vector<8x384xf32>
    %cst_162 = arith.constant 0.000000e+00 : f32
    %149 = vector.broadcast %cst_162 : f32 to vector<8x384xf32>
    %150 = arith.maximumf %148, %149 : vector<8x384xf32>
    %151 = vector.broadcast %0 : vector<1x384xf32> to vector<8x384xf32>
    %152 = arith.mulf %150, %151 : vector<8x384xf32>
    %c19_i32_163 = arith.constant 19 : i32
    %153 = tpu.dynamic_rotate %152 by %c19_i32_163 dim 1 : vector<8x384xf32>, i32 -> vector<8x384xf32>
    %c0_164 = arith.constant 0 : index
    %c0_165 = arith.constant 0 : index
    %154 = vector.load %arg7[%c0_164, %c0_165] : memref<72x384xf32, #tpu.memory_space<vmem>>, vector<8x384xf32>
    tpu.vector_store %arg7[%c0_164, %c0_165], %153 {strides = array<i32>} : memref<72x384xf32, #tpu.memory_space<vmem>>, vector<8x384xf32>,
    %c18_i32_166 = arith.constant 18 : i32
    %155 = tpu.dynamic_rotate %152 by %c18_i32_166 dim 1 : vector<8x384xf32>, i32 -> vector<8x384xf32>
    %c8_167 = arith.constant 8 : index
    %c0_168 = arith.constant 0 : index
    %156 = vector.load %arg7[%c8_167, %c0_168] : memref<72x384xf32, #tpu.memory_space<vmem>>, vector<8x384xf32>
    tpu.vector_store %arg7[%c8_167, %c0_168], %155 {strides = array<i32>} : memref<72x384xf32, #tpu.memory_space<vmem>>, vector<8x384xf32>,
    %c17_i32_169 = arith.constant 17 : i32
    %157 = tpu.dynamic_rotate %152 by %c17_i32_169 dim 1 : vector<8x384xf32>, i32 -> vector<8x384xf32>
    %c16_170 = arith.constant 16 : index
    %c0_171 = arith.constant 0 : index
    %158 = vector.load %arg7[%c16_170, %c0_171] : memref<72x384xf32, #tpu.memory_space<vmem>>, vector<8x384xf32>
    tpu.vector_store %arg7[%c16_170, %c0_171], %157 {strides = array<i32>} : memref<72x384xf32, #tpu.memory_space<vmem>>, vector<8x384xf32>,
    %c1_i32_172 = arith.constant 1 : i32
    %159 = tpu.dynamic_rotate %152 by %c1_i32_172 dim 1 : vector<8x384xf32>, i32 -> vector<8x384xf32>
    %c24_173 = arith.constant 24 : index
    %c0_174 = arith.constant 0 : index
    %160 = vector.load %arg7[%c24_173, %c0_174] : memref<72x384xf32, #tpu.memory_space<vmem>>, vector<8x384xf32>
    tpu.vector_store %arg7[%c24_173, %c0_174], %159 {strides = array<i32>} : memref<72x384xf32, #tpu.memory_space<vmem>>, vector<8x384xf32>,
    %c32_175 = arith.constant 32 : index
    %c0_176 = arith.constant 0 : index
    %161 = vector.load %arg7[%c32_175, %c0_176] : memref<72x384xf32, #tpu.memory_space<vmem>>, vector<8x384xf32>
    tpu.vector_store %arg7[%c32_175, %c0_176], %152 {strides = array<i32>} : memref<72x384xf32, #tpu.memory_space<vmem>>, vector<8x384xf32>,
    %c383_i32_177 = arith.constant 383 : i32
    %162 = tpu.dynamic_rotate %152 by %c383_i32_177 dim 1 : vector<8x384xf32>, i32 -> vector<8x384xf32>
    %c40_178 = arith.constant 40 : index
    %c0_179 = arith.constant 0 : index
    %163 = vector.load %arg7[%c40_178, %c0_179] : memref<72x384xf32, #tpu.memory_space<vmem>>, vector<8x384xf32>
    tpu.vector_store %arg7[%c40_178, %c0_179], %162 {strides = array<i32>} : memref<72x384xf32, #tpu.memory_space<vmem>>, vector<8x384xf32>,
    %c367_i32_180 = arith.constant 367 : i32
    %164 = tpu.dynamic_rotate %152 by %c367_i32_180 dim 1 : vector<8x384xf32>, i32 -> vector<8x384xf32>
    %c48_181 = arith.constant 48 : index
    %c0_182 = arith.constant 0 : index
    %165 = vector.load %arg7[%c48_181, %c0_182] : memref<72x384xf32, #tpu.memory_space<vmem>>, vector<8x384xf32>
    tpu.vector_store %arg7[%c48_181, %c0_182], %164 {strides = array<i32>} : memref<72x384xf32, #tpu.memory_space<vmem>>, vector<8x384xf32>,
    %c366_i32_183 = arith.constant 366 : i32
    %166 = tpu.dynamic_rotate %152 by %c366_i32_183 dim 1 : vector<8x384xf32>, i32 -> vector<8x384xf32>
    %c56_184 = arith.constant 56 : index
    %c0_185 = arith.constant 0 : index
    %167 = vector.load %arg7[%c56_184, %c0_185] : memref<72x384xf32, #tpu.memory_space<vmem>>, vector<8x384xf32>
    tpu.vector_store %arg7[%c56_184, %c0_185], %166 {strides = array<i32>} : memref<72x384xf32, #tpu.memory_space<vmem>>, vector<8x384xf32>,
    %c365_i32_186 = arith.constant 365 : i32
    %168 = tpu.dynamic_rotate %152 by %c365_i32_186 dim 1 : vector<8x384xf32>, i32 -> vector<8x384xf32>
    %c64_187 = arith.constant 64 : index
    %c0_188 = arith.constant 0 : index
    %169 = vector.load %arg7[%c64_187, %c0_188] : memref<72x384xf32, #tpu.memory_space<vmem>>, vector<8x384xf32>
    tpu.vector_store %arg7[%c64_187, %c0_188], %168 {strides = array<i32>} : memref<72x384xf32, #tpu.memory_space<vmem>>, vector<8x384xf32>,
    %c0_189 = arith.constant 0 : index
    %c0_190 = arith.constant 0 : index
    %170 = vector.load %arg7[%c0_189, %c0_190] : memref<72x384xf32, #tpu.memory_space<vmem>>, vector<72x384xf32>
    %171 = arith.truncf %170 : vector<72x384xf32> to vector<72x384xbf16>
    %c5 = arith.constant 5 : index
    %c0_191 = arith.constant 0 : index
    %c0_192 = arith.constant 0 : index
    %172 = vector.load %arg2[%c5, %c0_191, %c0_192] : memref<10x8x72xbf16, #tpu.memory_space<vmem>>, vector<1x8x72xbf16>
    %173 = vector.shape_cast %172 : vector<1x8x72xbf16> to vector<8x72xbf16>
    %cst_193 = arith.constant dense<0.000000e+00> : vector<8x384xf32>
    %174 = tpu.matmul %173, %171, %cst_193 {dimension_numbers = #tpu.dot_dimension_numbers<[1], [0], [0], [1], [0, 0, 1, 1], [], []>} : vector<8x72xbf16>, vector<72x384xbf16>, vector<8x384xf32> -> vector<8x384xf32>
    %c5_194 = arith.constant 5 : index
    %c0_195 = arith.constant 0 : index
    %c0_196 = arith.constant 0 : index
    %175 = vector.load %arg3[%c5_194, %c0_195, %c0_196] : memref<10x8x1xf32, #tpu.memory_space<vmem>>, vector<1x8x1xf32>
    %176 = vector.shape_cast %175 : vector<1x8x1xf32> to vector<8x1xf32>
    %177 = vector.broadcast %176 : vector<8x1xf32> to vector<8x384xf32>
    %178 = arith.addf %174, %177 : vector<8x384xf32>
    %cst_197 = arith.constant 0.000000e+00 : f32
    %179 = vector.broadcast %cst_197 : f32 to vector<8x384xf32>
    %180 = arith.maximumf %178, %179 : vector<8x384xf32>
    %181 = vector.broadcast %0 : vector<1x384xf32> to vector<8x384xf32>
    %182 = arith.mulf %180, %181 : vector<8x384xf32>
    %c19_i32_198 = arith.constant 19 : i32
    %183 = tpu.dynamic_rotate %182 by %c19_i32_198 dim 1 : vector<8x384xf32>, i32 -> vector<8x384xf32>
    %c0_199 = arith.constant 0 : index
    %c0_200 = arith.constant 0 : index
    %184 = vector.load %arg7[%c0_199, %c0_200] : memref<72x384xf32, #tpu.memory_space<vmem>>, vector<8x384xf32>
    tpu.vector_store %arg7[%c0_199, %c0_200], %183 {strides = array<i32>} : memref<72x384xf32, #tpu.memory_space<vmem>>, vector<8x384xf32>,
    %c18_i32_201 = arith.constant 18 : i32
    %185 = tpu.dynamic_rotate %182 by %c18_i32_201 dim 1 : vector<8x384xf32>, i32 -> vector<8x384xf32>
    %c8_202 = arith.constant 8 : index
    %c0_203 = arith.constant 0 : index
    %186 = vector.load %arg7[%c8_202, %c0_203] : memref<72x384xf32, #tpu.memory_space<vmem>>, vector<8x384xf32>
    tpu.vector_store %arg7[%c8_202, %c0_203], %185 {strides = array<i32>} : memref<72x384xf32, #tpu.memory_space<vmem>>, vector<8x384xf32>,
    %c17_i32_204 = arith.constant 17 : i32
    %187 = tpu.dynamic_rotate %182 by %c17_i32_204 dim 1 : vector<8x384xf32>, i32 -> vector<8x384xf32>
    %c16_205 = arith.constant 16 : index
    %c0_206 = arith.constant 0 : index
    %188 = vector.load %arg7[%c16_205, %c0_206] : memref<72x384xf32, #tpu.memory_space<vmem>>, vector<8x384xf32>
    tpu.vector_store %arg7[%c16_205, %c0_206], %187 {strides = array<i32>} : memref<72x384xf32, #tpu.memory_space<vmem>>, vector<8x384xf32>,
    %c1_i32_207 = arith.constant 1 : i32
    %189 = tpu.dynamic_rotate %182 by %c1_i32_207 dim 1 : vector<8x384xf32>, i32 -> vector<8x384xf32>
    %c24_208 = arith.constant 24 : index
    %c0_209 = arith.constant 0 : index
    %190 = vector.load %arg7[%c24_208, %c0_209] : memref<72x384xf32, #tpu.memory_space<vmem>>, vector<8x384xf32>
    tpu.vector_store %arg7[%c24_208, %c0_209], %189 {strides = array<i32>} : memref<72x384xf32, #tpu.memory_space<vmem>>, vector<8x384xf32>,
    %c32_210 = arith.constant 32 : index
    %c0_211 = arith.constant 0 : index
    %191 = vector.load %arg7[%c32_210, %c0_211] : memref<72x384xf32, #tpu.memory_space<vmem>>, vector<8x384xf32>
    tpu.vector_store %arg7[%c32_210, %c0_211], %182 {strides = array<i32>} : memref<72x384xf32, #tpu.memory_space<vmem>>, vector<8x384xf32>,
    %c383_i32_212 = arith.constant 383 : i32
    %192 = tpu.dynamic_rotate %182 by %c383_i32_212 dim 1 : vector<8x384xf32>, i32 -> vector<8x384xf32>
    %c40_213 = arith.constant 40 : index
    %c0_214 = arith.constant 0 : index
    %193 = vector.load %arg7[%c40_213, %c0_214] : memref<72x384xf32, #tpu.memory_space<vmem>>, vector<8x384xf32>
    tpu.vector_store %arg7[%c40_213, %c0_214], %192 {strides = array<i32>} : memref<72x384xf32, #tpu.memory_space<vmem>>, vector<8x384xf32>,
    %c367_i32_215 = arith.constant 367 : i32
    %194 = tpu.dynamic_rotate %182 by %c367_i32_215 dim 1 : vector<8x384xf32>, i32 -> vector<8x384xf32>
    %c48_216 = arith.constant 48 : index
    %c0_217 = arith.constant 0 : index
    %195 = vector.load %arg7[%c48_216, %c0_217] : memref<72x384xf32, #tpu.memory_space<vmem>>, vector<8x384xf32>
    tpu.vector_store %arg7[%c48_216, %c0_217], %194 {strides = array<i32>} : memref<72x384xf32, #tpu.memory_space<vmem>>, vector<8x384xf32>,
    %c366_i32_218 = arith.constant 366 : i32
    %196 = tpu.dynamic_rotate %182 by %c366_i32_218 dim 1 : vector<8x384xf32>, i32 -> vector<8x384xf32>
    %c56_219 = arith.constant 56 : index
    %c0_220 = arith.constant 0 : index
    %197 = vector.load %arg7[%c56_219, %c0_220] : memref<72x384xf32, #tpu.memory_space<vmem>>, vector<8x384xf32>
    tpu.vector_store %arg7[%c56_219, %c0_220], %196 {strides = array<i32>} : memref<72x384xf32, #tpu.memory_space<vmem>>, vector<8x384xf32>,
    %c365_i32_221 = arith.constant 365 : i32
    %198 = tpu.dynamic_rotate %182 by %c365_i32_221 dim 1 : vector<8x384xf32>, i32 -> vector<8x384xf32>
    %c64_222 = arith.constant 64 : index
    %c0_223 = arith.constant 0 : index
    %199 = vector.load %arg7[%c64_222, %c0_223] : memref<72x384xf32, #tpu.memory_space<vmem>>, vector<8x384xf32>
    tpu.vector_store %arg7[%c64_222, %c0_223], %198 {strides = array<i32>} : memref<72x384xf32, #tpu.memory_space<vmem>>, vector<8x384xf32>,
    %c0_224 = arith.constant 0 : index
    %c0_225 = arith.constant 0 : index
    %200 = vector.load %arg7[%c0_224, %c0_225] : memref<72x384xf32, #tpu.memory_space<vmem>>, vector<72x384xf32>
    %201 = arith.truncf %200 : vector<72x384xf32> to vector<72x384xbf16>
    %c6 = arith.constant 6 : index
    %c0_226 = arith.constant 0 : index
    %c0_227 = arith.constant 0 : index
    %202 = vector.load %arg2[%c6, %c0_226, %c0_227] : memref<10x8x72xbf16, #tpu.memory_space<vmem>>, vector<1x8x72xbf16>
    %203 = vector.shape_cast %202 : vector<1x8x72xbf16> to vector<8x72xbf16>
    %cst_228 = arith.constant dense<0.000000e+00> : vector<8x384xf32>
    %204 = tpu.matmul %203, %201, %cst_228 {dimension_numbers = #tpu.dot_dimension_numbers<[1], [0], [0], [1], [0, 0, 1, 1], [], []>} : vector<8x72xbf16>, vector<72x384xbf16>, vector<8x384xf32> -> vector<8x384xf32>
    %c6_229 = arith.constant 6 : index
    %c0_230 = arith.constant 0 : index
    %c0_231 = arith.constant 0 : index
    %205 = vector.load %arg3[%c6_229, %c0_230, %c0_231] : memref<10x8x1xf32, #tpu.memory_space<vmem>>, vector<1x8x1xf32>
    %206 = vector.shape_cast %205 : vector<1x8x1xf32> to vector<8x1xf32>
    %207 = vector.broadcast %206 : vector<8x1xf32> to vector<8x384xf32>
    %208 = arith.addf %204, %207 : vector<8x384xf32>
    %cst_232 = arith.constant 0.000000e+00 : f32
    %209 = vector.broadcast %cst_232 : f32 to vector<8x384xf32>
    %210 = arith.maximumf %208, %209 : vector<8x384xf32>
    %211 = vector.broadcast %0 : vector<1x384xf32> to vector<8x384xf32>
    %212 = arith.mulf %210, %211 : vector<8x384xf32>
    %c19_i32_233 = arith.constant 19 : i32
    %213 = tpu.dynamic_rotate %212 by %c19_i32_233 dim 1 : vector<8x384xf32>, i32 -> vector<8x384xf32>
    %c0_234 = arith.constant 0 : index
    %c0_235 = arith.constant 0 : index
    %214 = vector.load %arg7[%c0_234, %c0_235] : memref<72x384xf32, #tpu.memory_space<vmem>>, vector<8x384xf32>
    tpu.vector_store %arg7[%c0_234, %c0_235], %213 {strides = array<i32>} : memref<72x384xf32, #tpu.memory_space<vmem>>, vector<8x384xf32>,
    %c18_i32_236 = arith.constant 18 : i32
    %215 = tpu.dynamic_rotate %212 by %c18_i32_236 dim 1 : vector<8x384xf32>, i32 -> vector<8x384xf32>
    %c8_237 = arith.constant 8 : index
    %c0_238 = arith.constant 0 : index
    %216 = vector.load %arg7[%c8_237, %c0_238] : memref<72x384xf32, #tpu.memory_space<vmem>>, vector<8x384xf32>
    tpu.vector_store %arg7[%c8_237, %c0_238], %215 {strides = array<i32>} : memref<72x384xf32, #tpu.memory_space<vmem>>, vector<8x384xf32>,
    %c17_i32_239 = arith.constant 17 : i32
    %217 = tpu.dynamic_rotate %212 by %c17_i32_239 dim 1 : vector<8x384xf32>, i32 -> vector<8x384xf32>
    %c16_240 = arith.constant 16 : index
    %c0_241 = arith.constant 0 : index
    %218 = vector.load %arg7[%c16_240, %c0_241] : memref<72x384xf32, #tpu.memory_space<vmem>>, vector<8x384xf32>
    tpu.vector_store %arg7[%c16_240, %c0_241], %217 {strides = array<i32>} : memref<72x384xf32, #tpu.memory_space<vmem>>, vector<8x384xf32>,
    %c1_i32_242 = arith.constant 1 : i32
    %219 = tpu.dynamic_rotate %212 by %c1_i32_242 dim 1 : vector<8x384xf32>, i32 -> vector<8x384xf32>
    %c24_243 = arith.constant 24 : index
    %c0_244 = arith.constant 0 : index
    %220 = vector.load %arg7[%c24_243, %c0_244] : memref<72x384xf32, #tpu.memory_space<vmem>>, vector<8x384xf32>
    tpu.vector_store %arg7[%c24_243, %c0_244], %219 {strides = array<i32>} : memref<72x384xf32, #tpu.memory_space<vmem>>, vector<8x384xf32>,
    %c32_245 = arith.constant 32 : index
    %c0_246 = arith.constant 0 : index
    %221 = vector.load %arg7[%c32_245, %c0_246] : memref<72x384xf32, #tpu.memory_space<vmem>>, vector<8x384xf32>
    tpu.vector_store %arg7[%c32_245, %c0_246], %212 {strides = array<i32>} : memref<72x384xf32, #tpu.memory_space<vmem>>, vector<8x384xf32>,
    %c383_i32_247 = arith.constant 383 : i32
    %222 = tpu.dynamic_rotate %212 by %c383_i32_247 dim 1 : vector<8x384xf32>, i32 -> vector<8x384xf32>
    %c40_248 = arith.constant 40 : index
    %c0_249 = arith.constant 0 : index
    %223 = vector.load %arg7[%c40_248, %c0_249] : memref<72x384xf32, #tpu.memory_space<vmem>>, vector<8x384xf32>
    tpu.vector_store %arg7[%c40_248, %c0_249], %222 {strides = array<i32>} : memref<72x384xf32, #tpu.memory_space<vmem>>, vector<8x384xf32>,
    %c367_i32_250 = arith.constant 367 : i32
    %224 = tpu.dynamic_rotate %212 by %c367_i32_250 dim 1 : vector<8x384xf32>, i32 -> vector<8x384xf32>
    %c48_251 = arith.constant 48 : index
    %c0_252 = arith.constant 0 : index
    %225 = vector.load %arg7[%c48_251, %c0_252] : memref<72x384xf32, #tpu.memory_space<vmem>>, vector<8x384xf32>
    tpu.vector_store %arg7[%c48_251, %c0_252], %224 {strides = array<i32>} : memref<72x384xf32, #tpu.memory_space<vmem>>, vector<8x384xf32>,
    %c366_i32_253 = arith.constant 366 : i32
    %226 = tpu.dynamic_rotate %212 by %c366_i32_253 dim 1 : vector<8x384xf32>, i32 -> vector<8x384xf32>
    %c56_254 = arith.constant 56 : index
    %c0_255 = arith.constant 0 : index
    %227 = vector.load %arg7[%c56_254, %c0_255] : memref<72x384xf32, #tpu.memory_space<vmem>>, vector<8x384xf32>
    tpu.vector_store %arg7[%c56_254, %c0_255], %226 {strides = array<i32>} : memref<72x384xf32, #tpu.memory_space<vmem>>, vector<8x384xf32>,
    %c365_i32_256 = arith.constant 365 : i32
    %228 = tpu.dynamic_rotate %212 by %c365_i32_256 dim 1 : vector<8x384xf32>, i32 -> vector<8x384xf32>
    %c64_257 = arith.constant 64 : index
    %c0_258 = arith.constant 0 : index
    %229 = vector.load %arg7[%c64_257, %c0_258] : memref<72x384xf32, #tpu.memory_space<vmem>>, vector<8x384xf32>
    tpu.vector_store %arg7[%c64_257, %c0_258], %228 {strides = array<i32>} : memref<72x384xf32, #tpu.memory_space<vmem>>, vector<8x384xf32>,
    %c0_259 = arith.constant 0 : index
    %c0_260 = arith.constant 0 : index
    %230 = vector.load %arg7[%c0_259, %c0_260] : memref<72x384xf32, #tpu.memory_space<vmem>>, vector<72x384xf32>
    %231 = arith.truncf %230 : vector<72x384xf32> to vector<72x384xbf16>
    %c7 = arith.constant 7 : index
    %c0_261 = arith.constant 0 : index
    %c0_262 = arith.constant 0 : index
    %232 = vector.load %arg2[%c7, %c0_261, %c0_262] : memref<10x8x72xbf16, #tpu.memory_space<vmem>>, vector<1x8x72xbf16>
    %233 = vector.shape_cast %232 : vector<1x8x72xbf16> to vector<8x72xbf16>
    %cst_263 = arith.constant dense<0.000000e+00> : vector<8x384xf32>
    %234 = tpu.matmul %233, %231, %cst_263 {dimension_numbers = #tpu.dot_dimension_numbers<[1], [0], [0], [1], [0, 0, 1, 1], [], []>} : vector<8x72xbf16>, vector<72x384xbf16>, vector<8x384xf32> -> vector<8x384xf32>
    %c7_264 = arith.constant 7 : index
    %c0_265 = arith.constant 0 : index
    %c0_266 = arith.constant 0 : index
    %235 = vector.load %arg3[%c7_264, %c0_265, %c0_266] : memref<10x8x1xf32, #tpu.memory_space<vmem>>, vector<1x8x1xf32>
    %236 = vector.shape_cast %235 : vector<1x8x1xf32> to vector<8x1xf32>
    %237 = vector.broadcast %236 : vector<8x1xf32> to vector<8x384xf32>
    %238 = arith.addf %234, %237 : vector<8x384xf32>
    %cst_267 = arith.constant 0.000000e+00 : f32
    %239 = vector.broadcast %cst_267 : f32 to vector<8x384xf32>
    %240 = arith.maximumf %238, %239 : vector<8x384xf32>
    %241 = vector.broadcast %0 : vector<1x384xf32> to vector<8x384xf32>
    %242 = arith.mulf %240, %241 : vector<8x384xf32>
    %c0_268 = arith.constant 0 : index
    %c0_269 = arith.constant 0 : index
    %c0_270 = arith.constant 0 : index
    %243 = vector.load %arg5[%c0_268, %c0_269, %c0_270] : memref<1x8x384xf32, #tpu.memory_space<vmem>>, vector<1x8x384xf32>
    %244 = vector.shape_cast %243 : vector<1x8x384xf32> to vector<8x384xf32>
    %245 = vector.shape_cast %242 : vector<8x384xf32> to vector<1x8x384xf32>
    tpu.vector_store %arg5[%c0_268, %c0_269, %c0_270], %245 {strides = array<i32>} : memref<1x8x384xf32, #tpu.memory_space<vmem>>, vector<1x8x384xf32>,
    %c19_i32_271 = arith.constant 19 : i32
    %246 = tpu.dynamic_rotate %242 by %c19_i32_271 dim 1 : vector<8x384xf32>, i32 -> vector<8x384xf32>
    %c0_272 = arith.constant 0 : index
    %c0_273 = arith.constant 0 : index
    %247 = vector.load %arg7[%c0_272, %c0_273] : memref<72x384xf32, #tpu.memory_space<vmem>>, vector<8x384xf32>
    tpu.vector_store %arg7[%c0_272, %c0_273], %246 {strides = array<i32>} : memref<72x384xf32, #tpu.memory_space<vmem>>, vector<8x384xf32>,
    %c18_i32_274 = arith.constant 18 : i32
    %248 = tpu.dynamic_rotate %242 by %c18_i32_274 dim 1 : vector<8x384xf32>, i32 -> vector<8x384xf32>
    %c8_275 = arith.constant 8 : index
    %c0_276 = arith.constant 0 : index
    %249 = vector.load %arg7[%c8_275, %c0_276] : memref<72x384xf32, #tpu.memory_space<vmem>>, vector<8x384xf32>
    tpu.vector_store %arg7[%c8_275, %c0_276], %248 {strides = array<i32>} : memref<72x384xf32, #tpu.memory_space<vmem>>, vector<8x384xf32>,
    %c17_i32_277 = arith.constant 17 : i32
    %250 = tpu.dynamic_rotate %242 by %c17_i32_277 dim 1 : vector<8x384xf32>, i32 -> vector<8x384xf32>
    %c16_278 = arith.constant 16 : index
    %c0_279 = arith.constant 0 : index
    %251 = vector.load %arg7[%c16_278, %c0_279] : memref<72x384xf32, #tpu.memory_space<vmem>>, vector<8x384xf32>
    tpu.vector_store %arg7[%c16_278, %c0_279], %250 {strides = array<i32>} : memref<72x384xf32, #tpu.memory_space<vmem>>, vector<8x384xf32>,
    %c1_i32_280 = arith.constant 1 : i32
    %252 = tpu.dynamic_rotate %242 by %c1_i32_280 dim 1 : vector<8x384xf32>, i32 -> vector<8x384xf32>
    %c24_281 = arith.constant 24 : index
    %c0_282 = arith.constant 0 : index
    %253 = vector.load %arg7[%c24_281, %c0_282] : memref<72x384xf32, #tpu.memory_space<vmem>>, vector<8x384xf32>
    tpu.vector_store %arg7[%c24_281, %c0_282], %252 {strides = array<i32>} : memref<72x384xf32, #tpu.memory_space<vmem>>, vector<8x384xf32>,
    %c32_283 = arith.constant 32 : index
    %c0_284 = arith.constant 0 : index
    %254 = vector.load %arg7[%c32_283, %c0_284] : memref<72x384xf32, #tpu.memory_space<vmem>>, vector<8x384xf32>
    tpu.vector_store %arg7[%c32_283, %c0_284], %242 {strides = array<i32>} : memref<72x384xf32, #tpu.memory_space<vmem>>, vector<8x384xf32>,
    %c383_i32_285 = arith.constant 383 : i32
    %255 = tpu.dynamic_rotate %242 by %c383_i32_285 dim 1 : vector<8x384xf32>, i32 -> vector<8x384xf32>
    %c40_286 = arith.constant 40 : index
    %c0_287 = arith.constant 0 : index
    %256 = vector.load %arg7[%c40_286, %c0_287] : memref<72x384xf32, #tpu.memory_space<vmem>>, vector<8x384xf32>
    tpu.vector_store %arg7[%c40_286, %c0_287], %255 {strides = array<i32>} : memref<72x384xf32, #tpu.memory_space<vmem>>, vector<8x384xf32>,
    %c367_i32_288 = arith.constant 367 : i32
    %257 = tpu.dynamic_rotate %242 by %c367_i32_288 dim 1 : vector<8x384xf32>, i32 -> vector<8x384xf32>
    %c48_289 = arith.constant 48 : index
    %c0_290 = arith.constant 0 : index
    %258 = vector.load %arg7[%c48_289, %c0_290] : memref<72x384xf32, #tpu.memory_space<vmem>>, vector<8x384xf32>
    tpu.vector_store %arg7[%c48_289, %c0_290], %257 {strides = array<i32>} : memref<72x384xf32, #tpu.memory_space<vmem>>, vector<8x384xf32>,
    %c366_i32_291 = arith.constant 366 : i32
    %259 = tpu.dynamic_rotate %242 by %c366_i32_291 dim 1 : vector<8x384xf32>, i32 -> vector<8x384xf32>
    %c56_292 = arith.constant 56 : index
    %c0_293 = arith.constant 0 : index
    %260 = vector.load %arg7[%c56_292, %c0_293] : memref<72x384xf32, #tpu.memory_space<vmem>>, vector<8x384xf32>
    tpu.vector_store %arg7[%c56_292, %c0_293], %259 {strides = array<i32>} : memref<72x384xf32, #tpu.memory_space<vmem>>, vector<8x384xf32>,
    %c365_i32_294 = arith.constant 365 : i32
    %261 = tpu.dynamic_rotate %242 by %c365_i32_294 dim 1 : vector<8x384xf32>, i32 -> vector<8x384xf32>
    %c64_295 = arith.constant 64 : index
    %c0_296 = arith.constant 0 : index
    %262 = vector.load %arg7[%c64_295, %c0_296] : memref<72x384xf32, #tpu.memory_space<vmem>>, vector<8x384xf32>
    tpu.vector_store %arg7[%c64_295, %c0_296], %261 {strides = array<i32>} : memref<72x384xf32, #tpu.memory_space<vmem>>, vector<8x384xf32>,
    %c0_297 = arith.constant 0 : index
    %c0_298 = arith.constant 0 : index
    %263 = vector.load %arg7[%c0_297, %c0_298] : memref<72x384xf32, #tpu.memory_space<vmem>>, vector<72x384xf32>
    %264 = arith.truncf %263 : vector<72x384xf32> to vector<72x384xbf16>
    %c8_299 = arith.constant 8 : index
    %c0_300 = arith.constant 0 : index
    %c0_301 = arith.constant 0 : index
    %265 = vector.load %arg2[%c8_299, %c0_300, %c0_301] : memref<10x8x72xbf16, #tpu.memory_space<vmem>>, vector<1x8x72xbf16>
    %266 = vector.shape_cast %265 : vector<1x8x72xbf16> to vector<8x72xbf16>
    %cst_302 = arith.constant dense<0.000000e+00> : vector<8x384xf32>
    %267 = tpu.matmul %266, %264, %cst_302 {dimension_numbers = #tpu.dot_dimension_numbers<[1], [0], [0], [1], [0, 0, 1, 1], [], []>} : vector<8x72xbf16>, vector<72x384xbf16>, vector<8x384xf32> -> vector<8x384xf32>
    %c8_303 = arith.constant 8 : index
    %c0_304 = arith.constant 0 : index
    %c0_305 = arith.constant 0 : index
    %268 = vector.load %arg3[%c8_303, %c0_304, %c0_305] : memref<10x8x1xf32, #tpu.memory_space<vmem>>, vector<1x8x1xf32>
    %269 = vector.shape_cast %268 : vector<1x8x1xf32> to vector<8x1xf32>
    %270 = vector.broadcast %269 : vector<8x1xf32> to vector<8x384xf32>
    %271 = arith.addf %267, %270 : vector<8x384xf32>
    %cst_306 = arith.constant 0.000000e+00 : f32
    %272 = vector.broadcast %cst_306 : f32 to vector<8x384xf32>
    %273 = arith.maximumf %271, %272 : vector<8x384xf32>
    %274 = vector.broadcast %0 : vector<1x384xf32> to vector<8x384xf32>
    %275 = arith.mulf %273, %274 : vector<8x384xf32>
    %c19_i32_307 = arith.constant 19 : i32
    %276 = tpu.dynamic_rotate %275 by %c19_i32_307 dim 1 : vector<8x384xf32>, i32 -> vector<8x384xf32>
    %c0_308 = arith.constant 0 : index
    %c0_309 = arith.constant 0 : index
    %277 = vector.load %arg7[%c0_308, %c0_309] : memref<72x384xf32, #tpu.memory_space<vmem>>, vector<8x384xf32>
    tpu.vector_store %arg7[%c0_308, %c0_309], %276 {strides = array<i32>} : memref<72x384xf32, #tpu.memory_space<vmem>>, vector<8x384xf32>,
    %c18_i32_310 = arith.constant 18 : i32
    %278 = tpu.dynamic_rotate %275 by %c18_i32_310 dim 1 : vector<8x384xf32>, i32 -> vector<8x384xf32>
    %c8_311 = arith.constant 8 : index
    %c0_312 = arith.constant 0 : index
    %279 = vector.load %arg7[%c8_311, %c0_312] : memref<72x384xf32, #tpu.memory_space<vmem>>, vector<8x384xf32>
    tpu.vector_store %arg7[%c8_311, %c0_312], %278 {strides = array<i32>} : memref<72x384xf32, #tpu.memory_space<vmem>>, vector<8x384xf32>,
    %c17_i32_313 = arith.constant 17 : i32
    %280 = tpu.dynamic_rotate %275 by %c17_i32_313 dim 1 : vector<8x384xf32>, i32 -> vector<8x384xf32>
    %c16_314 = arith.constant 16 : index
    %c0_315 = arith.constant 0 : index
    %281 = vector.load %arg7[%c16_314, %c0_315] : memref<72x384xf32, #tpu.memory_space<vmem>>, vector<8x384xf32>
    tpu.vector_store %arg7[%c16_314, %c0_315], %280 {strides = array<i32>} : memref<72x384xf32, #tpu.memory_space<vmem>>, vector<8x384xf32>,
    %c1_i32_316 = arith.constant 1 : i32
    %282 = tpu.dynamic_rotate %275 by %c1_i32_316 dim 1 : vector<8x384xf32>, i32 -> vector<8x384xf32>
    %c24_317 = arith.constant 24 : index
    %c0_318 = arith.constant 0 : index
    %283 = vector.load %arg7[%c24_317, %c0_318] : memref<72x384xf32, #tpu.memory_space<vmem>>, vector<8x384xf32>
    tpu.vector_store %arg7[%c24_317, %c0_318], %282 {strides = array<i32>} : memref<72x384xf32, #tpu.memory_space<vmem>>, vector<8x384xf32>,
    %c32_319 = arith.constant 32 : index
    %c0_320 = arith.constant 0 : index
    %284 = vector.load %arg7[%c32_319, %c0_320] : memref<72x384xf32, #tpu.memory_space<vmem>>, vector<8x384xf32>
    tpu.vector_store %arg7[%c32_319, %c0_320], %275 {strides = array<i32>} : memref<72x384xf32, #tpu.memory_space<vmem>>, vector<8x384xf32>,
    %c383_i32_321 = arith.constant 383 : i32
    %285 = tpu.dynamic_rotate %275 by %c383_i32_321 dim 1 : vector<8x384xf32>, i32 -> vector<8x384xf32>
    %c40_322 = arith.constant 40 : index
    %c0_323 = arith.constant 0 : index
    %286 = vector.load %arg7[%c40_322, %c0_323] : memref<72x384xf32, #tpu.memory_space<vmem>>, vector<8x384xf32>
    tpu.vector_store %arg7[%c40_322, %c0_323], %285 {strides = array<i32>} : memref<72x384xf32, #tpu.memory_space<vmem>>, vector<8x384xf32>,
    %c367_i32_324 = arith.constant 367 : i32
    %287 = tpu.dynamic_rotate %275 by %c367_i32_324 dim 1 : vector<8x384xf32>, i32 -> vector<8x384xf32>
    %c48_325 = arith.constant 48 : index
    %c0_326 = arith.constant 0 : index
    %288 = vector.load %arg7[%c48_325, %c0_326] : memref<72x384xf32, #tpu.memory_space<vmem>>, vector<8x384xf32>
    tpu.vector_store %arg7[%c48_325, %c0_326], %287 {strides = array<i32>} : memref<72x384xf32, #tpu.memory_space<vmem>>, vector<8x384xf32>,
    %c366_i32_327 = arith.constant 366 : i32
    %289 = tpu.dynamic_rotate %275 by %c366_i32_327 dim 1 : vector<8x384xf32>, i32 -> vector<8x384xf32>
    %c56_328 = arith.constant 56 : index
    %c0_329 = arith.constant 0 : index
    %290 = vector.load %arg7[%c56_328, %c0_329] : memref<72x384xf32, #tpu.memory_space<vmem>>, vector<8x384xf32>
    tpu.vector_store %arg7[%c56_328, %c0_329], %289 {strides = array<i32>} : memref<72x384xf32, #tpu.memory_space<vmem>>, vector<8x384xf32>,
    %c365_i32_330 = arith.constant 365 : i32
    %291 = tpu.dynamic_rotate %275 by %c365_i32_330 dim 1 : vector<8x384xf32>, i32 -> vector<8x384xf32>
    %c64_331 = arith.constant 64 : index
    %c0_332 = arith.constant 0 : index
    %292 = vector.load %arg7[%c64_331, %c0_332] : memref<72x384xf32, #tpu.memory_space<vmem>>, vector<8x384xf32>
    tpu.vector_store %arg7[%c64_331, %c0_332], %291 {strides = array<i32>} : memref<72x384xf32, #tpu.memory_space<vmem>>, vector<8x384xf32>,
    %c0_333 = arith.constant 0 : index
    %c0_334 = arith.constant 0 : index
    %293 = vector.load %arg7[%c0_333, %c0_334] : memref<72x384xf32, #tpu.memory_space<vmem>>, vector<72x384xf32>
    %294 = arith.truncf %293 : vector<72x384xf32> to vector<72x384xbf16>
    %c9 = arith.constant 9 : index
    %c0_335 = arith.constant 0 : index
    %c0_336 = arith.constant 0 : index
    %295 = vector.load %arg2[%c9, %c0_335, %c0_336] : memref<10x8x72xbf16, #tpu.memory_space<vmem>>, vector<1x8x72xbf16>
    %296 = vector.shape_cast %295 : vector<1x8x72xbf16> to vector<8x72xbf16>
    %cst_337 = arith.constant dense<0.000000e+00> : vector<8x384xf32>
    %297 = tpu.matmul %296, %294, %cst_337 {dimension_numbers = #tpu.dot_dimension_numbers<[1], [0], [0], [1], [0, 0, 1, 1], [], []>} : vector<8x72xbf16>, vector<72x384xbf16>, vector<8x384xf32> -> vector<8x384xf32>
    %c9_338 = arith.constant 9 : index
    %c0_339 = arith.constant 0 : index
    %c0_340 = arith.constant 0 : index
    %298 = vector.load %arg3[%c9_338, %c0_339, %c0_340] : memref<10x8x1xf32, #tpu.memory_space<vmem>>, vector<1x8x1xf32>
    %299 = vector.shape_cast %298 : vector<1x8x1xf32> to vector<8x1xf32>
    %300 = vector.broadcast %299 : vector<8x1xf32> to vector<8x384xf32>
    %301 = arith.addf %297, %300 : vector<8x384xf32>
    %cst_341 = arith.constant 0.000000e+00 : f32
    %302 = vector.broadcast %cst_341 : f32 to vector<8x384xf32>
    %303 = arith.maximumf %301, %302 : vector<8x384xf32>
    %304 = vector.broadcast %0 : vector<1x384xf32> to vector<8x384xf32>
    %305 = arith.mulf %303, %304 : vector<8x384xf32>
    %c0_342 = arith.constant 0 : index
    %c0_343 = arith.constant 0 : index
    %c0_344 = arith.constant 0 : index
    %306 = vector.load %arg6[%c0_342, %c0_343, %c0_344] : memref<1x8x384xf32, #tpu.memory_space<vmem>>, vector<1x8x384xf32>
    %307 = vector.shape_cast %306 : vector<1x8x384xf32> to vector<8x384xf32>
    %308 = vector.shape_cast %305 : vector<8x384xf32> to vector<1x8x384xf32>
    tpu.vector_store %arg6[%c0_342, %c0_343, %c0_344], %308 {strides = array<i32>} : memref<1x8x384xf32, #tpu.memory_space<vmem>>, vector<1x8x384xf32>,
    return
  }
  func.func @transform_0(%arg0: i32) -> (i32, i32) {
    %c0_i32 = arith.constant 0 : i32
    %c0_i32_0 = arith.constant 0 : i32
    %c0_i32_1 = arith.constant 0 : i32
    return %c0_i32, %c0_i32_0 : i32, i32
  }
  func.func @transform_1(%arg0: i32) -> (i32, i32, i32) {
    %c0_i32 = arith.constant 0 : i32
    %c0_i32_0 = arith.constant 0 : i32
    %c0_i32_1 = arith.constant 0 : i32
    %c0_i32_2 = arith.constant 0 : i32
    return %c0_i32, %c0_i32_0, %c0_i32_1 : i32, i32, i32
  }
  func.func @transform_2(%arg0: i32) -> (i32, i32, i32) {
    %c0_i32 = arith.constant 0 : i32
    %c0_i32_0 = arith.constant 0 : i32
    %c0_i32_1 = arith.constant 0 : i32
    %c0_i32_2 = arith.constant 0 : i32
    return %c0_i32, %c0_i32_0, %c0_i32_1 : i32, i32, i32
  }
  func.func @transform_3(%arg0: i32) -> (i32, i32, i32) {
    %c0_i32 = arith.constant 0 : i32
    %c0_i32_0 = arith.constant 0 : i32
    %c0_i32_1 = arith.constant 0 : i32
    return %arg0, %c0_i32, %c0_i32_0 : i32, i32, i32
  }
  func.func @transform_4(%arg0: i32) -> (i32, i32, i32) {
    %c0_i32 = arith.constant 0 : i32
    %c0_i32_0 = arith.constant 0 : i32
    %c0_i32_1 = arith.constant 0 : i32
    return %arg0, %c0_i32, %c0_i32_0 : i32, i32, i32
  }
  func.func @transform_5(%arg0: i32) -> (i32, i32, i32) {
    %c0_i32 = arith.constant 0 : i32
    %c0_i32_0 = arith.constant 0 : i32
    %c0_i32_1 = arith.constant 0 : i32
    return %arg0, %c0_i32, %c0_i32_0 : i32, i32, i32
  }
}

</mosaic_0001>

<bundles_post_ra>
// kernel: tpu_custom_call.1
= control target key start
LH: loop header
LB: loop body
LE: loop exit
PB: predicated region body
PF: predicated region fallthrough
CT: control target
= control target key end

     0   :  { %11 = vsyncpa [#allocation4], 0  ;;  %s3736_s0 = inlined_call_operand.vmem [shape: f32[1,384], index: 0, kind: input, shape index: {}]   ;;  %s3737_s1 = inlined_call_operand.vmem [shape: bf16[10,8,72], index: 1, kind: input, shape index: {}]   ;;  %s3738_s2 = inlined_call_operand.vmem [shape: f32[10,8,1], index: 2, kind: input, shape index: {}]   ;;  %s3739_s3 = inlined_call_operand.vmem [shape: f32[1,8,384], index: 3, kind: input, shape index: {}]   ;;  %s3740_s4 = inlined_call_operand.hbm [shape: f32[1,8,384], index: 4, kind: output, shape index: {0}]   ;;  %s3741_s5 = inlined_call_operand.hbm [shape: f32[1,8,384], index: 5, kind: output, shape index: {1}]  }
   0x1   :  { %v2709_v0 = vld [vmem:[%s3739_s3] sm:$0xff]  ;;  %v2714_v1 = vld [vmem:[%s3739_s3 + $0x8] sm:$0xff] }
   0x2   :  { %v2215_v2 = vpack.i.bf16 %v2714_v1, %v2709_v0 }
   0x3   :  { %12 = vsyncpa [#allocation6], 0  ;;  %s2665_s22 = smov 111   ;;  %s2666_s23 = smov 109   ;;  %v2724_v3 = vld [vmem:[%s3739_s3 + $0x10] sm:$0xff]  ;;  %v32_v5 = vlaneseq  ;;  %vm188_vm3 = vcmask 1043456  }
   0x4   :  { %2216 = vrot.lane.b32.xlu1 %v2215_v2, %s2665_s22  ;;  %2211 = vrot.lane.b32.xlu0 %v2215_v2, %s2666_s23  ;;  %s2667_s24 = smov 110   ;;  %s2668_s27 = smov 127   ;;  %v178_v38 = vld [vmem:[%s3738_s2] sm:$0xff]  ;;  %v2673_v41 = vmov 0   ;;  %vm184_vm9 = vcmask 588800  }
   0x5   :  { %2221 = vrot.lane.b32.xlu2 %v2215_v2, %s2667_s24  ;;  %s2669_s28 = smov 17   ;;  %s2670_s3 = smov 1   ;;  %v2747_v6 = vand.u32 127, %v32_v5  ;;  %2250 = vset.pattern.permute.xlu1 %v2673_v41 }
   0x6   :  { %s2671_s29 = smov 19   ;;  %s2672_s30 = smov 18   ;;  %2291 = vset.pattern.permute.xlu0 %v2673_v41  ;;  %2372 = vset.pattern.permute.xlu2 %v2673_v41 }
   0x7   :  { %vm128_vm0 = vcmp.lt.s32.totalorder %v2747_v6, 109  ;;  %vm102_vm1 = vcmp.lt.s32.totalorder %v2747_v6, 111  ;;  %vm115_vm2 = vcmp.lt.s32.totalorder %v2747_v6, 110  ;;  %vm89_vm4 = vcmp.lt.s32.totalorder %v2747_v6, 127  ;;  %s2137_s8 = sshll.u32 %s3741_s5, 4  ;;  %s2138_s8 = int_to_ptr.hbm [resolvable:$true] %s2137_s8 }
   0x8   :  { %vm60_vm5 = vcmp.lt.s32.totalorder %v2747_v6, 17  ;;  %vm73_vm6 = vcmp.lt.s32.totalorder %v2747_v6, 1  ;;  %vm47_vm7 = vcmp.lt.s32.totalorder %v2747_v6, 18  ;;  %vm34_vm8 = vcmp.lt.s32.totalorder %v2747_v6, 19 }
   0xc   :  { %100 = vrot.lane.b32.xlu1 %v2724_v3, %s2665_s22  ;;  %126 = vrot.lane.b32.xlu0 %v2724_v3, %s2666_s23 }
   0xd   :  { %113 = vrot.lane.b32.xlu2 %v2724_v3, %s2667_s24 }
  0x14   :  { %87 = vrot.lane.b32.xlu1 %v2724_v3, %s2668_s27  ;;  %2226 = vrot.lane.b32.xlu0 %v2215_v2, %s2668_s27 }
  0x15   :  { %2231 = vrot.lane.b32.xlu2 %v2215_v2, %s2669_s28 }
  0x1c   :  { %2236 = vrot.lane.b32.xlu1 %v2215_v2, %s2670_s3  ;;  %58 = vrot.lane.b32.xlu0 %v2724_v3, %s2669_s28 }
  0x1d   :  { %71 = vrot.lane.b32.xlu2 %v2724_v3, %s2670_s3 }
  0x24   :  { %2241 = vrot.lane.b32.xlu0 %v2215_v2, %s2671_s29  ;;  %30 = vrot.lane.b32.xlu1 %v2724_v3, %s2671_s29 }
  0x25   :  { %2246 = vrot.lane.b32.xlu2 %v2215_v2, %s2672_s30 }
  0x2c   :  { %45 = vrot.lane.b32.xlu0 %v2724_v3, %s2672_s30  ;;  %181 = vperm.xlu1 %2250, %v178_v38  }
  0x5f   :  { %v2222_v4 = vpop.permute.xlu2 %2221 }
  0x60   :  { %v2224_v8 = vunpack.i.h.bf16 %v2222_v4  ;;  %v2223_v9 = vunpack.i.l.bf16 %v2222_v4 }
  0x62   :  { %v117_v19 = vsel %vm115_vm2, %v2223_v9, %v2224_v8 }
  0x67   :  { %v114_v7 = vpop.permute.xlu2 %113 }
  0x68   :  { %v116_v29 = vsel %vm115_vm2, %v2224_v8, %v114_v7  ;;  %v118_v30 = vsel %vm115_vm2, %v114_v7, %v2223_v9 }
  0x6f   :  { %v2232_v20 = vpop.permute.xlu2 %2231 }
  0x70   :  { %v2234_v50 = vunpack.i.h.bf16 %v2232_v20  ;;  %v2233_v51 = vunpack.i.l.bf16 %v2232_v20 }
  0x72   :  { %v62_v57 = vsel %vm60_vm5, %v2233_v51, %v2234_v50 }
  0x76   :  { %v2217_v10 = vpop.permute.xlu1 %2216  ;;  %v2212_v11 = vpop.permute.xlu0 %2211 }
  0x77   :  { %v2219_v12 = vunpack.i.h.bf16 %v2217_v10  ;;  %v2218_v13 = vunpack.i.l.bf16 %v2217_v10  ;;  %v2214_v14 = vunpack.i.h.bf16 %v2212_v11  ;;  %v2213_v15 = vunpack.i.l.bf16 %v2212_v11  ;;  %v72_v37 = vpop.permute.xlu2 %71 }
  0x79   :  { %v130_v16 = vsel %vm128_vm0, %v2213_v15, %v2214_v14  ;;  %v104_v18 = vsel %vm102_vm1, %v2218_v13, %v2219_v12 }
  0x7a   :  { %v174_v17 = vpack.c.bf16 %v130_v16, %v130_v16  ;;  %v171_v22 = vpack.c.bf16 %v117_v19, %v104_v18 }
  0x7c   :  { %v190_v21 = vsel %vm188_vm3, %v174_v17, 0 }
  0x7d   :  { %201 = vmatpush.bf16.msra.mxu0 %v190_v21 }
  0x7e   :  { %v101_v23 = vpop.permute.xlu1 %100  ;;  %v127_v24 = vpop.permute.xlu0 %126 }
  0x7f   :  { %v129_v25 = vsel %vm128_vm0, %v2214_v14, %v127_v24  ;;  %v131_v26 = vsel %vm128_vm0, %v127_v24, %v2213_v15  ;;  %v103_v33 = vsel %vm102_vm1, %v2219_v12, %v101_v23  ;;  %v105_v34 = vsel %vm102_vm1, %v101_v23, %v2218_v13  ;;  %v2247_v58 = vpop.permute.xlu2 %2246  ;;  %v177_v12 = vld [vmem:[%s3737_s1] sm:$0xf] }
  0x80   :  { %v175_v27 = vpack.c.bf16 %v129_v25, %v129_v25  ;;  %v176_v28 = vpack.c.bf16 %v131_v26, %v131_v26  ;;  %v172_v35 = vpack.c.bf16 %v116_v29, %v103_v33  ;;  %v173_v36 = vpack.c.bf16 %v118_v30, %v105_v34  ;;  %v22_v23 = vld [vmem:[%s3736_s0] sm:$0x7] }
  0x81   :  { %202 = vmatpush.bf16.msra.mxu0 %v171_v22  ;;  %v2249_v2 = vunpack.i.h.bf16 %v2247_v58  ;;  %v2823_v25 = vperm.slane %v22_v23, 1  ;;  %v2838_v38 = vperm.slane %v22_v23, 2 }
  0x82   :  { %v193_v31 = vsel %vm188_vm3, %v175_v27, 0  ;;  %v196_v32 = vsel %vm188_vm3, %v176_v28, 0  ;;  %v2825_v28 = vperm.slane %v22_v23, 0 }
  0x83   :  { %214 = vmatpush.bf16.msra.mxu1 %v193_v31  ;;  %227 = vmatpush.bf16.msra.mxu2 %v196_v32 }
  0x86   :  { %v88_v39 = vpop.permute.xlu1 %87  ;;  %v2227_v40 = vpop.permute.xlu0 %2226 }
  0x87   :  { %v2229_v42 = vunpack.i.h.bf16 %v2227_v40  ;;  %v2228_v43 = vunpack.i.l.bf16 %v2227_v40  ;;  %215 = vmatpush.bf16.msra.mxu1 %v172_v35  ;;  %228 = vmatpush.bf16.msra.mxu2 %v173_v36 }
  0x89   :  { %v91_v44 = vsel %vm89_vm4, %v2228_v43, %v2229_v42  ;;  %v90_v45 = vsel %vm89_vm4, %v2229_v42, %v88_v39  ;;  %v92_v46 = vsel %vm89_vm4, %v88_v39, %v2228_v43 }
  0x8a   :  { %v168_v47 = vpack.c.bf16 %v91_v44, %v2709_v0  ;;  %v169_v48 = vpack.c.bf16 %v90_v45, %v2714_v1  ;;  %v170_v49 = vpack.c.bf16 %v92_v46, %v2724_v3  ;;  %v2248_v3 = vunpack.i.l.bf16 %v2247_v58 }
  0x8c   :  { %203 = vmatpush.bf16.msra.mxu0 %v168_v47  ;;  %216 = vmatpush.bf16.msra.mxu1 %v169_v48  ;;  %v49_v8 = vsel %vm47_vm7, %v2248_v3, %v2249_v2 }
  0x8d   :  { %229 = vmatpush.bf16.msra.mxu2 %v170_v49 }
  0x8e   :  { %v2237_v52 = vpop.permute.xlu1 %2236  ;;  %v59_v53 = vpop.permute.xlu0 %58 }
  0x8f   :  { %v2239_v54 = vunpack.i.h.bf16 %v2237_v52  ;;  %v2238_v55 = vunpack.i.l.bf16 %v2237_v52  ;;  %v63_v56 = vsel %vm60_vm5, %v59_v53, %v2233_v51  ;;  %v61_v61 = vsel %vm60_vm5, %v2234_v50, %v59_v53 }
  0x91   :  { %v76_v59 = vsel %vm73_vm6, %v72_v37, %v2238_v55  ;;  %v75_v60 = vsel %vm73_vm6, %v2238_v55, %v2239_v54  ;;  %v74_v62 = vsel %vm73_vm6, %v2239_v54, %v72_v37 }
  0x92   :  { %v165_v63 = vpack.c.bf16 %v76_v59, %v63_v56  ;;  %v166_v0 = vpack.c.bf16 %v75_v60, %v62_v57  ;;  %v167_v1 = vpack.c.bf16 %v74_v62, %v61_v61 }
  0x94   :  { %204 = vmatpush.bf16.msra.mxu0 %v165_v63  ;;  %217 = vmatpush.bf16.msra.mxu1 %v166_v0 }
  0x95   :  { %230 = vmatpush.bf16.msra.mxu2 %v167_v1 }
  0x96   :  { %v2242_v4 = vpop.permute.xlu0 %2241  ;;  %v31_v11 = vpop.permute.xlu1 %30 }
  0x97   :  { %v2244_v5 = vunpack.i.h.bf16 %v2242_v4  ;;  %v2243_v7 = vunpack.i.l.bf16 %v2242_v4 }
  0x99   :  { %v36_v9 = vsel %vm34_vm8, %v2243_v7, %v2244_v5  ;;  %v37_v14 = vsel %vm34_vm8, %v31_v11, %v2243_v7  ;;  %v35_v16 = vsel %vm34_vm8, %v2244_v5, %v31_v11 }
  0x9a   :  { %v163_v10 = vpack.c.bf16 %v49_v8, %v36_v9 }
  0x9c   :  { %218 = vmatpush.bf16.msra.mxu1 %v163_v10 }
  0x9e   :  { %v46_v13 = vpop.permute.xlu0 %45  ;;  %v182_v20 = vpop.permute.xlu1 %181 }
  0x9f   :  { %2152 = vmatmul.msk.bf16.vlgmr.msra.gmra.mxu1 %vm184_vm9, %v177_v12  ;;  %v50_v15 = vsel %vm47_vm7, %v46_v13, %v2248_v3  ;;  %v48_v17 = vsel %vm47_vm7, %v2249_v2, %v46_v13 }
  0xa0   :  { %v162_v18 = vpack.c.bf16 %v50_v15, %v37_v14  ;;  %v164_v19 = vpack.c.bf16 %v48_v17, %v35_v16  ;;  %v2155_v17 = vld [vmem:[%s3738_s2 + $0x8] sm:$0xff] }
  0xa2   :  { %205 = vmatpush.bf16.msra.mxu0 %v162_v18  ;;  %231 = vmatpush.bf16.msra.mxu2 %v164_v19 }
  0xa5   :  { %2151 = vmatmul.msk.bf16.vlgmr.msra.gmra.mxu0 %vm184_vm9, %v177_v12  ;;  %2153 = vmatmul.msk.bf16.vlgmr.msra.gmra.mxu2 %vm184_vm9, %v177_v12 }
 0x11c   :  { %v220_v21 = vpop.f32.mrf.mxu1 }
 0x11d   :  { %v221_v22 = vadd.f32 %v220_v21, %v182_v20 }
 0x11f   :  { %v238_v24 = vmax.f32 %v221_v22, 0.0 }
 0x121   :  { %v2828_v30 = vmul.f32 %v2823_v25, %v238_v24 }
 0x122   :  { %v207_v26 = vpop.f32.mrf.mxu0 }
 0x123   :  { %v208_v27 = vadd.f32 %v207_v26, %v182_v20 }
 0x124   :  { %v222_v29 = vpop.f32.mrf.mxu1 }
 0x125   :  { %v237_v31 = vmax.f32 %v208_v27, 0.0 }
 0x127   :  { %v2831_v32 = vmul.f32 %v2825_v28, %v237_v31 }
 0x128   :  { %v233_v33 = vpop.f32.mrf.mxu2 }
 0x129   :  { %v234_v34 = vadd.f32 %v233_v33, %v182_v20  ;;  %v2261_v35 = vpack.i.bf16 %v2828_v30, %v2831_v32 }
 0x12a   :  { %v209_v36 = vpop.f32.mrf.mxu0 }
 0x12b   :  { %2262 = vrot.lane.b32.xlu1 %v2261_v35, %s2667_s24  ;;  %2257 = vrot.lane.b32.xlu0 %v2261_v35, %s2665_s22  ;;  %v239_v37 = vmax.f32 %v234_v34, 0.0 }
 0x12c   :  { %2252 = vrot.lane.b32.xlu2 %v2261_v35, %s2666_s23 }
 0x12d   :  { %v2841_v40 = vmul.f32 %v2838_v38, %v239_v37 }
 0x12f   :  { %v2276_v41 = vpack.i.bf16 %v2841_v40, %v2831_v32 }
 0x130   :  { %v235_v39 = vpop.f32.mrf.mxu2 }
 0x133   :  { %317 = vrot.lane.b32.xlu1 %v2841_v40, %s2665_s22  ;;  %2267 = vrot.lane.b32.xlu0 %v2261_v35, %s2668_s27 }
 0x134   :  { %276 = vrot.lane.b32.xlu2 %v2828_v30, %s2669_s28 }
 0x13b   :  { %2277 = vrot.lane.b32.xlu1 %v2276_v41, %s2670_s3  ;;  %2272 = vrot.lane.b32.xlu0 %v2276_v41, %s2669_s28 }
 0x13c   :  { %341 = vrot.lane.b32.xlu2 %v2841_v40, %s2666_s23 }
 0x143   :  { %2287 = vrot.lane.b32.xlu1 %v2276_v41, %s2672_s30  ;;  %2282 = vrot.lane.b32.xlu0 %v2276_v41, %s2671_s29 }
 0x144   :  { %329 = vrot.lane.b32.xlu2 %v2841_v40, %s2667_s24 }
 0x14b   :  { %252 = vrot.lane.b32.xlu1 %v2828_v30, %s2671_s29  ;;  %288 = vrot.lane.b32.xlu0 %v2828_v30, %s2670_s3 }
 0x14c   :  { %305 = vrot.lane.b32.xlu2 %v2841_v40, %s2668_s27 }
 0x153   :  { %397 = vperm.xlu0 %2291, %v2155_v17  }
 0x154   :  { %264 = vrot.lane.b32.xlu2 %v2828_v30, %s2672_s30 }
 0x186   :  { %v2253_v42 = vpop.permute.xlu2 %2252 }
 0x187   :  { %v2255_v43 = vunpack.i.h.bf16 %v2253_v42  ;;  %v2254_v44 = vunpack.i.l.bf16 %v2253_v42  ;;  %v2154_v42 = vld [vmem:[%s3737_s1 + $0x4] sm:$0xf] }
 0x189   :  { %v344_v45 = vsel %vm128_vm0, %v2254_v44, %v2255_v43 }
 0x18a   :  { %v388_v46 = vpack.c.bf16 %v344_v45, %v344_v45 }
 0x18c   :  { %v404_v47 = vsel %vm188_vm3, %v388_v46, 0 }
 0x18d   :  { %415 = vmatpush.bf16.msra.mxu3 %v404_v47 }
 0x18e   :  { %v2869_v48 = vpop.permute.xlu2 %276 }
 0x196   :  { %v342_v49 = vpop.permute.xlu2 %341 }
 0x197   :  { %v343_v50 = vsel %vm128_vm0, %v2255_v43, %v342_v49  ;;  %v345_v51 = vsel %vm128_vm0, %v342_v49, %v2254_v44 }
 0x198   :  { %v389_v52 = vpack.c.bf16 %v343_v50, %v343_v50  ;;  %v390_v53 = vpack.c.bf16 %v345_v51, %v345_v51 }
 0x19a   :  { %v407_v54 = vsel %vm188_vm3, %v389_v52, 0  ;;  %v410_v55 = vsel %vm188_vm3, %v390_v53, 0 }
 0x19b   :  { %428 = vmatpush.bf16.msrb.mxu0 %v407_v54  ;;  %441 = vmatpush.bf16.msrb.mxu1 %v410_v55 }
 0x19d   :  { %v2263_v56 = vpop.permute.xlu1 %2262  ;;  %v2258_v57 = vpop.permute.xlu0 %2257 }
 0x19e   :  { %v2265_v58 = vunpack.i.h.bf16 %v2263_v56  ;;  %v2264_v59 = vunpack.i.l.bf16 %v2263_v56  ;;  %v2260_v60 = vunpack.i.h.bf16 %v2258_v57  ;;  %v2259_v61 = vunpack.i.l.bf16 %v2258_v57  ;;  %v330_v62 = vpop.permute.xlu2 %329 }
 0x1a0   :  { %v320_v63 = vsel %vm102_vm1, %v2259_v61, %v2260_v60  ;;  %v332_v0 = vsel %vm115_vm2, %v2264_v59, %v2265_v58  ;;  %v331_v2 = vsel %vm115_vm2, %v2265_v58, %v330_v62  ;;  %v333_v3 = vsel %vm115_vm2, %v330_v62, %v2264_v59 }
 0x1a1   :  { %v385_v1 = vpack.c.bf16 %v332_v0, %v320_v63 }
 0x1a3   :  { %416 = vmatpush.bf16.msra.mxu3 %v385_v1 }
 0x1a5   :  { %v318_v4 = vpop.permute.xlu1 %317  ;;  %v2268_v5 = vpop.permute.xlu0 %2267 }
 0x1a6   :  { %v2270_v7 = vunpack.i.h.bf16 %v2268_v5  ;;  %v2269_v8 = vunpack.i.l.bf16 %v2268_v5  ;;  %v319_v9 = vsel %vm102_vm1, %v2260_v60, %v318_v4  ;;  %v321_v10 = vsel %vm102_vm1, %v318_v4, %v2259_v61  ;;  %v306_v11 = vpop.permute.xlu2 %305 }
 0x1a7   :  { %v386_v12 = vpack.c.bf16 %v331_v2, %v319_v9  ;;  %v387_v13 = vpack.c.bf16 %v333_v3, %v321_v10 }
 0x1a8   :  { %v307_v14 = vsel %vm89_vm4, %v2270_v7, %v306_v11  ;;  %v309_v15 = vsel %vm89_vm4, %v306_v11, %v2269_v8  ;;  %v308_v16 = vsel %vm89_vm4, %v2269_v8, %v2270_v7 }
 0x1a9   :  { %429 = vmatpush.bf16.msrb.mxu0 %v386_v12  ;;  %442 = vmatpush.bf16.msrb.mxu1 %v387_v13  ;;  %v382_v18 = vpack.c.bf16 %v308_v16, %v2831_v32  ;;  %v383_v19 = vpack.c.bf16 %v307_v14, %v2828_v30  ;;  %v384_v20 = vpack.c.bf16 %v309_v15, %v2841_v40  ;;  %v2160_v12 = vld [vmem:[%s3738_s2 + $0x10] sm:$0xff] }
 0x1ab   :  { %417 = vmatpush.bf16.msra.mxu3 %v382_v18 }
 0x1ad   :  { %v2278_v21 = vpop.permute.xlu1 %2277  ;;  %v2273_v22 = vpop.permute.xlu0 %2272  ;;  %430 = vmatpush.bf16.msrb.mxu0 %v383_v19  ;;  %443 = vmatpush.bf16.msrb.mxu1 %v384_v20 }
 0x1ae   :  { %v2280_v23 = vunpack.i.h.bf16 %v2278_v21  ;;  %v2279_v24 = vunpack.i.l.bf16 %v2278_v21  ;;  %v2275_v26 = vunpack.i.h.bf16 %v2273_v22  ;;  %v2274_v27 = vunpack.i.l.bf16 %v2273_v22  ;;  %v265_v54 = vpop.permute.xlu2 %264 }
 0x1b0   :  { %v282_v29 = vsel %vm60_vm5, %v2275_v26, %v2274_v27  ;;  %v294_v31 = vsel %vm73_vm6, %v2280_v23, %v2279_v24  ;;  %v281_v47 = vsel %vm60_vm5, %v2274_v27, %v2869_v48  ;;  %v280_v49 = vsel %vm60_vm5, %v2869_v48, %v2275_v26 }
 0x1b1   :  { %v379_v32 = vpack.c.bf16 %v294_v31, %v282_v29 }
 0x1b3   :  { %418 = vmatpush.bf16.msra.mxu3 %v379_v32 }
 0x1b5   :  { %v2288_v33 = vpop.permute.xlu1 %2287  ;;  %v2283_v30 = vpop.permute.xlu0 %2282 }
 0x1b6   :  { %v2290_v34 = vunpack.i.h.bf16 %v2288_v33  ;;  %v2289_v35 = vunpack.i.l.bf16 %v2288_v33  ;;  %v2285_v36 = vunpack.i.h.bf16 %v2283_v30  ;;  %v2284_v37 = vunpack.i.l.bf16 %v2283_v30 }
 0x1b8   :  { %v258_v39 = vsel %vm34_vm8, %v2285_v36, %v2284_v37  ;;  %v270_v40 = vsel %vm47_vm7, %v2290_v34, %v2289_v35  ;;  %v269_v55 = vsel %vm47_vm7, %v2289_v35, %v265_v54  ;;  %v268_v56 = vsel %vm47_vm7, %v265_v54, %v2290_v34 }
 0x1b9   :  { %v376_v41 = vpack.c.bf16 %v270_v40, %v258_v39 }
 0x1bb   :  { %419 = vmatpush.bf16.msra.mxu3 %v376_v41 }
 0x1bd   :  { %v253_v43 = vpop.permute.xlu1 %252  ;;  %v289_v44 = vpop.permute.xlu0 %288 }
 0x1be   :  { %v292_v45 = vsel %vm73_vm6, %v289_v44, %v2280_v23  ;;  %v293_v46 = vsel %vm73_vm6, %v2279_v24, %v289_v44  ;;  %2156 = vmatmul.msk.bf16.vlgmr.msra.gmra.mxu3 %vm184_vm9, %v2154_v42  ;;  %v256_v52 = vsel %vm34_vm8, %v253_v43, %v2285_v36  ;;  %v257_v53 = vsel %vm34_vm8, %v2284_v37, %v253_v43 }
 0x1bf   :  { %v380_v50 = vpack.c.bf16 %v293_v46, %v281_v47  ;;  %v381_v51 = vpack.c.bf16 %v292_v45, %v280_v49  ;;  %v377_v57 = vpack.c.bf16 %v269_v55, %v257_v53  ;;  %v378_v58 = vpack.c.bf16 %v268_v56, %v256_v52 }
 0x1c1   :  { %431 = vmatpush.bf16.msrb.mxu0 %v380_v50  ;;  %444 = vmatpush.bf16.msrb.mxu1 %v381_v51 }
 0x1c5   :  { %432 = vmatpush.bf16.msrb.mxu0 %v377_v57  ;;  %445 = vmatpush.bf16.msrb.mxu1 %v378_v58  ;;  %v398_v48 = vpop.permute.xlu0 %397 }
 0x1c8   :  { %2157 = vmatmul.msk.bf16.vlgmr.msrb.gmra.mxu0 %vm184_vm9, %v2154_v42  ;;  %2158 = vmatmul.msk.bf16.vlgmr.msrb.gmra.mxu1 %vm184_vm9, %v2154_v42 }
 0x241   :  { %v421_v59 = vpop.f32.mrf.mxu3 }
 0x242   :  { %v422_v60 = vadd.f32 %v421_v59, %v398_v48 }
 0x244   :  { %v451_v61 = vmax.f32 %v422_v60, 0.0 }
 0x245   :  { %v434_v62 = vpop.f32.mrf.mxu0  ;;  %v447_v63 = vpop.f32.mrf.mxu1 }
 0x246   :  { %v435_v0 = vadd.f32 %v434_v62, %v398_v48  ;;  %v448_v1 = vadd.f32 %v447_v63, %v398_v48  ;;  %v2934_v2 = vmul.f32 %v451_v61, %v2825_v28 }
 0x248   :  { %v452_v3 = vmax.f32 %v435_v0, 0.0  ;;  %v453_v4 = vmax.f32 %v448_v1, 0.0 }
 0x249   :  { %v423_v5 = vpop.f32.mrf.mxu3 }
 0x24a   :  { %v2937_v7 = vmul.f32 %v452_v3, %v2823_v25  ;;  %v2940_v8 = vmul.f32 %v453_v4, %v2838_v38 }
 0x24c   :  { %548 = vrot.lane.b32.xlu2 %v2940_v8, %s2666_s23  ;;  %v2302_v9 = vpack.i.bf16 %v2937_v7, %v2934_v2 }
 0x24d   :  { %v436_v10 = vpop.f32.mrf.mxu0  ;;  %v449_v11 = vpop.f32.mrf.mxu1 }
 0x24e   :  { %2303 = vrot.lane.b32.xlu0 %v2302_v9, %s2667_s24  ;;  %2293 = vrot.lane.b32.xlu1 %v2302_v9, %s2666_s23 }
 0x254   :  { %524 = vrot.lane.b32.xlu2 %v2940_v8, %s2665_s22 }
 0x256   :  { %512 = vrot.lane.b32.xlu0 %v2940_v8, %s2668_s27  ;;  %2298 = vrot.lane.b32.xlu1 %v2302_v9, %s2665_s22 }
 0x25c   :  { %2308 = vrot.lane.b32.xlu2 %v2302_v9, %s2668_s27 }
 0x25e   :  { %2318 = vrot.lane.b32.xlu0 %v2302_v9, %s2670_s3  ;;  %536 = vrot.lane.b32.xlu1 %v2940_v8, %s2667_s24 }
 0x264   :  { %485 = vrot.lane.b32.xlu2 %v2940_v8, %s2669_s28 }
 0x266   :  { %461 = vrot.lane.b32.xlu0 %v2940_v8, %s2671_s29  ;;  %2313 = vrot.lane.b32.xlu1 %v2302_v9, %s2669_s28 }
 0x26c   :  { %2323 = vrot.lane.b32.xlu2 %v2302_v9, %s2671_s29 }
 0x26e   :  { %604 = vperm.xlu0 %2291, %v2160_v12   ;;  %497 = vrot.lane.b32.xlu1 %v2940_v8, %s2670_s3 }
 0x274   :  { %473 = vrot.lane.b32.xlu2 %v2940_v8, %s2672_s30 }
 0x276   :  { %2328 = vrot.lane.b32.xlu1 %v2302_v9, %s2672_s30 }
 0x2a6   :  { %v549_v13 = vpop.permute.xlu2 %548 }
 0x2ae   :  { %v525_v14 = vpop.permute.xlu2 %524 }
 0x2b6   :  { %v2309_v26 = vpop.permute.xlu2 %2308 }
 0x2b7   :  { %v2311_v34 = vunpack.i.h.bf16 %v2309_v26  ;;  %v2310_v35 = vunpack.i.l.bf16 %v2309_v26 }
 0x2b9   :  { %v515_v43 = vsel %vm89_vm4, %v2310_v35, %v2311_v34 }
 0x2ba   :  { %v589_v45 = vpack.c.bf16 %v515_v43, %v2934_v2 }
 0x2be   :  { %v486_v56 = vpop.permute.xlu2 %485 }
 0x2c0   :  { %v2304_v15 = vpop.permute.xlu0 %2303  ;;  %v2294_v16 = vpop.permute.xlu1 %2293 }
 0x2c1   :  { %v2296_v17 = vunpack.i.h.bf16 %v2294_v16  ;;  %v2295_v18 = vunpack.i.l.bf16 %v2294_v16  ;;  %v2306_v32 = vunpack.i.h.bf16 %v2304_v15  ;;  %v2305_v33 = vunpack.i.l.bf16 %v2304_v15 }
 0x2c3   :  { %v551_v19 = vsel %vm128_vm0, %v2295_v18, %v2296_v17  ;;  %v550_v20 = vsel %vm128_vm0, %v2296_v17, %v549_v13  ;;  %v552_v21 = vsel %vm128_vm0, %v549_v13, %v2295_v18  ;;  %v539_v41 = vsel %vm115_vm2, %v2305_v33, %v2306_v32 }
 0x2c4   :  { %v595_v22 = vpack.c.bf16 %v551_v19, %v551_v19  ;;  %v596_v23 = vpack.c.bf16 %v550_v20, %v550_v20  ;;  %v597_v24 = vpack.c.bf16 %v552_v21, %v552_v21 }
 0x2c6   :  { %v611_v27 = vsel %vm188_vm3, %v595_v22, 0  ;;  %v614_v29 = vsel %vm188_vm3, %v596_v23, 0  ;;  %v617_v31 = vsel %vm188_vm3, %v597_v24, 0  ;;  %v2324_v2 = vpop.permute.xlu2 %2323 }
 0x2c7   :  { %622 = vmatpush.bf16.msrb.mxu2 %v611_v27  ;;  %635 = vmatpush.bf16.msrb.mxu3 %v614_v29  ;;  %v2326_v11 = vunpack.i.h.bf16 %v2324_v2  ;;  %v2325_v12 = vunpack.i.l.bf16 %v2324_v2  ;;  %v2159_v29 = vld [vmem:[%s3737_s1 + $0x8] sm:$0xf] }
 0x2c8   :  { %648 = vmatpush.bf16.msra.mxu0 %v617_v31  ;;  %v2299_v30 = vpop.permute.xlu1 %2298  ;;  %v513_v39 = vpop.permute.xlu0 %512 }
 0x2c9   :  { %v2301_v36 = vunpack.i.h.bf16 %v2299_v30  ;;  %v2300_v37 = vunpack.i.l.bf16 %v2299_v30  ;;  %v514_v53 = vsel %vm89_vm4, %v2311_v34, %v513_v39  ;;  %v516_v54 = vsel %vm89_vm4, %v513_v39, %v2310_v35 }
 0x2ca   :  { %v591_v57 = vpack.c.bf16 %v516_v54, %v2940_v8  ;;  %v590_v58 = vpack.c.bf16 %v514_v53, %v2937_v7  ;;  %v464_v19 = vsel %vm34_vm8, %v2325_v12, %v2326_v11 }
 0x2cb   :  { %v527_v40 = vsel %vm102_vm1, %v2300_v37, %v2301_v36  ;;  %v528_v46 = vsel %vm102_vm1, %v525_v14, %v2300_v37  ;;  %v526_v50 = vsel %vm102_vm1, %v2301_v36, %v525_v14 }
 0x2cc   :  { %v592_v42 = vpack.c.bf16 %v539_v41, %v527_v40 }
 0x2ce   :  { %623 = vmatpush.bf16.msrb.mxu2 %v592_v42  ;;  %v474_v17 = vpop.permute.xlu2 %473 }
 0x2d0   :  { %v537_v44 = vpop.permute.xlu1 %536  ;;  %v2319_v55 = vpop.permute.xlu0 %2318 }
 0x2d1   :  { %v538_v47 = vsel %vm115_vm2, %v2306_v32, %v537_v44  ;;  %v540_v49 = vsel %vm115_vm2, %v537_v44, %v2305_v33  ;;  %v2321_v48 = vunpack.i.h.bf16 %v2319_v55  ;;  %v2320_v59 = vunpack.i.l.bf16 %v2319_v55 }
 0x2d2   :  { %v594_v51 = vpack.c.bf16 %v540_v49, %v528_v46  ;;  %624 = vmatpush.bf16.msrb.mxu2 %v589_v45  ;;  %v593_v52 = vpack.c.bf16 %v538_v47, %v526_v50 }
 0x2d3   :  { %v500_v0 = vsel %vm73_vm6, %v2320_v59, %v2321_v48 }
 0x2d4   :  { %636 = vmatpush.bf16.msrb.mxu3 %v593_v52  ;;  %649 = vmatpush.bf16.msra.mxu0 %v594_v51 }
 0x2d8   :  { %v2314_v60 = vpop.permute.xlu1 %2313  ;;  %637 = vmatpush.bf16.msrb.mxu3 %v590_v58  ;;  %650 = vmatpush.bf16.msra.mxu0 %v591_v57  ;;  %v462_v13 = vpop.permute.xlu0 %461 }
 0x2d9   :  { %v2316_v61 = vunpack.i.h.bf16 %v2314_v60  ;;  %v2315_v62 = vunpack.i.l.bf16 %v2314_v60  ;;  %v463_v18 = vsel %vm34_vm8, %v2326_v11, %v462_v13  ;;  %v465_v20 = vsel %vm34_vm8, %v462_v13, %v2325_v12 }
 0x2db   :  { %v488_v63 = vsel %vm60_vm5, %v2315_v62, %v2316_v61  ;;  %v487_v4 = vsel %vm60_vm5, %v2316_v61, %v486_v56  ;;  %v489_v8 = vsel %vm60_vm5, %v486_v56, %v2315_v62  ;;  %v2165_v56 = vld [vmem:[%s3738_s2 + $0x18] sm:$0xff] }
 0x2dc   :  { %v587_v1 = vpack.c.bf16 %v500_v0, %v488_v63 }
 0x2de   :  { %638 = vmatpush.bf16.msrb.mxu3 %v587_v1 }
 0x2e0   :  { %v498_v3 = vpop.permute.xlu1 %497  ;;  %v605_v31 = vpop.permute.xlu0 %604 }
 0x2e1   :  { %v499_v5 = vsel %vm73_vm6, %v2321_v48, %v498_v3  ;;  %v501_v7 = vsel %vm73_vm6, %v498_v3, %v2320_v59 }
 0x2e2   :  { %v588_v9 = vpack.c.bf16 %v499_v5, %v487_v4  ;;  %v586_v10 = vpack.c.bf16 %v501_v7, %v489_v8 }
 0x2e4   :  { %625 = vmatpush.bf16.msrb.mxu2 %v586_v10  ;;  %651 = vmatpush.bf16.msra.mxu0 %v588_v9 }
 0x2e8   :  { %v2329_v14 = vpop.permute.xlu1 %2328 }
 0x2e9   :  { %v2331_v15 = vunpack.i.h.bf16 %v2329_v14  ;;  %v2330_v16 = vunpack.i.l.bf16 %v2329_v14 }
 0x2eb   :  { %v477_v21 = vsel %vm47_vm7, %v474_v17, %v2330_v16  ;;  %v476_v22 = vsel %vm47_vm7, %v2330_v16, %v2331_v15  ;;  %v475_v23 = vsel %vm47_vm7, %v2331_v15, %v474_v17 }
 0x2ec   :  { %v583_v24 = vpack.c.bf16 %v477_v21, %v465_v20  ;;  %v584_v26 = vpack.c.bf16 %v476_v22, %v464_v19  ;;  %v585_v27 = vpack.c.bf16 %v475_v23, %v463_v18 }
 0x2ee   :  { %626 = vmatpush.bf16.msrb.mxu2 %v583_v24  ;;  %639 = vmatpush.bf16.msrb.mxu3 %v584_v26 }
 0x2ef   :  { %652 = vmatpush.bf16.msra.mxu0 %v585_v27 }
 0x2f1   :  { %2161 = vmatmul.msk.bf16.vlgmr.msrb.gmra.mxu2 %vm184_vm9, %v2159_v29  ;;  %2162 = vmatmul.msk.bf16.vlgmr.msrb.gmra.mxu3 %vm184_vm9, %v2159_v29 }
 0x2f2   :  { %2163 = vmatmul.msk.bf16.vlgmr.msra.gmra.mxu0 %vm184_vm9, %v2159_v29 }
 0x36f   :  { %v654_v32 = vpop.f32.mrf.mxu0 }
 0x370   :  { %v655_v33 = vadd.f32 %v654_v32, %v605_v31 }
 0x372   :  { %v660_v30 = vmax.f32 %v655_v33, 0.0 }
 0x374   :  { %v3032_v34 = vmul.f32 %v660_v30, %v2838_v38  ;;  %v628_v35 = vpop.f32.mrf.mxu2  ;;  %v641_v36 = vpop.f32.mrf.mxu3 }
 0x375   :  { %v629_v39 = vadd.f32 %v628_v35, %v605_v31  ;;  %v642_v40 = vadd.f32 %v641_v36, %v605_v31 }
 0x376   :  { %743 = vrot.lane.b32.xlu0 %v3032_v34, %s2667_s24  ;;  %731 = vrot.lane.b32.xlu1 %v3032_v34, %s2665_s22 }
 0x377   :  { %755 = vrot.lane.b32.xlu2 %v3032_v34, %s2666_s23  ;;  %v656_v37 = vpop.f32.mrf.mxu0  ;;  %v658_v41 = vmax.f32 %v629_v39, 0.0  ;;  %v659_v42 = vmax.f32 %v642_v40, 0.0 }
 0x379   :  { %v3047_v45 = vmul.f32 %v658_v41, %v2825_v28  ;;  %v3050_v46 = vmul.f32 %v659_v42, %v2823_v25 }
 0x37b   :  { %v2337_v47 = vpack.i.bf16 %v3050_v46, %v3047_v45 }
 0x37c   :  { %v630_v43 = vpop.f32.mrf.mxu2  ;;  %v643_v44 = vpop.f32.mrf.mxu3 }
 0x37e   :  { %704 = vrot.lane.b32.xlu0 %v3032_v34, %s2670_s3  ;;  %692 = vrot.lane.b32.xlu1 %v3032_v34, %s2669_s28 }
 0x37f   :  { %719 = vrot.lane.b32.xlu2 %v3032_v34, %s2668_s27 }
 0x386   :  { %2338 = vrot.lane.b32.xlu0 %v2337_v47, %s2665_s22  ;;  %2333 = vrot.lane.b32.xlu1 %v2337_v47, %s2666_s23 }
 0x387   :  { %2343 = vrot.lane.b32.xlu2 %v2337_v47, %s2667_s24 }
 0x38e   :  { %2353 = vrot.lane.b32.xlu0 %v2337_v47, %s2669_s28  ;;  %2348 = vrot.lane.b32.xlu1 %v2337_v47, %s2668_s27 }
 0x38f   :  { %2358 = vrot.lane.b32.xlu2 %v2337_v47, %s2670_s3 }
 0x396   :  { %2368 = vrot.lane.b32.xlu0 %v2337_v47, %s2672_s30  ;;  %2363 = vrot.lane.b32.xlu1 %v2337_v47, %s2671_s29 }
 0x397   :  { %668 = vrot.lane.b32.xlu2 %v3032_v34, %s2671_s29 }
 0x39e   :  { %680 = vrot.lane.b32.xlu1 %v3032_v34, %s2672_s30 }
 0x39f   :  { %811 = vperm.xlu2 %2372, %v2165_v56   ;;  %v2164_v56 = vld [vmem:[%s3737_s1 + $0xc] sm:$0xf] }
 0x3d1   :  { %v756_v49 = vpop.permute.xlu2 %755 }
 0x3d9   :  { %v720_v52 = vpop.permute.xlu2 %719 }
 0x3e1   :  { %v2344_v55 = vpop.permute.xlu2 %2343 }
 0x3e2   :  { %v2346_v62 = vunpack.i.h.bf16 %v2344_v55  ;;  %v2345_v63 = vunpack.i.l.bf16 %v2344_v55 }
 0x3e4   :  { %v746_v14 = vsel %vm115_vm2, %v2345_v63, %v2346_v62 }
 0x3e8   :  { %v744_v50 = vpop.permute.xlu0 %743  ;;  %v732_v51 = vpop.permute.xlu1 %731 }
 0x3e9   :  { %v745_v12 = vsel %vm115_vm2, %v2346_v62, %v744_v50  ;;  %v2359_v13 = vpop.permute.xlu2 %2358  ;;  %v747_v16 = vsel %vm115_vm2, %v744_v50, %v2345_v63 }
 0x3ea   :  { %v2361_v26 = vunpack.i.h.bf16 %v2359_v13  ;;  %v2360_v29 = vunpack.i.l.bf16 %v2359_v13 }
 0x3ec   :  { %v707_v41 = vsel %vm73_vm6, %v2360_v29, %v2361_v26 }
 0x3f0   :  { %v705_v53 = vpop.permute.xlu0 %704  ;;  %v693_v54 = vpop.permute.xlu1 %692 }
 0x3f1   :  { %v708_v40 = vsel %vm73_vm6, %v705_v53, %v2360_v29 }
 0x3f8   :  { %v2339_v57 = vpop.permute.xlu0 %2338  ;;  %v2334_v58 = vpop.permute.xlu1 %2333 }
 0x3f9   :  { %v2341_v48 = vunpack.i.h.bf16 %v2339_v57  ;;  %v2340_v59 = vunpack.i.l.bf16 %v2339_v57  ;;  %v2336_v60 = vunpack.i.h.bf16 %v2334_v58  ;;  %v2335_v61 = vunpack.i.l.bf16 %v2334_v58  ;;  %v669_v57 = vpop.permute.xlu2 %668 }
 0x3fb   :  { %v758_v0 = vsel %vm128_vm0, %v2335_v61, %v2336_v60  ;;  %v757_v1 = vsel %vm128_vm0, %v2336_v60, %v756_v49  ;;  %v759_v2 = vsel %vm128_vm0, %v756_v49, %v2335_v61  ;;  %v734_v7 = vsel %vm102_vm1, %v2340_v59, %v2341_v48 }
 0x3fc   :  { %v802_v3 = vpack.c.bf16 %v758_v0, %v758_v0  ;;  %v803_v4 = vpack.c.bf16 %v757_v1, %v757_v1  ;;  %v804_v5 = vpack.c.bf16 %v759_v2, %v759_v2  ;;  %v733_v8 = vsel %vm102_vm1, %v2341_v48, %v732_v51 }
 0x3fd   :  { %v735_v15 = vsel %vm102_vm1, %v732_v51, %v2340_v59  ;;  %v799_v19 = vpack.c.bf16 %v746_v14, %v734_v7  ;;  %v800_v20 = vpack.c.bf16 %v745_v12, %v733_v8 }
 0x3fe   :  { %v818_v9 = vsel %vm188_vm3, %v802_v3, 0  ;;  %v821_v10 = vsel %vm188_vm3, %v803_v4, 0  ;;  %v824_v11 = vsel %vm188_vm3, %v804_v5, 0  ;;  %v801_v27 = vpack.c.bf16 %v747_v16, %v735_v15 }
 0x3ff   :  { %829 = vmatpush.bf16.msra.mxu1 %v818_v9  ;;  %842 = vmatpush.bf16.msra.mxu2 %v821_v10 }
 0x400   :  { %855 = vmatpush.bf16.msra.mxu3 %v824_v11  ;;  %v2354_v17 = vpop.permute.xlu0 %2353  ;;  %v2349_v18 = vpop.permute.xlu1 %2348 }
 0x401   :  { %v2356_v21 = vunpack.i.h.bf16 %v2354_v17  ;;  %v2355_v22 = vunpack.i.l.bf16 %v2354_v17  ;;  %v2351_v23 = vunpack.i.h.bf16 %v2349_v18  ;;  %v2350_v24 = vunpack.i.l.bf16 %v2349_v18  ;;  %v812_v0 = vpop.permute.xlu2 %811  ;;  %v2170_v18 = vld [vmem:[%s3738_s2 + $0x20] sm:$0xff] }
 0x403   :  { %830 = vmatpush.bf16.msra.mxu1 %v799_v19  ;;  %843 = vmatpush.bf16.msra.mxu2 %v800_v20  ;;  %v722_v31 = vsel %vm89_vm4, %v2350_v24, %v2351_v23  ;;  %v721_v32 = vsel %vm89_vm4, %v2351_v23, %v720_v52  ;;  %v723_v33 = vsel %vm89_vm4, %v720_v52, %v2350_v24 }
 0x404   :  { %856 = vmatpush.bf16.msra.mxu3 %v801_v27  ;;  %v796_v30 = vpack.c.bf16 %v722_v31, %v3047_v45  ;;  %v797_v35 = vpack.c.bf16 %v721_v32, %v3050_v46  ;;  %v798_v36 = vpack.c.bf16 %v723_v33, %v3032_v34  ;;  %v696_v37 = vsel %vm60_vm5, %v693_v54, %v2355_v22 }
 0x405   :  { %v695_v39 = vsel %vm60_vm5, %v2355_v22, %v2356_v21  ;;  %v694_v42 = vsel %vm60_vm5, %v2356_v21, %v693_v54  ;;  %v706_v34 = vsel %vm73_vm6, %v2361_v26, %v705_v53  ;;  %v793_v45 = vpack.c.bf16 %v708_v40, %v696_v37 }
 0x406   :  { %v794_v46 = vpack.c.bf16 %v707_v41, %v695_v39  ;;  %v795_v52 = vpack.c.bf16 %v706_v34, %v694_v42 }
 0x407   :  { %831 = vmatpush.bf16.msra.mxu1 %v796_v30  ;;  %844 = vmatpush.bf16.msra.mxu2 %v797_v35 }
 0x408   :  { %857 = vmatpush.bf16.msra.mxu3 %v798_v36  ;;  %v2369_v43 = vpop.permute.xlu0 %2368  ;;  %v2364_v44 = vpop.permute.xlu1 %2363 }
 0x409   :  { %v2371_v47 = vunpack.i.h.bf16 %v2369_v43  ;;  %v2370_v49 = vunpack.i.l.bf16 %v2369_v43  ;;  %v2366_v50 = vunpack.i.h.bf16 %v2364_v44  ;;  %v2365_v51 = vunpack.i.l.bf16 %v2364_v44 }
 0x40b   :  { %832 = vmatpush.bf16.msra.mxu1 %v793_v45  ;;  %845 = vmatpush.bf16.msra.mxu2 %v794_v46  ;;  %v671_v55 = vsel %vm34_vm8, %v2365_v51, %v2366_v50  ;;  %v683_v54 = vsel %vm47_vm7, %v2370_v49, %v2371_v47  ;;  %v670_v48 = vsel %vm34_vm8, %v2366_v50, %v669_v57 }
 0x40c   :  { %858 = vmatpush.bf16.msra.mxu3 %v795_v52  ;;  %v791_v53 = vpack.c.bf16 %v683_v54, %v671_v55  ;;  %v672_v59 = vsel %vm34_vm8, %v669_v57, %v2365_v51 }
 0x40f   :  { %846 = vmatpush.bf16.msra.mxu2 %v791_v53 }
 0x410   :  { %v681_v58 = vpop.permute.xlu1 %680 }
 0x411   :  { %v682_v60 = vsel %vm47_vm7, %v2371_v47, %v681_v58  ;;  %v684_v61 = vsel %vm47_vm7, %v681_v58, %v2370_v49 }
 0x412   :  { %v790_v62 = vpack.c.bf16 %v684_v61, %v672_v59  ;;  %v792_v63 = vpack.c.bf16 %v682_v60, %v670_v48  ;;  %2167 = vmatmul.msk.bf16.vlgmr.msra.gmra.mxu2 %vm184_vm9, %v2164_v56 }
 0x414   :  { %833 = vmatpush.bf16.msra.mxu1 %v790_v62  ;;  %859 = vmatpush.bf16.msra.mxu3 %v792_v63 }
 0x417   :  { %2166 = vmatmul.msk.bf16.vlgmr.msra.gmra.mxu1 %vm184_vm9, %v2164_v56  ;;  %2168 = vmatmul.msk.bf16.vlgmr.msra.gmra.mxu3 %vm184_vm9, %v2164_v56 }
 0x494   :  { %v835_v1 = vpop.f32.mrf.mxu1 }
 0x495   :  { %v836_v2 = vadd.f32 %v835_v1, %v812_v0  ;;  %v848_v3 = vpop.f32.mrf.mxu2 }
 0x496   :  { %v849_v4 = vadd.f32 %v848_v3, %v812_v0 }
 0x497   :  { %v865_v5 = vmax.f32 %v836_v2, 0.0 }
 0x498   :  { %v866_v7 = vmax.f32 %v849_v4, 0.0 }
 0x499   :  { %v3130_v8 = vmul.f32 %v865_v5, %v2825_v28 }
 0x49a   :  { %v3133_v9 = vmul.f32 %v866_v7, %v2823_v25  ;;  %v861_v10 = vpop.f32.mrf.mxu3 }
 0x49b   :  { %v862_v11 = vadd.f32 %v861_v10, %v812_v0 }
 0x49c   :  { %v837_v12 = vpop.f32.mrf.mxu1  ;;  %v2378_v13 = vpack.i.bf16 %v3133_v9, %v3130_v8 }
 0x49d   :  { %v867_v14 = vmax.f32 %v862_v11, 0.0  ;;  %v850_v15 = vpop.f32.mrf.mxu2 }
 0x49e   :  { %2379 = vrot.lane.b32.xlu2 %v2378_v13, %s2665_s22  ;;  %2374 = vrot.lane.b32.xlu0 %v2378_v13, %s2666_s23 }
 0x49f   :  { %v3140_v16 = vmul.f32 %v867_v14, %v2838_v38 }
 0x4a1   :  { %962 = vrot.lane.b32.xlu1 %v3140_v16, %s2666_s23 }
 0x4a2   :  { %v863_v17 = vpop.f32.mrf.mxu3 }
 0x4a6   :  { %950 = vrot.lane.b32.xlu2 %v3140_v16, %s2667_s24  ;;  %938 = vrot.lane.b32.xlu0 %v3140_v16, %s2665_s22 }
 0x4a9   :  { %2384 = vrot.lane.b32.xlu1 %v2378_v13, %s2667_s24 }
 0x4ae   :  { %2394 = vrot.lane.b32.xlu2 %v2378_v13, %s2669_s28  ;;  %2389 = vrot.lane.b32.xlu0 %v2378_v13, %s2668_s27 }
 0x4b1   :  { %926 = vrot.lane.b32.xlu1 %v3140_v16, %s2668_s27 }
 0x4b6   :  { %911 = vrot.lane.b32.xlu2 %v3140_v16, %s2670_s3  ;;  %899 = vrot.lane.b32.xlu0 %v3140_v16, %s2669_s28 }
 0x4b9   :  { %2399 = vrot.lane.b32.xlu1 %v2378_v13, %s2670_s3 }
 0x4be   :  { %2409 = vrot.lane.b32.xlu2 %v2378_v13, %s2672_s30  ;;  %2404 = vrot.lane.b32.xlu0 %v2378_v13, %s2671_s29 }
 0x4c1   :  { %875 = vrot.lane.b32.xlu1 %v3140_v16, %s2671_s29 }
 0x4c6   :  { %887 = vrot.lane.b32.xlu0 %v3140_v16, %s2672_s30 }
 0x4c9   :  { %1018 = vperm.xlu1 %2250, %v2170_v18  }
 0x4f8   :  { %v2380_v19 = vpop.permute.xlu2 %2379 }
 0x4f9   :  { %v2382_v40 = vunpack.i.h.bf16 %v2380_v19  ;;  %v2381_v41 = vunpack.i.l.bf16 %v2380_v19 }
 0x4fb   :  { %v941_v45 = vsel %vm102_vm1, %v2381_v41, %v2382_v40 }
 0x500   :  { %v951_v20 = vpop.permute.xlu2 %950 }
 0x508   :  { %v2395_v30 = vpop.permute.xlu2 %2394 }
 0x509   :  { %v2397_v1 = vunpack.i.h.bf16 %v2395_v30  ;;  %v2396_v2 = vunpack.i.l.bf16 %v2395_v30 }
 0x510   :  { %v2375_v21 = vpop.permute.xlu0 %2374  ;;  %v912_v54 = vpop.permute.xlu2 %911 }
 0x511   :  { %v2377_v22 = vunpack.i.h.bf16 %v2375_v21  ;;  %v2376_v23 = vunpack.i.l.bf16 %v2375_v21 }
 0x513   :  { %v963_v24 = vpop.permute.xlu1 %962  ;;  %v965_v26 = vsel %vm128_vm0, %v2376_v23, %v2377_v22 }
 0x514   :  { %v964_v27 = vsel %vm128_vm0, %v2377_v22, %v963_v24  ;;  %v966_v29 = vsel %vm128_vm0, %v963_v24, %v2376_v23  ;;  %v1009_v31 = vpack.c.bf16 %v965_v26, %v965_v26 }
 0x515   :  { %v1010_v32 = vpack.c.bf16 %v964_v27, %v964_v27  ;;  %v1011_v33 = vpack.c.bf16 %v966_v29, %v966_v29  ;;  %v2169_v27 = vld [vmem:[%s3737_s1 + $0x10] sm:$0xf] }
 0x516   :  { %v1025_v35 = vsel %vm188_vm3, %v1009_v31, 0 }
 0x517   :  { %1036 = vmatpush.bf16.msrb.mxu0 %v1025_v35  ;;  %v1028_v36 = vsel %vm188_vm3, %v1010_v32, 0  ;;  %v1031_v37 = vsel %vm188_vm3, %v1011_v33, 0 }
 0x518   :  { %v939_v39 = vpop.permute.xlu0 %938  ;;  %1049 = vmatpush.bf16.msrb.mxu1 %v1028_v36  ;;  %1062 = vmatpush.bf16.msrb.mxu2 %v1031_v37  ;;  %v2410_v3 = vpop.permute.xlu2 %2409 }
 0x519   :  { %v940_v44 = vsel %vm102_vm1, %v2382_v40, %v939_v39  ;;  %v942_v46 = vsel %vm102_vm1, %v939_v39, %v2381_v41  ;;  %v2412_v10 = vunpack.i.h.bf16 %v2410_v3  ;;  %v2411_v15 = vunpack.i.l.bf16 %v2410_v3 }
 0x51b   :  { %v2385_v42 = vpop.permute.xlu1 %2384  ;;  %v890_v23 = vsel %vm47_vm7, %v2411_v15, %v2412_v10 }
 0x51c   :  { %v2387_v34 = vunpack.i.h.bf16 %v2385_v42  ;;  %v2386_v43 = vunpack.i.l.bf16 %v2385_v42 }
 0x51e   :  { %v953_v47 = vsel %vm115_vm2, %v2386_v43, %v2387_v34  ;;  %v952_v49 = vsel %vm115_vm2, %v2387_v34, %v951_v20  ;;  %v954_v50 = vsel %vm115_vm2, %v951_v20, %v2386_v43 }
 0x51f   :  { %v1006_v51 = vpack.c.bf16 %v953_v47, %v941_v45  ;;  %v1007_v52 = vpack.c.bf16 %v952_v49, %v940_v44  ;;  %v1008_v55 = vpack.c.bf16 %v954_v50, %v942_v46 }
 0x520   :  { %v2390_v53 = vpop.permute.xlu0 %2389 }
 0x521   :  { %v2392_v56 = vunpack.i.h.bf16 %v2390_v53  ;;  %v2391_v57 = vunpack.i.l.bf16 %v2390_v53  ;;  %1037 = vmatpush.bf16.msrb.mxu0 %v1006_v51  ;;  %1050 = vmatpush.bf16.msrb.mxu1 %v1007_v52 }
 0x522   :  { %1063 = vmatpush.bf16.msrb.mxu2 %v1008_v55 }
 0x523   :  { %v927_v58 = vpop.permute.xlu1 %926  ;;  %v929_v48 = vsel %vm89_vm4, %v2391_v57, %v2392_v56 }
 0x524   :  { %v928_v59 = vsel %vm89_vm4, %v2392_v56, %v927_v58  ;;  %v930_v60 = vsel %vm89_vm4, %v927_v58, %v2391_v57  ;;  %v1003_v61 = vpack.c.bf16 %v929_v48, %v3130_v8  ;;  %v902_v8 = vsel %vm60_vm5, %v2396_v2, %v2397_v1  ;;  %v2175_v56 = vld [vmem:[%s3738_s2 + $0x28] sm:$0xff] }
 0x525   :  { %v1004_v62 = vpack.c.bf16 %v928_v59, %v3133_v9  ;;  %v1005_v63 = vpack.c.bf16 %v930_v60, %v3140_v16 }
 0x526   :  { %1038 = vmatpush.bf16.msrb.mxu0 %v1003_v61 }
 0x527   :  { %1051 = vmatpush.bf16.msrb.mxu1 %v1004_v62  ;;  %1064 = vmatpush.bf16.msrb.mxu2 %v1005_v63 }
 0x528   :  { %v900_v0 = vpop.permute.xlu0 %899 }
 0x529   :  { %v901_v11 = vsel %vm60_vm5, %v2397_v1, %v900_v0  ;;  %v903_v9 = vsel %vm60_vm5, %v900_v0, %v2396_v2 }
 0x52b   :  { %v2400_v4 = vpop.permute.xlu1 %2399 }
 0x52c   :  { %v2402_v5 = vunpack.i.h.bf16 %v2400_v4  ;;  %v2401_v7 = vunpack.i.l.bf16 %v2400_v4 }
 0x52e   :  { %v915_v12 = vsel %vm73_vm6, %v912_v54, %v2401_v7  ;;  %v914_v13 = vsel %vm73_vm6, %v2401_v7, %v2402_v5  ;;  %v913_v14 = vsel %vm73_vm6, %v2402_v5, %v912_v54 }
 0x52f   :  { %v1000_v16 = vpack.c.bf16 %v915_v12, %v903_v9  ;;  %v1001_v17 = vpack.c.bf16 %v914_v13, %v902_v8  ;;  %v1002_v18 = vpack.c.bf16 %v913_v14, %v901_v11 }
 0x530   :  { %v2405_v19 = vpop.permute.xlu0 %2404 }
 0x531   :  { %v2407_v20 = vunpack.i.h.bf16 %v2405_v19  ;;  %v2406_v21 = vunpack.i.l.bf16 %v2405_v19  ;;  %1039 = vmatpush.bf16.msrb.mxu0 %v1000_v16  ;;  %1052 = vmatpush.bf16.msrb.mxu1 %v1001_v17 }
 0x532   :  { %1065 = vmatpush.bf16.msrb.mxu2 %v1002_v18 }
 0x533   :  { %v878_v22 = vsel %vm34_vm8, %v2406_v21, %v2407_v20  ;;  %v876_v26 = vpop.permute.xlu1 %875 }
 0x534   :  { %v998_v24 = vpack.c.bf16 %v890_v23, %v878_v22  ;;  %v877_v31 = vsel %vm34_vm8, %v2407_v20, %v876_v26  ;;  %v879_v32 = vsel %vm34_vm8, %v876_v26, %v2406_v21 }
 0x536   :  { %1053 = vmatpush.bf16.msrb.mxu1 %v998_v24 }
 0x538   :  { %v888_v29 = vpop.permute.xlu0 %887 }
 0x539   :  { %v889_v33 = vsel %vm47_vm7, %v2412_v10, %v888_v29  ;;  %v891_v30 = vsel %vm47_vm7, %v888_v29, %v2411_v15  ;;  %2172 = vmatmul.msk.bf16.vlgmr.msrb.gmra.mxu1 %vm184_vm9, %v2169_v27 }
 0x53a   :  { %v997_v35 = vpack.c.bf16 %v891_v30, %v879_v32  ;;  %v999_v36 = vpack.c.bf16 %v889_v33, %v877_v31 }
 0x53b   :  { %v1019_v39 = vpop.permute.xlu1 %1018 }
 0x53c   :  { %1040 = vmatpush.bf16.msrb.mxu0 %v997_v35  ;;  %1066 = vmatpush.bf16.msrb.mxu2 %v999_v36 }
 0x53f   :  { %2171 = vmatmul.msk.bf16.vlgmr.msrb.gmra.mxu0 %vm184_vm9, %v2169_v27  ;;  %2173 = vmatmul.msk.bf16.vlgmr.msrb.gmra.mxu2 %vm184_vm9, %v2169_v27 }
 0x5b6   :  { %v1055_v37 = vpop.f32.mrf.mxu1 }
 0x5b7   :  { %v1056_v40 = vadd.f32 %v1055_v37, %v1019_v39 }
 0x5b9   :  { %v1073_v42 = vmax.f32 %v1056_v40, 0.0 }
 0x5bb   :  { %v3228_v45 = vmul.f32 %v1073_v42, %v2823_v25 }
 0x5bc   :  { %v1042_v41 = vpop.f32.mrf.mxu0 }
 0x5bd   :  { %v1043_v34 = vadd.f32 %v1042_v41, %v1019_v39 }
 0x5be   :  { %v1057_v43 = vpop.f32.mrf.mxu1 }
 0x5bf   :  { %v1072_v44 = vmax.f32 %v1043_v34, 0.0 }
 0x5c1   :  { %v3231_v46 = vmul.f32 %v1072_v44, %v2825_v28 }
 0x5c2   :  { %v1068_v47 = vpop.f32.mrf.mxu2 }
 0x5c3   :  { %v1069_v49 = vadd.f32 %v1068_v47, %v1019_v39  ;;  %v2423_v50 = vpack.i.bf16 %v3228_v45, %v3231_v46 }
 0x5c4   :  { %v1044_v51 = vpop.f32.mrf.mxu0 }
 0x5c5   :  { %2424 = vrot.lane.b32.xlu1 %v2423_v50, %s2667_s24  ;;  %2419 = vrot.lane.b32.xlu0 %v2423_v50, %s2665_s22  ;;  %v1074_v52 = vmax.f32 %v1069_v49, 0.0 }
 0x5c6   :  { %2414 = vrot.lane.b32.xlu2 %v2423_v50, %s2666_s23 }
 0x5c7   :  { %v3239_v54 = vmul.f32 %v1074_v52, %v2838_v38 }
 0x5c9   :  { %v2438_v53 = vpack.i.bf16 %v3239_v54, %v3231_v46 }
 0x5ca   :  { %v1070_v55 = vpop.f32.mrf.mxu2 }
 0x5cd   :  { %1145 = vrot.lane.b32.xlu1 %v3239_v54, %s2665_s22  ;;  %2429 = vrot.lane.b32.xlu0 %v2423_v50, %s2668_s27 }
 0x5ce   :  { %1104 = vrot.lane.b32.xlu2 %v3228_v45, %s2669_s28 }
 0x5d5   :  { %2439 = vrot.lane.b32.xlu1 %v2438_v53, %s2670_s3  ;;  %2434 = vrot.lane.b32.xlu0 %v2438_v53, %s2669_s28 }
 0x5d6   :  { %1169 = vrot.lane.b32.xlu2 %v3239_v54, %s2666_s23 }
 0x5dd   :  { %2449 = vrot.lane.b32.xlu1 %v2438_v53, %s2672_s30  ;;  %2444 = vrot.lane.b32.xlu0 %v2438_v53, %s2671_s29 }
 0x5de   :  { %1157 = vrot.lane.b32.xlu2 %v3239_v54, %s2667_s24 }
 0x5e5   :  { %1080 = vrot.lane.b32.xlu1 %v3228_v45, %s2671_s29  ;;  %1116 = vrot.lane.b32.xlu0 %v3228_v45, %s2670_s3 }
 0x5e6   :  { %1133 = vrot.lane.b32.xlu2 %v3239_v54, %s2668_s27 }
 0x5ed   :  { %1225 = vperm.xlu0 %2291, %v2175_v56   ;;  %v2174_v56 = vld [vmem:[%s3737_s1 + $0x14] sm:$0xf] }
 0x5ee   :  { %1092 = vrot.lane.b32.xlu2 %v3228_v45, %s2672_s30 }
 0x620   :  { %v2415_v57 = vpop.permute.xlu2 %2414 }
 0x621   :  { %v2417_v58 = vunpack.i.h.bf16 %v2415_v57  ;;  %v2416_v48 = vunpack.i.l.bf16 %v2415_v57 }
 0x623   :  { %v1172_v59 = vsel %vm128_vm0, %v2416_v48, %v2417_v58 }
 0x624   :  { %v1216_v60 = vpack.c.bf16 %v1172_v59, %v1172_v59 }
 0x626   :  { %v1232_v61 = vsel %vm188_vm3, %v1216_v60, 0 }
 0x627   :  { %1243 = vmatpush.bf16.msrb.mxu3 %v1232_v61 }
 0x628   :  { %v3270_v62 = vpop.permute.xlu2 %1104 }
 0x630   :  { %v1170_v63 = vpop.permute.xlu2 %1169 }
 0x631   :  { %v1171_v0 = vsel %vm128_vm0, %v2417_v58, %v1170_v63  ;;  %v1173_v1 = vsel %vm128_vm0, %v1170_v63, %v2416_v48 }
 0x632   :  { %v1217_v2 = vpack.c.bf16 %v1171_v0, %v1171_v0  ;;  %v1218_v3 = vpack.c.bf16 %v1173_v1, %v1173_v1 }
 0x634   :  { %v1235_v4 = vsel %vm188_vm3, %v1217_v2, 0  ;;  %v1238_v5 = vsel %vm188_vm3, %v1218_v3, 0 }
 0x635   :  { %1256 = vmatpush.bf16.msra.mxu0 %v1235_v4  ;;  %1269 = vmatpush.bf16.msra.mxu1 %v1238_v5 }
 0x637   :  { %v2425_v7 = vpop.permute.xlu1 %2424  ;;  %v2420_v10 = vpop.permute.xlu0 %2419 }
 0x638   :  { %v2427_v11 = vunpack.i.h.bf16 %v2425_v7  ;;  %v2426_v8 = vunpack.i.l.bf16 %v2425_v7  ;;  %v2422_v9 = vunpack.i.h.bf16 %v2420_v10  ;;  %v2421_v12 = vunpack.i.l.bf16 %v2420_v10  ;;  %v1158_v13 = vpop.permute.xlu2 %1157 }
 0x63a   :  { %v1148_v14 = vsel %vm102_vm1, %v2421_v12, %v2422_v9  ;;  %v1160_v15 = vsel %vm115_vm2, %v2426_v8, %v2427_v11  ;;  %v1159_v17 = vsel %vm115_vm2, %v2427_v11, %v1158_v13  ;;  %v1161_v18 = vsel %vm115_vm2, %v1158_v13, %v2426_v8 }
 0x63b   :  { %v1213_v16 = vpack.c.bf16 %v1160_v15, %v1148_v14 }
 0x63d   :  { %1244 = vmatpush.bf16.msrb.mxu3 %v1213_v16 }
 0x63f   :  { %v1146_v19 = vpop.permute.xlu1 %1145  ;;  %v2430_v20 = vpop.permute.xlu0 %2429 }
 0x640   :  { %v1147_v21 = vsel %vm102_vm1, %v2422_v9, %v1146_v19  ;;  %v1149_v22 = vsel %vm102_vm1, %v1146_v19, %v2421_v12  ;;  %v2432_v23 = vunpack.i.h.bf16 %v2430_v20  ;;  %v2431_v24 = vunpack.i.l.bf16 %v2430_v20  ;;  %v1134_v29 = vpop.permute.xlu2 %1133 }
 0x641   :  { %v1214_v26 = vpack.c.bf16 %v1159_v17, %v1147_v21  ;;  %v1215_v27 = vpack.c.bf16 %v1161_v18, %v1149_v22 }
 0x642   :  { %v1135_v31 = vsel %vm89_vm4, %v2432_v23, %v1134_v29  ;;  %v1137_v32 = vsel %vm89_vm4, %v1134_v29, %v2431_v24  ;;  %v1136_v33 = vsel %vm89_vm4, %v2431_v24, %v2432_v23 }
 0x643   :  { %1257 = vmatpush.bf16.msra.mxu0 %v1214_v26  ;;  %1270 = vmatpush.bf16.msra.mxu1 %v1215_v27  ;;  %v1210_v30 = vpack.c.bf16 %v1136_v33, %v3231_v46  ;;  %v1211_v35 = vpack.c.bf16 %v1135_v31, %v3228_v45  ;;  %v1212_v36 = vpack.c.bf16 %v1137_v32, %v3239_v54  ;;  %v2180_v26 = vld [vmem:[%s3738_s2 + $0x30] sm:$0xff] }
 0x645   :  { %1245 = vmatpush.bf16.msrb.mxu3 %v1210_v30 }
 0x647   :  { %v2440_v37 = vpop.permute.xlu1 %2439  ;;  %v2435_v39 = vpop.permute.xlu0 %2434  ;;  %1258 = vmatpush.bf16.msra.mxu0 %v1211_v35  ;;  %1271 = vmatpush.bf16.msra.mxu1 %v1212_v36 }
 0x648   :  { %v2442_v40 = vunpack.i.h.bf16 %v2440_v37  ;;  %v2441_v41 = vunpack.i.l.bf16 %v2440_v37  ;;  %v2437_v42 = vunpack.i.h.bf16 %v2435_v39  ;;  %v2436_v34 = vunpack.i.l.bf16 %v2435_v39  ;;  %v1093_v3 = vpop.permute.xlu2 %1092 }
 0x64a   :  { %v1110_v43 = vsel %vm60_vm5, %v2437_v42, %v2436_v34  ;;  %v1122_v44 = vsel %vm73_vm6, %v2442_v40, %v2441_v41  ;;  %v1108_v48 = vsel %vm60_vm5, %v3270_v62, %v2437_v42  ;;  %v1109_v59 = vsel %vm60_vm5, %v2436_v34, %v3270_v62 }
 0x64b   :  { %v1207_v46 = vpack.c.bf16 %v1122_v44, %v1110_v43 }
 0x64d   :  { %1246 = vmatpush.bf16.msrb.mxu3 %v1207_v46 }
 0x64f   :  { %v2450_v45 = vpop.permute.xlu1 %2449  ;;  %v2445_v47 = vpop.permute.xlu0 %2444 }
 0x650   :  { %v2452_v49 = vunpack.i.h.bf16 %v2450_v45  ;;  %v2451_v50 = vunpack.i.l.bf16 %v2450_v45  ;;  %v2447_v51 = vunpack.i.h.bf16 %v2445_v47  ;;  %v2446_v52 = vunpack.i.l.bf16 %v2445_v47 }
 0x652   :  { %v1086_v55 = vsel %vm34_vm8, %v2447_v51, %v2446_v52  ;;  %v1098_v54 = vsel %vm47_vm7, %v2452_v49, %v2451_v50  ;;  %v1096_v62 = vsel %vm47_vm7, %v1093_v3, %v2452_v49  ;;  %v1097_v4 = vsel %vm47_vm7, %v2451_v50, %v1093_v3 }
 0x653   :  { %v1204_v53 = vpack.c.bf16 %v1098_v54, %v1086_v55 }
 0x655   :  { %1247 = vmatpush.bf16.msrb.mxu3 %v1204_v53 }
 0x657   :  { %v1081_v57 = vpop.permute.xlu1 %1080  ;;  %v1117_v58 = vpop.permute.xlu0 %1116 }
 0x658   :  { %v1120_v60 = vsel %vm73_vm6, %v1117_v58, %v2442_v40  ;;  %v1121_v61 = vsel %vm73_vm6, %v2441_v41, %v1117_v58  ;;  %2176 = vmatmul.msk.bf16.vlgmr.msrb.gmra.mxu3 %vm184_vm9, %v2174_v56  ;;  %v1084_v1 = vsel %vm34_vm8, %v1081_v57, %v2447_v51  ;;  %v1085_v2 = vsel %vm34_vm8, %v2446_v52, %v1081_v57 }
 0x659   :  { %v1208_v63 = vpack.c.bf16 %v1121_v61, %v1109_v59  ;;  %v1209_v0 = vpack.c.bf16 %v1120_v60, %v1108_v48  ;;  %v1205_v5 = vpack.c.bf16 %v1097_v4, %v1085_v2  ;;  %v1206_v7 = vpack.c.bf16 %v1096_v62, %v1084_v1 }
 0x65b   :  { %1259 = vmatpush.bf16.msra.mxu0 %v1208_v63  ;;  %1272 = vmatpush.bf16.msra.mxu1 %v1209_v0 }
 0x65f   :  { %1260 = vmatpush.bf16.msra.mxu0 %v1205_v5  ;;  %1273 = vmatpush.bf16.msra.mxu1 %v1206_v7  ;;  %v1226_v10 = vpop.permute.xlu0 %1225 }
 0x662   :  { %2177 = vmatmul.msk.bf16.vlgmr.msra.gmra.mxu0 %vm184_vm9, %v2174_v56  ;;  %2178 = vmatmul.msk.bf16.vlgmr.msra.gmra.mxu1 %vm184_vm9, %v2174_v56 }
 0x6db   :  { %v1249_v11 = vpop.f32.mrf.mxu3 }
 0x6dc   :  { %v1250_v8 = vadd.f32 %v1249_v11, %v1226_v10 }
 0x6de   :  { %v1279_v13 = vmax.f32 %v1250_v8, 0.0 }
 0x6df   :  { %v1262_v9 = vpop.f32.mrf.mxu0  ;;  %v1275_v12 = vpop.f32.mrf.mxu1 }
 0x6e0   :  { %v1263_v14 = vadd.f32 %v1262_v9, %v1226_v10  ;;  %v1276_v15 = vadd.f32 %v1275_v12, %v1226_v10  ;;  %v3332_v19 = vmul.f32 %v1279_v13, %v2825_v28 }
 0x6e2   :  { %v1280_v16 = vmax.f32 %v1263_v14, 0.0  ;;  %v1281_v17 = vmax.f32 %v1276_v15, 0.0 }
 0x6e3   :  { %v1251_v18 = vpop.f32.mrf.mxu3 }
 0x6e4   :  { %v3335_v20 = vmul.f32 %v1280_v16, %v2823_v25  ;;  %v3338_v21 = vmul.f32 %v1281_v17, %v2838_v38 }
 0x6e6   :  { %1376 = vrot.lane.b32.xlu2 %v3338_v21, %s2666_s23  ;;  %v2458_v22 = vpack.i.bf16 %v3335_v20, %v3332_v19 }
 0x6e7   :  { %v1264_v23 = vpop.f32.mrf.mxu0  ;;  %v1277_v24 = vpop.f32.mrf.mxu1 }
 0x6e8   :  { %2459 = vrot.lane.b32.xlu0 %v2458_v22, %s2665_s22  ;;  %2454 = vrot.lane.b32.xlu1 %v2458_v22, %s2666_s23 }
 0x6ee   :  { %2464 = vrot.lane.b32.xlu2 %v2458_v22, %s2667_s24 }
 0x6f0   :  { %1364 = vrot.lane.b32.xlu0 %v3338_v21, %s2667_s24  ;;  %1352 = vrot.lane.b32.xlu1 %v3338_v21, %s2665_s22 }
 0x6f6   :  { %1340 = vrot.lane.b32.xlu2 %v3338_v21, %s2668_s27 }
 0x6f8   :  { %2474 = vrot.lane.b32.xlu0 %v2458_v22, %s2669_s28  ;;  %2469 = vrot.lane.b32.xlu1 %v2458_v22, %s2668_s27 }
 0x6fe   :  { %2479 = vrot.lane.b32.xlu2 %v2458_v22, %s2670_s3 }
 0x700   :  { %1325 = vrot.lane.b32.xlu0 %v3338_v21, %s2670_s3  ;;  %1313 = vrot.lane.b32.xlu1 %v3338_v21, %s2669_s28 }
 0x706   :  { %1289 = vrot.lane.b32.xlu2 %v3338_v21, %s2671_s29 }
 0x708   :  { %2489 = vrot.lane.b32.xlu0 %v2458_v22, %s2672_s30  ;;  %2484 = vrot.lane.b32.xlu1 %v2458_v22, %s2671_s29 }
 0x70e   :  { %1432 = vperm.xlu2 %2372, %v2180_v26  }
 0x710   :  { %1301 = vrot.lane.b32.xlu1 %v3338_v21, %s2672_s30 }
 0x740   :  { %v1377_v27 = vpop.permute.xlu2 %1376 }
 0x748   :  { %v2465_v29 = vpop.permute.xlu2 %2464 }
 0x749   :  { %v2467_v37 = vunpack.i.h.bf16 %v2465_v29  ;;  %v2466_v39 = vunpack.i.l.bf16 %v2465_v29 }
 0x74b   :  { %v1367_v51 = vsel %vm115_vm2, %v2466_v39, %v2467_v37 }
 0x750   :  { %v1341_v46 = vpop.permute.xlu2 %1340 }
 0x758   :  { %v2480_v60 = vpop.permute.xlu2 %2479 }
 0x759   :  { %v2482_v62 = vunpack.i.h.bf16 %v2480_v60  ;;  %v2481_v4 = vunpack.i.l.bf16 %v2480_v60 }
 0x75a   :  { %v2460_v31 = vpop.permute.xlu0 %2459  ;;  %v2455_v32 = vpop.permute.xlu1 %2454 }
 0x75b   :  { %v2462_v33 = vunpack.i.h.bf16 %v2460_v31  ;;  %v2461_v30 = vunpack.i.l.bf16 %v2460_v31  ;;  %v2457_v35 = vunpack.i.h.bf16 %v2455_v32  ;;  %v2456_v36 = vunpack.i.l.bf16 %v2455_v32 }
 0x75c   :  { %v1328_v13 = vsel %vm73_vm6, %v2481_v4, %v2482_v62 }
 0x75d   :  { %v1379_v40 = vsel %vm128_vm0, %v2456_v36, %v2457_v35  ;;  %v1378_v41 = vsel %vm128_vm0, %v2457_v35, %v1377_v27  ;;  %v1380_v42 = vsel %vm128_vm0, %v1377_v27, %v2456_v36  ;;  %v1355_v45 = vsel %vm102_vm1, %v2461_v30, %v2462_v33  ;;  %v2179_v35 = vld [vmem:[%s3737_s1 + $0x18] sm:$0xf] }
 0x75e   :  { %v1423_v34 = vpack.c.bf16 %v1379_v40, %v1379_v40  ;;  %v1424_v43 = vpack.c.bf16 %v1378_v41, %v1378_v41  ;;  %v1425_v44 = vpack.c.bf16 %v1380_v42, %v1380_v42  ;;  %v1420_v54 = vpack.c.bf16 %v1367_v51, %v1355_v45 }
 0x760   :  { %v1439_v47 = vsel %vm188_vm3, %v1423_v34, 0  ;;  %v1442_v49 = vsel %vm188_vm3, %v1424_v43, 0  ;;  %v1445_v50 = vsel %vm188_vm3, %v1425_v44, 0  ;;  %v1290_v36 = vpop.permute.xlu2 %1289 }
 0x761   :  { %1450 = vmatpush.bf16.msra.mxu2 %v1439_v47  ;;  %1463 = vmatpush.bf16.msra.mxu3 %v1442_v49 }
 0x762   :  { %1476 = vmatpush.bf16.msrb.mxu0 %v1445_v50  ;;  %v1365_v52 = vpop.permute.xlu0 %1364  ;;  %v1353_v55 = vpop.permute.xlu1 %1352 }
 0x763   :  { %v1366_v53 = vsel %vm115_vm2, %v2467_v37, %v1365_v52  ;;  %v1368_v56 = vsel %vm115_vm2, %v1365_v52, %v2466_v39  ;;  %v1354_v57 = vsel %vm102_vm1, %v2462_v33, %v1353_v55  ;;  %v1356_v58 = vsel %vm102_vm1, %v1353_v55, %v2461_v30 }
 0x764   :  { %v1421_v48 = vpack.c.bf16 %v1366_v53, %v1354_v57  ;;  %v1422_v59 = vpack.c.bf16 %v1368_v56, %v1356_v58 }
 0x765   :  { %1451 = vmatpush.bf16.msra.mxu2 %v1420_v54 }
 0x766   :  { %1464 = vmatpush.bf16.msra.mxu3 %v1421_v48  ;;  %1477 = vmatpush.bf16.msrb.mxu0 %v1422_v59 }
 0x768   :  { %v1433_v44 = vpop.permute.xlu2 %1432 }
 0x76a   :  { %v2475_v61 = vpop.permute.xlu0 %2474  ;;  %v2470_v63 = vpop.permute.xlu1 %2469 }
 0x76b   :  { %v2477_v0 = vunpack.i.h.bf16 %v2475_v61  ;;  %v2476_v1 = vunpack.i.l.bf16 %v2475_v61  ;;  %v2472_v2 = vunpack.i.h.bf16 %v2470_v63  ;;  %v2471_v3 = vunpack.i.l.bf16 %v2470_v63  ;;  %v2185_v61 = vld [vmem:[%s3738_s2 + $0x38] sm:$0xff] }
 0x76d   :  { %v1343_v5 = vsel %vm89_vm4, %v2471_v3, %v2472_v2  ;;  %v1342_v7 = vsel %vm89_vm4, %v2472_v2, %v1341_v46  ;;  %v1344_v10 = vsel %vm89_vm4, %v1341_v46, %v2471_v3  ;;  %v1316_v12 = vsel %vm60_vm5, %v2476_v1, %v2477_v0 }
 0x76e   :  { %v1417_v11 = vpack.c.bf16 %v1343_v5, %v3332_v19  ;;  %v1418_v8 = vpack.c.bf16 %v1342_v7, %v3335_v20  ;;  %v1419_v9 = vpack.c.bf16 %v1344_v10, %v3338_v21  ;;  %v1415_v16 = vpack.c.bf16 %v1328_v13, %v1316_v12 }
 0x770   :  { %1452 = vmatpush.bf16.msra.mxu2 %v1417_v11  ;;  %1465 = vmatpush.bf16.msra.mxu3 %v1418_v8 }
 0x771   :  { %1478 = vmatpush.bf16.msrb.mxu0 %v1419_v9 }
 0x772   :  { %v1326_v14 = vpop.permute.xlu0 %1325  ;;  %v1314_v15 = vpop.permute.xlu1 %1313 }
 0x773   :  { %v1327_v17 = vsel %vm73_vm6, %v2482_v62, %v1326_v14  ;;  %v1329_v18 = vsel %vm73_vm6, %v1326_v14, %v2481_v4  ;;  %v1315_v19 = vsel %vm60_vm5, %v2477_v0, %v1314_v15  ;;  %v1317_v20 = vsel %vm60_vm5, %v1314_v15, %v2476_v1 }
 0x774   :  { %v1414_v21 = vpack.c.bf16 %v1329_v18, %v1317_v20  ;;  %v1416_v22 = vpack.c.bf16 %v1327_v17, %v1315_v19  ;;  %1466 = vmatpush.bf16.msra.mxu3 %v1415_v16 }
 0x776   :  { %1453 = vmatpush.bf16.msra.mxu2 %v1414_v21  ;;  %1479 = vmatpush.bf16.msrb.mxu0 %v1416_v22 }
 0x77a   :  { %v2490_v23 = vpop.permute.xlu0 %2489  ;;  %v2485_v24 = vpop.permute.xlu1 %2484 }
 0x77b   :  { %v2492_v26 = vunpack.i.h.bf16 %v2490_v23  ;;  %v2491_v27 = vunpack.i.l.bf16 %v2490_v23  ;;  %v2487_v29 = vunpack.i.h.bf16 %v2485_v24  ;;  %v2486_v31 = vunpack.i.l.bf16 %v2485_v24 }
 0x77d   :  { %v1292_v32 = vsel %vm34_vm8, %v2486_v31, %v2487_v29  ;;  %v1304_v33 = vsel %vm47_vm7, %v2491_v27, %v2492_v26  ;;  %v1291_v39 = vsel %vm34_vm8, %v2487_v29, %v1290_v36  ;;  %v1293_v40 = vsel %vm34_vm8, %v1290_v36, %v2486_v31 }
 0x77e   :  { %v1412_v30 = vpack.c.bf16 %v1304_v33, %v1292_v32 }
 0x780   :  { %1467 = vmatpush.bf16.msra.mxu3 %v1412_v30 }
 0x782   :  { %v1302_v37 = vpop.permute.xlu1 %1301 }
 0x783   :  { %v1303_v41 = vsel %vm47_vm7, %v2492_v26, %v1302_v37  ;;  %v1305_v42 = vsel %vm47_vm7, %v1302_v37, %v2491_v27  ;;  %2182 = vmatmul.msk.bf16.vlgmr.msra.gmra.mxu3 %vm184_vm9, %v2179_v35 }
 0x784   :  { %v1411_v34 = vpack.c.bf16 %v1305_v42, %v1293_v40  ;;  %v1413_v43 = vpack.c.bf16 %v1303_v41, %v1291_v39 }
 0x786   :  { %1454 = vmatpush.bf16.msra.mxu2 %v1411_v34  ;;  %1480 = vmatpush.bf16.msrb.mxu0 %v1413_v43 }
 0x789   :  { %2181 = vmatmul.msk.bf16.vlgmr.msra.gmra.mxu2 %vm184_vm9, %v2179_v35  ;;  %2183 = vmatmul.msk.bf16.vlgmr.msrb.gmra.mxu0 %vm184_vm9, %v2179_v35 }
 0x806   :  { %v1469_v46 = vpop.f32.mrf.mxu3  ;;  %v1482_v45 = vpop.f32.mrf.mxu0 }
 0x807   :  { %v1483_v47 = vadd.f32 %v1482_v45, %v1433_v44  ;;  %v1470_v53 = vadd.f32 %v1469_v46, %v1433_v44 }
 0x809   :  { %v1488_v49 = vmax.f32 %v1483_v47, 0.0  ;;  %v1487_v58 = vmax.f32 %v1470_v53, 0.0 }
 0x80b   :  { %v3430_v50 = vmul.f32 %v1488_v49, %v2838_v38  ;;  %v3448_v59 = vmul.f32 %v1487_v58, %v2823_v25 }
 0x80c   :  { %v1456_v51 = vpop.f32.mrf.mxu2 }
 0x80d   :  { %1571 = vrot.lane.b32.xlu2 %v3430_v50, %s2667_s24  ;;  %1559 = vrot.lane.b32.xlu0 %v3430_v50, %s2665_s22  ;;  %v1457_v54 = vadd.f32 %v1456_v51, %v1433_v44 }
 0x80e   :  { %1583 = vrot.lane.b32.xlu1 %v3430_v50, %s2666_s23  ;;  %v1484_v52 = vpop.f32.mrf.mxu0  ;;  %v1471_v55 = vpop.f32.mrf.mxu3 }
 0x80f   :  { %v1486_v56 = vmax.f32 %v1457_v54, 0.0 }
 0x811   :  { %v3445_v48 = vmul.f32 %v1486_v56, %v2825_v28 }
 0x813   :  { %v2498_v60 = vpack.i.bf16 %v3448_v59, %v3445_v48 }
 0x814   :  { %v1458_v57 = vpop.f32.mrf.mxu2 }
 0x815   :  { %1532 = vrot.lane.b32.xlu2 %v3430_v50, %s2670_s3  ;;  %1520 = vrot.lane.b32.xlu0 %v3430_v50, %s2669_s28 }
 0x816   :  { %1547 = vrot.lane.b32.xlu1 %v3430_v50, %s2668_s27 }
 0x81d   :  { %2499 = vrot.lane.b32.xlu2 %v2498_v60, %s2665_s22  ;;  %2494 = vrot.lane.b32.xlu0 %v2498_v60, %s2666_s23 }
 0x81e   :  { %2504 = vrot.lane.b32.xlu1 %v2498_v60, %s2667_s24 }
 0x825   :  { %2514 = vrot.lane.b32.xlu2 %v2498_v60, %s2669_s28  ;;  %2509 = vrot.lane.b32.xlu0 %v2498_v60, %s2668_s27 }
 0x826   :  { %2519 = vrot.lane.b32.xlu1 %v2498_v60, %s2670_s3 }
 0x82d   :  { %2529 = vrot.lane.b32.xlu2 %v2498_v60, %s2672_s30  ;;  %2524 = vrot.lane.b32.xlu0 %v2498_v60, %s2671_s29 }
 0x82e   :  { %1496 = vrot.lane.b32.xlu1 %v3430_v50, %s2671_s29 }
 0x835   :  { %1508 = vrot.lane.b32.xlu0 %v3430_v50, %s2672_s30 }
 0x836   :  { %1639 = vperm.xlu1 %2250, %v2185_v61  }
 0x867   :  { %v1572_v63 = vpop.permute.xlu2 %1571 }
 0x86f   :  { %v1533_v0 = vpop.permute.xlu2 %1532 }
 0x877   :  { %v2500_v3 = vpop.permute.xlu2 %2499 }
 0x878   :  { %v2502_v13 = vunpack.i.h.bf16 %v2500_v3  ;;  %v2501_v17 = vunpack.i.l.bf16 %v2500_v3 }
 0x87a   :  { %v1562_v33 = vsel %vm102_vm1, %v2501_v17, %v2502_v13 }
 0x87f   :  { %v1560_v1 = vpop.permute.xlu0 %1559  ;;  %v2515_v8 = vpop.permute.xlu2 %2514 }
 0x880   :  { %v1584_v2 = vpop.permute.xlu1 %1583  ;;  %v1561_v29 = vsel %vm102_vm1, %v2502_v13, %v1560_v1  ;;  %v1563_v31 = vsel %vm102_vm1, %v1560_v1, %v2501_v17  ;;  %v2517_v34 = vunpack.i.h.bf16 %v2515_v8  ;;  %v2516_v45 = vunpack.i.l.bf16 %v2515_v8 }
 0x887   :  { %v1521_v62 = vpop.permute.xlu0 %1520  ;;  %v2530_v47 = vpop.permute.xlu2 %2529 }
 0x888   :  { %v1548_v4 = vpop.permute.xlu1 %1547  ;;  %v2532_v53 = vunpack.i.h.bf16 %v2530_v47  ;;  %v2531_v56 = vunpack.i.l.bf16 %v2530_v47  ;;  %v1522_v58 = vsel %vm60_vm5, %v2517_v34, %v1521_v62 }
 0x88a   :  { %v1511_v3 = vsel %vm47_vm7, %v2531_v56, %v2532_v53 }
 0x88f   :  { %v2495_v5 = vpop.permute.xlu0 %2494 }
 0x890   :  { %v2505_v7 = vpop.permute.xlu1 %2504  ;;  %v2497_v10 = vunpack.i.h.bf16 %v2495_v5  ;;  %v2496_v11 = vunpack.i.l.bf16 %v2495_v5 }
 0x891   :  { %v2507_v9 = vunpack.i.h.bf16 %v2505_v7  ;;  %v2506_v12 = vunpack.i.l.bf16 %v2505_v7 }
 0x892   :  { %v1586_v14 = vsel %vm128_vm0, %v2496_v11, %v2497_v10  ;;  %v1585_v15 = vsel %vm128_vm0, %v2497_v10, %v1584_v2  ;;  %v1587_v16 = vsel %vm128_vm0, %v1584_v2, %v2496_v11 }
 0x893   :  { %v1630_v18 = vpack.c.bf16 %v1586_v14, %v1586_v14  ;;  %v1631_v19 = vpack.c.bf16 %v1585_v15, %v1585_v15  ;;  %v1632_v20 = vpack.c.bf16 %v1587_v16, %v1587_v16  ;;  %v1574_v21 = vsel %vm115_vm2, %v2506_v12, %v2507_v9 }
 0x894   :  { %v1573_v26 = vsel %vm115_vm2, %v2507_v9, %v1572_v63  ;;  %v1575_v27 = vsel %vm115_vm2, %v1572_v63, %v2506_v12  ;;  %v1627_v37 = vpack.c.bf16 %v1574_v21, %v1562_v33 }
 0x895   :  { %v1646_v22 = vsel %vm188_vm3, %v1630_v18, 0  ;;  %v1649_v23 = vsel %vm188_vm3, %v1631_v19, 0  ;;  %v1652_v24 = vsel %vm188_vm3, %v1632_v20, 0  ;;  %v1628_v39 = vpack.c.bf16 %v1573_v26, %v1561_v29 }
 0x896   :  { %1657 = vmatpush.bf16.msrb.mxu1 %v1646_v22  ;;  %1670 = vmatpush.bf16.msrb.mxu2 %v1649_v23  ;;  %v1629_v42 = vpack.c.bf16 %v1575_v27, %v1563_v31 }
 0x897   :  { %1683 = vmatpush.bf16.msrb.mxu3 %v1652_v24  ;;  %v2510_v32 = vpop.permute.xlu0 %2509 }
 0x898   :  { %v2520_v30 = vpop.permute.xlu1 %2519  ;;  %v2512_v35 = vunpack.i.h.bf16 %v2510_v32  ;;  %v2511_v36 = vunpack.i.l.bf16 %v2510_v32 }
 0x899   :  { %v2522_v40 = vunpack.i.h.bf16 %v2520_v30  ;;  %v2521_v41 = vunpack.i.l.bf16 %v2520_v30  ;;  %v2190_v30 = vld [vmem:[%s3738_s2 + $0x40] sm:$0xff] }
 0x89a   :  { %1658 = vmatpush.bf16.msrb.mxu1 %v1627_v37  ;;  %1671 = vmatpush.bf16.msrb.mxu2 %v1628_v39  ;;  %v1550_v43 = vsel %vm89_vm4, %v2511_v36, %v2512_v35  ;;  %v1549_v44 = vsel %vm89_vm4, %v2512_v35, %v1548_v4  ;;  %v1551_v46 = vsel %vm89_vm4, %v1548_v4, %v2511_v36  ;;  %v2184_v4 = vld [vmem:[%s3737_s1 + $0x1c] sm:$0xf] }
 0x89b   :  { %1684 = vmatpush.bf16.msrb.mxu3 %v1629_v42  ;;  %v1624_v49 = vpack.c.bf16 %v1550_v43, %v3445_v48  ;;  %v1625_v51 = vpack.c.bf16 %v1549_v44, %v3448_v59  ;;  %v1626_v52 = vpack.c.bf16 %v1551_v46, %v3430_v50  ;;  %v1536_v55 = vsel %vm73_vm6, %v1533_v0, %v2521_v41 }
 0x89c   :  { %v1535_v54 = vsel %vm73_vm6, %v2521_v41, %v2522_v40  ;;  %v1534_v57 = vsel %vm73_vm6, %v2522_v40, %v1533_v0  ;;  %v1524_v48 = vsel %vm60_vm5, %v1521_v62, %v2516_v45  ;;  %v1523_v59 = vsel %vm60_vm5, %v2516_v45, %v2517_v34 }
 0x89d   :  { %v1621_v63 = vpack.c.bf16 %v1536_v55, %v1524_v48  ;;  %v1622_v1 = vpack.c.bf16 %v1535_v54, %v1523_v59  ;;  %v1623_v2 = vpack.c.bf16 %v1534_v57, %v1522_v58 }
 0x89e   :  { %1659 = vmatpush.bf16.msrb.mxu1 %v1624_v49  ;;  %1672 = vmatpush.bf16.msrb.mxu2 %v1625_v51 }
 0x89f   :  { %1685 = vmatpush.bf16.msrb.mxu3 %v1626_v52  ;;  %v2525_v50 = vpop.permute.xlu0 %2524 }
 0x8a0   :  { %v2527_v60 = vunpack.i.h.bf16 %v2525_v50  ;;  %v2526_v61 = vunpack.i.l.bf16 %v2525_v50  ;;  %v1497_v5 = vpop.permute.xlu1 %1496 }
 0x8a2   :  { %1660 = vmatpush.bf16.msrb.mxu1 %v1621_v63  ;;  %1673 = vmatpush.bf16.msrb.mxu2 %v1622_v1  ;;  %v1499_v0 = vsel %vm34_vm8, %v2526_v61, %v2527_v60  ;;  %v1498_v10 = vsel %vm34_vm8, %v2527_v60, %v1497_v5  ;;  %v1500_v11 = vsel %vm34_vm8, %v1497_v5, %v2526_v61 }
 0x8a3   :  { %1686 = vmatpush.bf16.msrb.mxu3 %v1623_v2  ;;  %v1619_v62 = vpack.c.bf16 %v1511_v3, %v1499_v0 }
 0x8a6   :  { %1674 = vmatpush.bf16.msrb.mxu2 %v1619_v62 }
 0x8a7   :  { %v1509_v7 = vpop.permute.xlu0 %1508 }
 0x8a8   :  { %v1510_v8 = vsel %vm47_vm7, %v2532_v53, %v1509_v7  ;;  %v1512_v9 = vsel %vm47_vm7, %v1509_v7, %v2531_v56  ;;  %v1640_v14 = vpop.permute.xlu1 %1639 }
 0x8a9   :  { %v1618_v12 = vpack.c.bf16 %v1512_v9, %v1500_v11  ;;  %v1620_v13 = vpack.c.bf16 %v1510_v8, %v1498_v10  ;;  %2187 = vmatmul.msk.bf16.vlgmr.msrb.gmra.mxu2 %vm184_vm9, %v2184_v4 }
 0x8ab   :  { %1661 = vmatpush.bf16.msrb.mxu1 %v1618_v12  ;;  %1687 = vmatpush.bf16.msrb.mxu3 %v1620_v13 }
 0x8ae   :  { %2186 = vmatmul.msk.bf16.vlgmr.msrb.gmra.mxu1 %vm184_vm9, %v2184_v4  ;;  %2188 = vmatmul.msk.bf16.vlgmr.msrb.gmra.mxu3 %vm184_vm9, %v2184_v4 }
 0x92b   :  { %v1663_v15 = vpop.f32.mrf.mxu1 }
 0x92c   :  { %v1664_v16 = vadd.f32 %v1663_v15, %v1640_v14  ;;  %v1676_v17 = vpop.f32.mrf.mxu2 }
 0x92d   :  { %v1677_v18 = vadd.f32 %v1676_v17, %v1640_v14 }
 0x92e   :  { %v1693_v19 = vmax.f32 %v1664_v16, 0.0 }
 0x92f   :  { %v1694_v20 = vmax.f32 %v1677_v18, 0.0 }
 0x930   :  { %v3528_v21 = vmul.f32 %v1693_v19, %v2825_v28 }
 0x931   :  { %v3531_v22 = vmul.f32 %v1694_v20, %v2823_v25  ;;  %v1689_v23 = vpop.f32.mrf.mxu3 }
 0x932   :  { %1699 = vst [vmem:[#allocation3] sm:$0xff] %v3528_v21  ;;  %v1690_v24 = vadd.f32 %v1689_v23, %v1640_v14 }
 0x933   :  { %1700 = vst [vmem:[#allocation3 + $0x8] sm:$0xff] %v3531_v22  ;;  %v1665_v26 = vpop.f32.mrf.mxu1  ;;  %v2538_v27 = vpack.i.bf16 %v3531_v22, %v3528_v21 }
 0x934   :  { %v1695_v29 = vmax.f32 %v1690_v24, 0.0  ;;  %v1678_v31 = vpop.f32.mrf.mxu2 }
 0x935   :  { %2539 = vrot.lane.b32.xlu1 %v2538_v27, %s2665_s22  ;;  %2534 = vrot.lane.b32.xlu2 %v2538_v27, %s2666_s23 }
 0x936   :  { %v3540_v32 = vmul.f32 %v1695_v29, %v2838_v38 }
 0x938   :  { %1701 = vst [vmem:[#allocation3 + $0x10] sm:$0xff] %v3540_v32  ;;  %1793 = vrot.lane.b32.xlu0 %v3540_v32, %s2666_s23 }
 0x939   :  { %v1691_v33 = vpop.f32.mrf.mxu3 }
 0x93d   :  { %1781 = vrot.lane.b32.xlu1 %v3540_v32, %s2667_s24  ;;  %1769 = vrot.lane.b32.xlu2 %v3540_v32, %s2665_s22 }
 0x940   :  { %2544 = vrot.lane.b32.xlu0 %v2538_v27, %s2667_s24 }
 0x945   :  { %2554 = vrot.lane.b32.xlu1 %v2538_v27, %s2669_s28  ;;  %2549 = vrot.lane.b32.xlu2 %v2538_v27, %s2668_s27 }
 0x948   :  { %1757 = vrot.lane.b32.xlu0 %v3540_v32, %s2668_s27 }
 0x94d   :  { %1742 = vrot.lane.b32.xlu1 %v3540_v32, %s2670_s3  ;;  %1730 = vrot.lane.b32.xlu2 %v3540_v32, %s2669_s28 }
 0x950   :  { %2559 = vrot.lane.b32.xlu0 %v2538_v27, %s2670_s3 }
 0x955   :  { %2569 = vrot.lane.b32.xlu1 %v2538_v27, %s2672_s30  ;;  %2564 = vrot.lane.b32.xlu2 %v2538_v27, %s2671_s29 }
 0x958   :  { %1706 = vrot.lane.b32.xlu0 %v3540_v32, %s2671_s29 }
 0x95d   :  { %1718 = vrot.lane.b32.xlu2 %v3540_v32, %s2672_s30 }
 0x960   :  { %1849 = vperm.xlu0 %2291, %v2190_v30  }
 0x98f   :  { %v2535_v35 = vpop.permute.xlu2 %2534 }
 0x990   :  { %v2537_v36 = vunpack.i.h.bf16 %v2535_v35  ;;  %v2536_v37 = vunpack.i.l.bf16 %v2535_v35 }
 0x992   :  { %v1796_v39 = vsel %vm128_vm0, %v2536_v37, %v2537_v36 }
 0x993   :  { %v1840_v40 = vpack.c.bf16 %v1796_v39, %v1796_v39 }
 0x995   :  { %v1856_v41 = vsel %vm188_vm3, %v1840_v40, 0 }
 0x996   :  { %1867 = vmatpush.bf16.msra.mxu0 %v1856_v41 }
 0x997   :  { %v1770_v42 = vpop.permute.xlu2 %1769 }
 0x99f   :  { %v2550_v44 = vpop.permute.xlu2 %2549 }
 0x9a0   :  { %v2552_v57 = vunpack.i.h.bf16 %v2550_v44  ;;  %v2551_v58 = vunpack.i.l.bf16 %v2550_v44 }
 0x9a2   :  { %v1760_v7 = vsel %vm89_vm4, %v2551_v58, %v2552_v57 }
 0x9a3   :  { %v1834_v11 = vpack.c.bf16 %v1760_v7, %v3528_v21 }
 0x9a7   :  { %v2540_v34 = vpop.permute.xlu1 %2539  ;;  %v1731_v61 = vpop.permute.xlu2 %1730 }
 0x9a8   :  { %v2542_v54 = vunpack.i.h.bf16 %v2540_v34  ;;  %v2541_v53 = vunpack.i.l.bf16 %v2540_v34 }
 0x9aa   :  { %v1794_v43 = vpop.permute.xlu0 %1793  ;;  %v1772_v59 = vsel %vm102_vm1, %v2541_v53, %v2542_v54  ;;  %v1771_v60 = vsel %vm102_vm1, %v2542_v54, %v1770_v42  ;;  %v1773_v2 = vsel %vm102_vm1, %v1770_v42, %v2541_v53 }
 0x9ab   :  { %v1795_v46 = vsel %vm128_vm0, %v2537_v36, %v1794_v43  ;;  %v1797_v45 = vsel %vm128_vm0, %v1794_v43, %v2536_v37 }
 0x9ac   :  { %v1841_v47 = vpack.c.bf16 %v1795_v46, %v1795_v46  ;;  %v1842_v49 = vpack.c.bf16 %v1797_v45, %v1797_v45 }
 0x9ae   :  { %v1859_v51 = vsel %vm188_vm3, %v1841_v47, 0  ;;  %v1862_v52 = vsel %vm188_vm3, %v1842_v49, 0 }
 0x9af   :  { %v1782_v55 = vpop.permute.xlu1 %1781  ;;  %1880 = vmatpush.bf16.msra.mxu1 %v1859_v51  ;;  %1893 = vmatpush.bf16.msra.mxu2 %v1862_v52  ;;  %v2565_v14 = vpop.permute.xlu2 %2564  ;;  %v2189_v51 = vld [vmem:[%s3737_s1 + $0x20] sm:$0xf] }
 0x9b0   :  { %v2567_v21 = vunpack.i.h.bf16 %v2565_v14  ;;  %v2566_v31 = vunpack.i.l.bf16 %v2565_v14 }
 0x9b2   :  { %v2545_v56 = vpop.permute.xlu0 %2544  ;;  %v1709_v34 = vsel %vm34_vm8, %v2566_v31, %v2567_v21 }
 0x9b3   :  { %v2547_v48 = vunpack.i.h.bf16 %v2545_v56  ;;  %v2546_v50 = vunpack.i.l.bf16 %v2545_v56 }
 0x9b5   :  { %v1784_v63 = vsel %vm115_vm2, %v2546_v50, %v2547_v48  ;;  %v1783_v1 = vsel %vm115_vm2, %v2547_v48, %v1782_v55  ;;  %v1785_v0 = vsel %vm115_vm2, %v1782_v55, %v2546_v50 }
 0x9b6   :  { %v1837_v3 = vpack.c.bf16 %v1784_v63, %v1772_v59  ;;  %v1838_v62 = vpack.c.bf16 %v1783_v1, %v1771_v60  ;;  %v1839_v4 = vpack.c.bf16 %v1785_v0, %v1773_v2 }
 0x9b7   :  { %v2555_v5 = vpop.permute.xlu1 %2554  ;;  %v1719_v39 = vpop.permute.xlu2 %1718 }
 0x9b8   :  { %1868 = vmatpush.bf16.msra.mxu0 %v1837_v3  ;;  %1881 = vmatpush.bf16.msra.mxu1 %v1838_v62  ;;  %v2557_v16 = vunpack.i.h.bf16 %v2555_v5  ;;  %v2556_v17 = vunpack.i.l.bf16 %v2555_v5 }
 0x9b9   :  { %1894 = vmatpush.bf16.msra.mxu2 %v1839_v4  ;;  %v2195_v4 = vld [vmem:[%s3738_s2 + $0x48] sm:$0xff] }
 0x9ba   :  { %v1758_v10 = vpop.permute.xlu0 %1757  ;;  %v1734_v23 = vsel %vm60_vm5, %v1731_v61, %v2556_v17  ;;  %v1733_v24 = vsel %vm60_vm5, %v2556_v17, %v2557_v16  ;;  %v1732_v27 = vsel %vm60_vm5, %v2557_v16, %v1731_v61 }
 0x9bb   :  { %v1759_v8 = vsel %vm89_vm4, %v2552_v57, %v1758_v10  ;;  %v1761_v9 = vsel %vm89_vm4, %v1758_v10, %v2551_v58 }
 0x9bc   :  { %v1835_v12 = vpack.c.bf16 %v1759_v8, %v3531_v22  ;;  %v1836_v13 = vpack.c.bf16 %v1761_v9, %v3540_v32  ;;  %1869 = vmatpush.bf16.msra.mxu0 %v1834_v11 }
 0x9be   :  { %1882 = vmatpush.bf16.msra.mxu1 %v1835_v12  ;;  %1895 = vmatpush.bf16.msra.mxu2 %v1836_v13 }
 0x9bf   :  { %v1743_v15 = vpop.permute.xlu1 %1742 }
 0x9c2   :  { %v2560_v18 = vpop.permute.xlu0 %2559 }
 0x9c3   :  { %v2562_v19 = vunpack.i.h.bf16 %v2560_v18  ;;  %v2561_v20 = vunpack.i.l.bf16 %v2560_v18 }
 0x9c5   :  { %v1746_v22 = vsel %vm73_vm6, %v1743_v15, %v2561_v20  ;;  %v1745_v26 = vsel %vm73_vm6, %v2561_v20, %v2562_v19  ;;  %v1744_v29 = vsel %vm73_vm6, %v2562_v19, %v1743_v15 }
 0x9c6   :  { %v1831_v32 = vpack.c.bf16 %v1746_v22, %v1734_v23  ;;  %v1832_v33 = vpack.c.bf16 %v1745_v26, %v1733_v24  ;;  %v1833_v30 = vpack.c.bf16 %v1744_v29, %v1732_v27 }
 0x9c7   :  { %v2570_v35 = vpop.permute.xlu1 %2569 }
 0x9c8   :  { %v2572_v36 = vunpack.i.h.bf16 %v2570_v35  ;;  %v2571_v37 = vunpack.i.l.bf16 %v2570_v35  ;;  %1870 = vmatpush.bf16.msra.mxu0 %v1831_v32  ;;  %1883 = vmatpush.bf16.msra.mxu1 %v1832_v33 }
 0x9c9   :  { %1896 = vmatpush.bf16.msra.mxu2 %v1833_v30 }
 0x9ca   :  { %v1707_v40 = vpop.permute.xlu0 %1706  ;;  %v1720_v41 = vsel %vm47_vm7, %v2572_v36, %v1719_v39  ;;  %v1722_v42 = vsel %vm47_vm7, %v1719_v39, %v2571_v37  ;;  %v1721_v43 = vsel %vm47_vm7, %v2571_v37, %v2572_v36 }
 0x9cb   :  { %v1708_v44 = vsel %vm34_vm8, %v2567_v21, %v1707_v40  ;;  %v1710_v46 = vsel %vm34_vm8, %v1707_v40, %v2566_v31  ;;  %v1829_v45 = vpack.c.bf16 %v1721_v43, %v1709_v34 }
 0x9cc   :  { %v1828_v47 = vpack.c.bf16 %v1722_v42, %v1710_v46  ;;  %v1830_v49 = vpack.c.bf16 %v1720_v41, %v1708_v44 }
 0x9cd   :  { %1884 = vmatpush.bf16.msra.mxu1 %v1829_v45 }
 0x9ce   :  { %1871 = vmatpush.bf16.msra.mxu0 %v1828_v47  ;;  %1897 = vmatpush.bf16.msra.mxu2 %v1830_v49 }
 0x9d0   :  { %2192 = vmatmul.msk.bf16.vlgmr.msra.gmra.mxu1 %vm184_vm9, %v2189_v51 }
 0x9d1   :  { %2191 = vmatmul.msk.bf16.vlgmr.msra.gmra.mxu0 %vm184_vm9, %v2189_v51  ;;  %2193 = vmatmul.msk.bf16.vlgmr.msra.gmra.mxu2 %vm184_vm9, %v2189_v51 }
 0x9d2   :  { %v1850_v52 = vpop.permute.xlu0 %1849 }
 0xa4d   :  { %v1886_v55 = vpop.f32.mrf.mxu1 }
 0xa4e   :  { %v1887_v54 = vadd.f32 %v1886_v55, %v1850_v52  ;;  %v1873_v53 = vpop.f32.mrf.mxu0 }
 0xa4f   :  { %v1874_v56 = vadd.f32 %v1873_v53, %v1850_v52 }
 0xa50   :  { %v1904_v57 = vmax.f32 %v1887_v54, 0.0 }
 0xa51   :  { %v1903_v58 = vmax.f32 %v1874_v56, 0.0 }
 0xa52   :  { %v3629_v48 = vmul.f32 %v1904_v57, %v2823_v25 }
 0xa53   :  { %v1906_v50 = vmul.f32 %v1903_v58, %v2825_v28 }
 0xa54   :  { %v1899_v59 = vpop.f32.mrf.mxu2 }
 0xa55   :  { %v1900_v60 = vadd.f32 %v1899_v59, %v1850_v52  ;;  %v1888_v61 = vpop.f32.mrf.mxu1  ;;  %v2583_v63 = vpack.i.bf16 %v3629_v48, %v1906_v50 }
 0xa56   :  { %v1875_v1 = vpop.f32.mrf.mxu0 }
 0xa57   :  { %2584 = vrot.lane.b32.xlu0 %v2583_v63, %s2667_s24  ;;  %2579 = vrot.lane.b32.xlu2 %v2583_v63, %s2665_s22  ;;  %v1905_v2 = vmax.f32 %v1900_v60, 0.0 }
 0xa58   :  { %2574 = vrot.lane.b32.xlu1 %v2583_v63, %s2666_s23 }
 0xa59   :  { %v3637_v3 = vmul.f32 %v1905_v2, %v2838_v38  ;;  %v2194_v2 = vld [vmem:[%s3737_s1 + $0x24] sm:$0xf]  ;;  %s2674_s1 = smov [#allocation3]  }
 0xa5b   :  { %v2598_v62 = vpack.i.bf16 %v3637_v3, %v1906_v50 }
 0xa5c   :  { %v1901_v0 = vpop.f32.mrf.mxu2 }
 0xa5f   :  { %1976 = vrot.lane.b32.xlu0 %v3637_v3, %s2665_s22  ;;  %2589 = vrot.lane.b32.xlu2 %v2583_v63, %s2668_s27 }
 0xa60   :  { %1935 = vrot.lane.b32.xlu1 %v3629_v48, %s2669_s28 }
 0xa67   :  { %2599 = vrot.lane.b32.xlu0 %v2598_v62, %s2670_s3  ;;  %2594 = vrot.lane.b32.xlu2 %v2598_v62, %s2669_s28 }
 0xa68   :  { %2000 = vrot.lane.b32.xlu1 %v3637_v3, %s2666_s23 }
 0xa6f   :  { %2609 = vrot.lane.b32.xlu0 %v2598_v62, %s2672_s30  ;;  %2604 = vrot.lane.b32.xlu2 %v2598_v62, %s2671_s29 }
 0xa70   :  { %1988 = vrot.lane.b32.xlu1 %v3637_v3, %s2667_s24  ;;  %s2124_s24 = sshll.u32 %s2674_s1, 4  ;;  %s2125_s24 = int_to_ptr.vmem [resolvable:$true] %s2124_s24 }
 0xa77   :  { %1911 = vrot.lane.b32.xlu0 %v3629_v48, %s2671_s29  ;;  %1947 = vrot.lane.b32.xlu2 %v3629_v48, %s2670_s3  ;;  %s2126_s29 = sshll.u32 %s3740_s4, 4  ;;  %s2127_s29 = int_to_ptr.hbm [resolvable:$true] %s2126_s29 }
 0xa78   :  { %1964 = vrot.lane.b32.xlu1 %v3637_v3, %s2668_s27  ;;  %2129 = dma.vmem_to_hbm [thread:$0]  %s2125_s24, 384, %s2127_s29, [#allocation4]  }
 0xa7f   :  { %2056 = vperm.xlu2 %2372, %v2195_v4  }
 0xa80   :  { %1923 = vrot.lane.b32.xlu1 %v3629_v48, %s2672_s30  ;;  %s2675_s30 = smov [#allocation5]  }
 0xa81   :  { %s2135_s6 = sshll.u32 %s2675_s30, 4  ;;  %s2136_s6 = int_to_ptr.vmem [resolvable:$true] %s2135_s6 }
 0xab1   :  { %v2580_v5 = vpop.permute.xlu2 %2579 }
 0xab2   :  { %v2582_v15 = vunpack.i.h.bf16 %v2580_v5  ;;  %v2581_v16 = vunpack.i.l.bf16 %v2580_v5 }
 0xab4   :  { %v1979_v22 = vsel %vm102_vm1, %v2581_v16, %v2582_v15 }
 0xab9   :  { %v3664_v7 = vpop.permute.xlu2 %2589 }
 0xaba   :  { %v2592_v18 = vunpack.i.h.bf16 %v3664_v7  ;;  %v2591_v19 = vunpack.i.l.bf16 %v3664_v7 }
 0xabc   :  { %v1967_v29 = vsel %vm89_vm4, %v2591_v19, %v2592_v18 }
 0xabd   :  { %v2041_v31 = vpack.c.bf16 %v1967_v29, %v1906_v50 }
 0xac1   :  { %v2595_v26 = vpop.permute.xlu2 %2594 }
 0xac2   :  { %v2597_v32 = vunpack.i.h.bf16 %v2595_v26  ;;  %v2596_v33 = vunpack.i.l.bf16 %v2595_v26 }
 0xac4   :  { %v1941_v34 = vsel %vm60_vm5, %v2597_v32, %v2596_v33 }
 0xac9   :  { %v2585_v10 = vpop.permute.xlu0 %2584  ;;  %v2605_v44 = vpop.permute.xlu2 %2604 }
 0xaca   :  { %v2575_v11 = vpop.permute.xlu1 %2574  ;;  %v2587_v12 = vunpack.i.h.bf16 %v2585_v10  ;;  %v2586_v13 = vunpack.i.l.bf16 %v2585_v10  ;;  %v2607_v49 = vunpack.i.h.bf16 %v2605_v44  ;;  %v2606_v51 = vunpack.i.l.bf16 %v2605_v44 }
 0xacb   :  { %v2577_v8 = vunpack.i.h.bf16 %v2575_v11  ;;  %v2576_v9 = vunpack.i.l.bf16 %v2575_v11 }
 0xacc   :  { %v1991_v21 = vsel %vm115_vm2, %v2586_v13, %v2587_v12  ;;  %v1917_v61 = vsel %vm34_vm8, %v2607_v49, %v2606_v51 }
 0xacd   :  { %v2003_v14 = vsel %vm128_vm0, %v2576_v9, %v2577_v8  ;;  %v2044_v27 = vpack.c.bf16 %v1991_v21, %v1979_v22 }
 0xace   :  { %v2047_v17 = vpack.c.bf16 %v2003_v14, %v2003_v14 }
 0xad0   :  { %v2063_v20 = vsel %vm188_vm3, %v2047_v17, 0 }
 0xad1   :  { %2074 = vmatpush.bf16.msra.mxu3 %v2063_v20  ;;  %v1977_v23 = vpop.permute.xlu0 %1976  ;;  %v1948_v5 = vpop.permute.xlu2 %1947 }
 0xad2   :  { %v1936_v24 = vpop.permute.xlu1 %1935  ;;  %v1978_v56 = vsel %vm102_vm1, %v2582_v15, %v1977_v23  ;;  %v1980_v57 = vsel %vm102_vm1, %v1977_v23, %v2581_v16 }
 0xad5   :  { %2075 = vmatpush.bf16.msra.mxu3 %v2044_v27 }
 0xad9   :  { %2076 = vmatpush.bf16.msra.mxu3 %v2041_v31  ;;  %v2600_v30 = vpop.permute.xlu0 %2599  ;;  %v2057_v21 = vpop.permute.xlu2 %2056 }
 0xada   :  { %v2602_v35 = vunpack.i.h.bf16 %v2600_v30  ;;  %v2601_v36 = vunpack.i.l.bf16 %v2600_v30  ;;  %v2001_v37 = vpop.permute.xlu1 %2000 }
 0xadb   :  { %v2002_v39 = vsel %vm128_vm0, %v2577_v8, %v2001_v37  ;;  %v2004_v40 = vsel %vm128_vm0, %v2001_v37, %v2576_v9  ;;  %v1939_v9 = vsel %vm60_vm5, %v1936_v24, %v2597_v32 }
 0xadc   :  { %v2048_v41 = vpack.c.bf16 %v2002_v39, %v2002_v39  ;;  %v2049_v42 = vpack.c.bf16 %v2004_v40, %v2004_v40  ;;  %v1953_v43 = vsel %vm73_vm6, %v2602_v35, %v2601_v36  ;;  %v1952_v11 = vsel %vm73_vm6, %v2601_v36, %v1948_v5 }
 0xadd   :  { %v2038_v46 = vpack.c.bf16 %v1953_v43, %v1941_v34  ;;  %v1951_v8 = vsel %vm73_vm6, %v1948_v5, %v2602_v35 }
 0xade   :  { %v2066_v45 = vsel %vm188_vm3, %v2048_v41, 0  ;;  %v2069_v47 = vsel %vm188_vm3, %v2049_v42, 0  ;;  %v2040_v15 = vpack.c.bf16 %v1951_v8, %v1939_v9 }
 0xadf   :  { %2087 = vmatpush.bf16.msrb.mxu0 %v2066_v45  ;;  %2100 = vmatpush.bf16.msrb.mxu1 %v2069_v47 }
 0xae0   :  { %2077 = vmatpush.bf16.msra.mxu3 %v2038_v46 }
 0xae1   :  { %v2610_v52 = vpop.permute.xlu0 %2609 }
 0xae2   :  { %v2612_v55 = vunpack.i.h.bf16 %v2610_v52  ;;  %v2611_v54 = vunpack.i.l.bf16 %v2610_v52  ;;  %v1989_v53 = vpop.permute.xlu1 %1988 }
 0xae3   :  { %v1990_v58 = vsel %vm115_vm2, %v2587_v12, %v1989_v53  ;;  %v1992_v50 = vsel %vm115_vm2, %v1989_v53, %v2586_v13  ;;  %v1940_v12 = vsel %vm60_vm5, %v2596_v33, %v1936_v24 }
 0xae4   :  { %v2045_v59 = vpack.c.bf16 %v1990_v58, %v1978_v56  ;;  %v2046_v60 = vpack.c.bf16 %v1992_v50, %v1980_v57  ;;  %v1929_v63 = vsel %vm47_vm7, %v2612_v55, %v2611_v54  ;;  %v2039_v14 = vpack.c.bf16 %v1952_v11, %v1940_v12 }
 0xae5   :  { %v2035_v1 = vpack.c.bf16 %v1929_v63, %v1917_v61 }
 0xae6   :  { %2088 = vmatpush.bf16.msrb.mxu0 %v2045_v59  ;;  %2101 = vmatpush.bf16.msrb.mxu1 %v2046_v60 }
 0xae7   :  { %2078 = vmatpush.bf16.msra.mxu3 %v2035_v1 }
 0xae9   :  { %v1912_v13 = vpop.permute.xlu0 %1911 }
 0xaea   :  { %v1965_v0 = vpop.permute.xlu1 %1964  ;;  %2196 = vmatmul.msk.bf16.vlgmr.msra.gmra.mxu3 %vm184_vm9, %v2194_v2  ;;  %v1916_v16 = vsel %vm34_vm8, %v2606_v51, %v1912_v13 }
 0xaeb   :  { %v1966_v62 = vsel %vm89_vm4, %v2592_v18, %v1965_v0  ;;  %v1968_v4 = vsel %vm89_vm4, %v1965_v0, %v2591_v19 }
 0xaec   :  { %v2042_v7 = vpack.c.bf16 %v1966_v62, %v3629_v48  ;;  %v2043_v10 = vpack.c.bf16 %v1968_v4, %v3637_v3  ;;  %v1915_v3 = vsel %vm34_vm8, %v1912_v13, %v2607_v49 }
 0xaee   :  { %2089 = vmatpush.bf16.msrb.mxu0 %v2042_v7  ;;  %2102 = vmatpush.bf16.msrb.mxu1 %v2043_v10 }
 0xaf2   :  { %v1924_v48 = vpop.permute.xlu1 %1923  ;;  %2090 = vmatpush.bf16.msrb.mxu0 %v2039_v14  ;;  %2103 = vmatpush.bf16.msrb.mxu1 %v2040_v15 }
 0xaf3   :  { %v1927_v17 = vsel %vm47_vm7, %v1924_v48, %v2612_v55  ;;  %v1928_v18 = vsel %vm47_vm7, %v2611_v54, %v1924_v48 }
 0xaf4   :  { %v2036_v19 = vpack.c.bf16 %v1928_v18, %v1916_v16  ;;  %v2037_v20 = vpack.c.bf16 %v1927_v17, %v1915_v3 }
 0xaf6   :  { %2091 = vmatpush.bf16.msrb.mxu0 %v2036_v19  ;;  %2104 = vmatpush.bf16.msrb.mxu1 %v2037_v20 }
 0xaf9   :  { %2197 = vmatmul.msk.bf16.vlgmr.msrb.gmra.mxu0 %vm184_vm9, %v2194_v2  ;;  %2198 = vmatmul.msk.bf16.vlgmr.msrb.gmra.mxu1 %vm184_vm9, %v2194_v2 }
 0xb6d   :  { %v2080_v6 = vpop.f32.mrf.mxu3 }
 0xb6e   :  { %v2081_v23 = vadd.f32 %v2080_v6, %v2057_v21 }
 0xb70   :  { %v2110_v24 = vmax.f32 %v2081_v23, 0.0 }
 0xb72   :  { %v2113_v22 = vmul.f32 %v2110_v24, %v2825_v28 }
 0xb74   :  { %2116 = vst [vmem:[#allocation5] sm:$0xff] %v2113_v22 }
 0xb75   :  { %v2082_v26 = vpop.f32.mrf.mxu3 }
 0xb76   :  { %v2093_v27 = vpop.f32.mrf.mxu0  ;;  %v2106_v29 = vpop.f32.mrf.mxu1 }
 0xb77   :  { %v2094_v31 = vadd.f32 %v2093_v27, %v2057_v21  ;;  %v2107_v32 = vadd.f32 %v2106_v29, %v2057_v21 }
 0xb79   :  { %v2111_v33 = vmax.f32 %v2094_v31, 0.0  ;;  %v2112_v30 = vmax.f32 %v2107_v32, 0.0 }
 0xb7b   :  { %v2114_v35 = vmul.f32 %v2111_v33, %v2823_v25  ;;  %v2115_v36 = vmul.f32 %v2112_v30, %v2838_v38 }
 0xb7d   :  { %2117 = vst [vmem:[#allocation5 + $0x8] sm:$0xff] %v2114_v35 }
 0xb7e   :  { %2118 = vst [vmem:[#allocation5 + $0x10] sm:$0xff] %v2115_v36  ;;  %v2095_v28 = vpop.f32.mrf.mxu0  ;;  %v2108_v37 = vpop.f32.mrf.mxu1 }
 0xb7f   :  { %2140 = dma.vmem_to_hbm [thread:$0]  %s2136_s6, 384, %s2138_s8, [#allocation6]  }
 0xb80   :  { %2661 = dma.done.wait [#allocation4], 384  }
 0xb81   :  { %2662 = vsyncadd [#allocation4], 4294966912 }
 0xb82   :  { %2663 = dma.done.wait [#allocation6], 384  }
 0xb83   :  { %2664 = vsyncadd [#allocation6], 4294966912 }
 0xb84   :  { %2149 = vsyncpa [#allocation4], 1 }
 0xb85   :  { %2150 = vsyncpa [#allocation6], 1 }

</bundles_post_ra>
